<compile_context>
chip_gen: v7x
topology: tpu7x:2x2x1
jax: 0.10.0
libtpu: 0.0.40
codegen_flags: <defaults>
</compile_context>

<pallas_src>
import jax
import jax.numpy as jnp
import numpy as np
from jax.experimental import pallas as pl
from jax.experimental.pallas import tpu as pltpu


# ----------------------------- kernel ----------------------------------------
def _make_bottleneck_kernel(H, W, Cmid, K_use, batch_block, stage2_mode):
    """Builds the kernel body (static shape params captured by closure)."""
    P = H * W

    def kernel(x_ref, w1_ref, b1_ref, w2_ref, b2_ref, w3_ref, b3_ref,
               o_ref, pad_ref, *scratch):
        cdt = pad_ref.dtype                       # compute/storage dtype
        Cmid_p = w1_ref.shape[1]
        K_p = w2_ref.shape[0]
        Wp2 = pad_ref.shape[1]                    # sublane-aligned W + 2

        if stage2_mode == "im2col":
            im_ref = scratch[0]
            # Zero only the padded K tail once per step (w2 rows there are 0,
            # but uninitialized VMEM could hold NaNs).
            if K_p > K_use:
                im_ref[:, K_use:] = jnp.zeros((P, K_p - K_use), cdt)

        for b in range(batch_block):
            x_flat = x_ref[b]                     # (P, Cin_p)

            # --- stage 1: 1x1 conv (BN folded) + bias + ReLU -----------------
            y1 = jnp.dot(x_flat, w1_ref[...], preferred_element_type=jnp.float32)
            y1 = jnp.maximum(y1 + b1_ref[...], 0.0).astype(cdt)

            # --- stage 2: 3x3 conv, padding=1 --------------------------------
            # Zero only the halo border; interior written once per image.
            pad_ref[0:1, :, :] = jnp.zeros((1, Wp2, Cmid), cdt)
            pad_ref[H + 1:H + 2, :, :] = jnp.zeros((1, Wp2, Cmid), cdt)
            pad_ref[:, 0:1, :] = jnp.zeros((H + 2, 1, Cmid), cdt)
            pad_ref[:, W + 1:W + 2, :] = jnp.zeros((H + 2, 1, Cmid), cdt)
            pad_ref[1:H + 1, 1:W + 1, :] = y1[:, :Cmid].reshape(H, W, Cmid)

            if stage2_mode == "im2col":
                # Taps packed contiguously: K_useful = 9*Cmid (single padding
                # of the TOTAL K to a lane multiple, done in the wrapper).
                for dy in range(3):
                    for dx in range(3):
                        k = dy * 3 + dx
                        im_ref[:, k * Cmid:(k + 1) * Cmid] = (
                            pad_ref[dy:dy + H, dx:dx + W, :].reshape(P, Cmid))
                y2 = jnp.dot(im_ref[...], w2_ref[...],
                             preferred_element_type=jnp.float32)
            else:
                # "direct": 9 accumulating dots, no im2col buffer (v7x MRB).
                y2 = jnp.zeros((P, Cmid_p), jnp.float32)
                for dy in range(3):
                    for dx in range(3):
                        k = dy * 3 + dx
                        patch = pad_ref[dy:dy + H, dx:dx + W, :].reshape(P, Cmid)
                        y2 = y2 + jnp.dot(patch,
                                          w2_ref[k * Cmid:(k + 1) * Cmid, :],
                                          preferred_element_type=jnp.float32)
            y2 = jnp.maximum(y2 + b2_ref[...], 0.0).astype(cdt)

            # --- stage 3: 1x1 expansion + bias, identity skip, final ReLU ----
            y3 = jnp.dot(y2, w3_ref[...], preferred_element_type=jnp.float32)
            out = jnp.maximum(y3 + b3_ref[...] + x_flat.astype(jnp.float32), 0.0)
            o_ref[b] = out.astype(o_ref.dtype)

    return kernel


# ----------------------------- wrapper ----------------------------------------
def _fold_bn(gamma, beta, mean, var, eps=1e-5):
    scale = gamma / jnp.sqrt(var + eps)
    bias = beta - mean * scale
    return scale, bias


def _round_up(v, m):
    return ((v + m - 1) // m) * m


def bottleneck_forward(x_nchw, params, *, compute_dtype=jnp.bfloat16,
                       batch_block=1, stage2_mode="im2col", lane=128):
    """params = ((w1, bn1), (w2, bn2), (w3, bn3)) in PyTorch layouts.

    stage2_mode: "im2col" (single big-K matmul; v5e/v6e default) or
                 "direct"  (9 accumulating dots, no im2col buffer; v7x).
    """
    (w1, bn1), (w2, bn2), (w3, bn3) = params
    N, Cin, H, W = x_nchw.shape
    Cmid = w1.shape[0]
    Cout = w3.shape[0]
    assert Cout == Cin, "projection=None (identity skip) requires Cin == inner*4"
    assert N % batch_block == 0, "batch_block must divide N"
    assert stage2_mode in ("im2col", "direct")
    # TODO(synk): projection / stride>1 path not implemented.

    s1, b1 = _fold_bn(*bn1)
    s2, b2 = _fold_bn(*bn2)
    s3, b3 = _fold_bn(*bn3)

    # Fold BN scale into the conv weights (per output channel).
    w1f = w1[:, :, 0, 0] * s1[:, None]                    # (Cmid, Cin)
    w2f = w2 * s2[:, None, None, None]                    # (Cmid, Cmid, 3, 3)
    w3f = w3[:, :, 0, 0] * s3[:, None]                    # (Cout, Cmid)

    # Lane-dense channel padding (K of the 3x3 conv padded once, not per-tap).
    Cin_p = _round_up(Cin, lane)
    Cmid_p = _round_up(Cmid, lane)
    Cout_p = _round_up(Cout, lane)
    K_use = 9 * Cmid
    K_p = _round_up(K_use, lane)
    P = H * W
    Wp2 = _round_up(W + 2, 8)                             # sublane-aligned halo

    w1_k = jnp.zeros((Cin_p, Cmid_p), compute_dtype).at[:Cin, :Cmid].set(
        jnp.transpose(w1f).astype(compute_dtype))
    # im2col layout: row index = (dy*3 + dx)*Cmid + c_in -> packed taps.
    w2_t = jnp.transpose(w2f, (2, 3, 1, 0)).reshape(K_use, Cmid)
    w2_k = jnp.zeros((K_p, Cmid_p), compute_dtype).at[:K_use, :Cmid].set(
        w2_t.astype(compute_dtype))
    w3_k = jnp.zeros((Cmid_p, Cout_p), compute_dtype).at[:Cmid, :Cout].set(
        jnp.transpose(w3f).astype(compute_dtype))

    b1_k = jnp.zeros((1, Cmid_p), jnp.float32).at[0, :Cmid].set(b1)
    b2_k = jnp.zeros((1, Cmid_p), jnp.float32).at[0, :Cmid].set(b2)
    b3_k = jnp.zeros((1, Cout_p), jnp.float32).at[0, :Cout].set(b3)

    # Flatten (H, W) -> P in the wrapper (keeps in-kernel refs 2-D per image).
    x_flat = jnp.transpose(x_nchw, (0, 2, 3, 1)).reshape(N, P, Cin)
    x_p = jnp.zeros((N, P, Cin_p), compute_dtype).at[..., :Cin].set(
        x_flat.astype(compute_dtype))

    # --- VMEM budget (no double counting; pipeline double-buffers blocks) ----
    bpe = jnp.dtype(compute_dtype).itemsize
    act_blk = batch_block * P * (Cin_p + Cout_p) * bpe
    w_bytes = (w1_k.size + w2_k.size + w3_k.size) * bpe \
        + (b1_k.size + b2_k.size + b3_k.size) * 4
    scratch_bytes = (H + 2) * Wp2 * Cmid * bpe
    if stage2_mode == "im2col":
        scratch_bytes += P * K_p * bpe
    vmem_need = 2 * act_blk + 2 * w_bytes + scratch_bytes
    try:
        phys_vmem = int(pltpu.get_tpu_info().vmem_capacity_bytes)
    except Exception:
        phys_vmem = 64 * 1024 * 1024
    cap = (phys_vmem * 7) // 8          # leave headroom for compiler scratch
    vmem_limit = int(min(cap, max(vmem_need + (4 << 20), 32 << 20)))

    scratch_shapes = [pltpu.VMEM((H + 2, Wp2, Cmid), compute_dtype)]
    if stage2_mode == "im2col":
        scratch_shapes.append(pltpu.VMEM((P, K_p), compute_dtype))

    # Weight/bias index maps are constant across the grid, so Mosaic does not
    # re-DMA them between steps (single fetch, default buffering kept).
    grid_spec = pltpu.PrefetchScalarGridSpec(
        num_scalar_prefetch=0,
        grid=(N // batch_block,),
        in_specs=[
            pl.BlockSpec((batch_block, P, Cin_p), lambda n: (n, 0, 0)),
            pl.BlockSpec((Cin_p, Cmid_p), lambda n: (0, 0)),
            pl.BlockSpec((1, Cmid_p), lambda n: (0, 0)),
            pl.BlockSpec((K_p, Cmid_p), lambda n: (0, 0)),
            pl.BlockSpec((1, Cmid_p), lambda n: (0, 0)),
            pl.BlockSpec((Cmid_p, Cout_p), lambda n: (0, 0)),
            pl.BlockSpec((1, Cout_p), lambda n: (0, 0)),
        ],
        out_specs=pl.BlockSpec((batch_block, P, Cout_p), lambda n: (n, 0, 0)),
        scratch_shapes=scratch_shapes,
    )

    flops = 2 * N * P * (Cin * Cmid + 9 * Cmid * Cmid + Cmid * Cout)
    bytes_accessed = (x_p.size + N * P * Cout_p) * bpe + w_bytes
    cost = pl.CostEstimate(flops=int(flops), transcendentals=0,
                           bytes_accessed=int(bytes_accessed))

    kernel = _make_bottleneck_kernel(H, W, Cmid, K_use, batch_block, stage2_mode)

    out_p = pl.pallas_call(
        kernel,
        out_shape=jax.ShapeDtypeStruct((N, P, Cout_p), compute_dtype),
        grid_spec=grid_spec,
        compiler_params=pltpu.CompilerParams(
            dimension_semantics=("parallel",),
            vmem_limit_bytes=vmem_limit),
        cost_estimate=cost,
    )(x_p, w1_k, b1_k, w2_k, b2_k, w3_k, b3_k)

    out = out_p[..., :Cout].reshape(N, H, W, Cout).astype(jnp.float32)
    return jnp.transpose(out, (0, 3, 1, 2))                 # back to NCHW


# ----------------------------- reference (plain JAX) -------------------------
def reference_forward(x, params):
    (w1, bn1), (w2, bn2), (w3, bn3) = params

    def conv(x, w, pad):
        return jax.lax.conv_general_dilated(
            x, w, window_strides=(1, 1), padding=[(pad, pad), (pad, pad)],
            dimension_numbers=('NCHW', 'OIHW', 'NCHW'))

    def bn(x, p):
        gamma, beta, mean, var = p
        s = gamma / jnp.sqrt(var + 1e-5)
        b = beta - mean * s
        return x * s[None, :, None, None] + b[None, :, None, None]

    r = jax.nn.relu(bn(conv(x, w1, 0), bn1))
    r = jax.nn.relu(bn(conv(r, w2, 1), bn2))
    r = bn(conv(r, w3, 0), bn3)
    return jax.nn.relu(r + x)


if __name__ == "__main__":
    key = jax.random.PRNGKey(0)
    N, H, W = 2, 16, 16
    inner = 4
    Cin = inner * 4      # expansion = 4; identity skip requires Cin == inner*4
    Cout = inner * 4

    ks = jax.random.split(key, 8)
    x = jax.random.normal(ks[0], (N, Cin, H, W), jnp.float32)

    def make_bn(k, c):
        k1, k2, k3, k4 = jax.random.split(k, 4)
        gamma = 1.0 + 0.1 * jax.random.normal(k1, (c,), jnp.float32)
        beta = 0.1 * jax.random.normal(k2, (c,), jnp.float32)
        mean = 0.1 * jax.random.normal(k3, (c,), jnp.float32)
        var = 1.0 + 0.1 * jax.random.uniform(k4, (c,), jnp.float32)
        return gamma, beta, mean, var

    w1 = 0.2 * jax.random.normal(ks[1], (inner, Cin, 1, 1), jnp.float32)
    w2 = 0.2 * jax.random.normal(ks[2], (inner, inner, 3, 3), jnp.float32)
    w3 = 0.2 * jax.random.normal(ks[3], (Cout, inner, 1, 1), jnp.float32)
    params = ((w1, make_bn(ks[4], inner)),
              (w2, make_bn(ks[5], inner)),
              (w3, make_bn(ks[6], Cout)))

    ref = reference_forward(x, params)

    # f32 / im2col / 1 image per step: structural correctness (tight tol).
    out_a = jax.block_until_ready(bottleneck_forward(
        x, params, compute_dtype=jnp.float32, batch_block=1,
        stage2_mode="im2col"))
    np.testing.assert_allclose(np.asarray(out_a), np.asarray(ref),
                               rtol=1e-4, atol=1e-4)

    # f32 / direct 9-dot (v7x path) / 2 images per step: tight tol.
    out_b = jax.block_until_ready(bottleneck_forward(
        x, params, compute_dtype=jnp.float32, batch_block=2,
        stage2_mode="direct"))
    np.testing.assert_allclose(np.asarray(out_b), np.asarray(ref),
                               rtol=1e-4, atol=1e-4)

    # bf16 / im2col (default perf config): looser tolerance.
    out_c = jax.block_until_ready(bottleneck_forward(
        x, params, compute_dtype=jnp.bfloat16, batch_block=1,
        stage2_mode="im2col"))
    np.testing.assert_allclose(np.asarray(out_c), np.asarray(ref),
                               rtol=5e-2, atol=5e-2)

    print("KERNEL_OK")
</pallas_src>

<mosaic_0001>
module attributes {stable_mosaic.version = 11 : i64} {
  func.func @kernel(%arg0: i32, %arg1: memref<1x256x128xf32, #tpu.memory_space<vmem>>, %arg2: memref<128x128xf32, #tpu.memory_space<vmem>>, %arg3: memref<1x128xf32, #tpu.memory_space<vmem>>, %arg4: memref<128x128xf32, #tpu.memory_space<vmem>>, %arg5: memref<1x128xf32, #tpu.memory_space<vmem>>, %arg6: memref<128x128xf32, #tpu.memory_space<vmem>>, %arg7: memref<1x128xf32, #tpu.memory_space<vmem>>, %arg8: memref<1x256x128xf32, #tpu.memory_space<vmem>>, %arg9: memref<18x24x4xf32, #tpu.memory_space<vmem>>, %arg10: memref<256x128xf32, #tpu.memory_space<vmem>>) attributes {dimension_semantics = [#tpu.dimension_semantics<parallel>], iteration_bounds = array<i64: 2>, scalar_prefetch = 0 : i64, scratch_operands = 2 : i64, tpu.core_type = #tpu.core_type<tc>, window_params = [{transform_indices = @transform_0, window_bounds = array<i64: 1, 256, 128>}, {pipeline_mode = #tpu.pipeline_mode<synchronous>, transform_indices = @transform_1, window_bounds = array<i64: 128, 128>}, {pipeline_mode = #tpu.pipeline_mode<synchronous>, transform_indices = @transform_2, window_bounds = array<i64: 1, 128>}, {pipeline_mode = #tpu.pipeline_mode<synchronous>, transform_indices = @transform_3, window_bounds = array<i64: 128, 128>}, {pipeline_mode = #tpu.pipeline_mode<synchronous>, transform_indices = @transform_4, window_bounds = array<i64: 1, 128>}, {pipeline_mode = #tpu.pipeline_mode<synchronous>, transform_indices = @transform_5, window_bounds = array<i64: 128, 128>}, {pipeline_mode = #tpu.pipeline_mode<synchronous>, transform_indices = @transform_6, window_bounds = array<i64: 1, 128>}, {transform_indices = @transform_7, window_bounds = array<i64: 1, 256, 128>}]} {
    %cst = arith.constant 0.000000e+00 : f32
    %0 = vector.broadcast %cst : f32 to vector<256x92xf32>
    %c0 = arith.constant 0 : index
    %c36 = arith.constant 36 : index
    %1 = vector.load %arg10[%c0, %c36] : memref<256x128xf32, #tpu.memory_space<vmem>>, vector<256x92xf32>
    tpu.vector_store %arg10[%c0, %c36], %0 {strides = array<i32>} : memref<256x128xf32, #tpu.memory_space<vmem>>, vector<256x92xf32>,
    %c0_0 = arith.constant 0 : index
    %c0_1 = arith.constant 0 : index
    %c0_2 = arith.constant 0 : index
    %2 = vector.load %arg1[%c0_0, %c0_1, %c0_2] : memref<1x256x128xf32, #tpu.memory_space<vmem>>, vector<1x256x128xf32>
    %3 = vector.shape_cast %2 : vector<1x256x128xf32> to vector<256x128xf32>
    %c0_3 = arith.constant 0 : index
    %c0_4 = arith.constant 0 : index
    %4 = vector.load %arg2[%c0_3, %c0_4] : memref<128x128xf32, #tpu.memory_space<vmem>>, vector<128x128xf32>
    %cst_5 = arith.constant dense<0.000000e+00> : vector<256x128xf32>
    %5 = tpu.matmul %3, %4, %cst_5 {dimension_numbers = #tpu.dot_dimension_numbers<[1], [0], [0], [1], [0, 0, 1, 1], [], []>} : vector<256x128xf32>, vector<128x128xf32>, vector<256x128xf32> -> vector<256x128xf32>
    %c0_6 = arith.constant 0 : index
    %c0_7 = arith.constant 0 : index
    %6 = vector.load %arg3[%c0_6, %c0_7] : memref<1x128xf32, #tpu.memory_space<vmem>>, vector<1x128xf32>
    %7 = vector.broadcast %6 : vector<1x128xf32> to vector<256x128xf32>
    %8 = arith.addf %5, %7 : vector<256x128xf32>
    %cst_8 = arith.constant 0.000000e+00 : f32
    %9 = vector.broadcast %cst_8 : f32 to vector<256x128xf32>
    %10 = arith.maximumf %8, %9 : vector<256x128xf32>
    %cst_9 = arith.constant 0.000000e+00 : f32
    %11 = vector.broadcast %cst_9 : f32 to vector<1x24x4xf32>
    %c0_10 = arith.constant 0 : index
    %c0_11 = arith.constant 0 : index
    %c0_12 = arith.constant 0 : index
    %12 = vector.load %arg9[%c0_10, %c0_11, %c0_12] : memref<18x24x4xf32, #tpu.memory_space<vmem>>, vector<1x24x4xf32>
    tpu.vector_store %arg9[%c0_10, %c0_11, %c0_12], %11 {strides = array<i32>} : memref<18x24x4xf32, #tpu.memory_space<vmem>>, vector<1x24x4xf32>,
    %cst_13 = arith.constant 0.000000e+00 : f32
    %13 = vector.broadcast %cst_13 : f32 to vector<1x24x4xf32>
    %c17 = arith.constant 17 : index
    %c0_14 = arith.constant 0 : index
    %c0_15 = arith.constant 0 : index
    %14 = vector.load %arg9[%c17, %c0_14, %c0_15] : memref<18x24x4xf32, #tpu.memory_space<vmem>>, vector<1x24x4xf32>
    tpu.vector_store %arg9[%c17, %c0_14, %c0_15], %13 {strides = array<i32>} : memref<18x24x4xf32, #tpu.memory_space<vmem>>, vector<1x24x4xf32>,
    %cst_16 = arith.constant 0.000000e+00 : f32
    %15 = vector.broadcast %cst_16 : f32 to vector<18x1x4xf32>
    %c0_17 = arith.constant 0 : index
    %c0_18 = arith.constant 0 : index
    %c0_19 = arith.constant 0 : index
    %16 = vector.load %arg9[%c0_17, %c0_18, %c0_19] : memref<18x24x4xf32, #tpu.memory_space<vmem>>, vector<18x1x4xf32>
    tpu.vector_store %arg9[%c0_17, %c0_18, %c0_19], %15 {strides = array<i32>} : memref<18x24x4xf32, #tpu.memory_space<vmem>>, vector<18x1x4xf32>,
    %cst_20 = arith.constant 0.000000e+00 : f32
    %17 = vector.broadcast %cst_20 : f32 to vector<18x1x4xf32>
    %c0_21 = arith.constant 0 : index
    %c17_22 = arith.constant 17 : index
    %c0_23 = arith.constant 0 : index
    %18 = vector.load %arg9[%c0_21, %c17_22, %c0_23] : memref<18x24x4xf32, #tpu.memory_space<vmem>>, vector<18x1x4xf32>
    tpu.vector_store %arg9[%c0_21, %c17_22, %c0_23], %17 {strides = array<i32>} : memref<18x24x4xf32, #tpu.memory_space<vmem>>, vector<18x1x4xf32>,
    %19 = vector.extract_strided_slice %10 {offsets = [0, 0], sizes = [256, 4], strides = [1, 1]} : vector<256x128xf32> to vector<256x4xf32>
    %20 = vector.shape_cast %19 : vector<256x4xf32> to vector<16x16x4xf32>
    %c1 = arith.constant 1 : index
    %c1_24 = arith.constant 1 : index
    %c0_25 = arith.constant 0 : index
    %21 = vector.load %arg9[%c1, %c1_24, %c0_25] : memref<18x24x4xf32, #tpu.memory_space<vmem>>, vector<16x16x4xf32>
    tpu.vector_store %arg9[%c1, %c1_24, %c0_25], %20 {strides = array<i32>} : memref<18x24x4xf32, #tpu.memory_space<vmem>>, vector<16x16x4xf32>,
    %c0_26 = arith.constant 0 : index
    %c0_27 = arith.constant 0 : index
    %c0_28 = arith.constant 0 : index
    %22 = vector.load %arg9[%c0_26, %c0_27, %c0_28] : memref<18x24x4xf32, #tpu.memory_space<vmem>>, vector<16x16x4xf32>
    %23 = vector.shape_cast %22 : vector<16x16x4xf32> to vector<256x4xf32>
    %c0_29 = arith.constant 0 : index
    %c0_30 = arith.constant 0 : index
    %24 = vector.load %arg10[%c0_29, %c0_30] : memref<256x128xf32, #tpu.memory_space<vmem>>, vector<256x4xf32>
    tpu.vector_store %arg10[%c0_29, %c0_30], %23 {strides = array<i32>} : memref<256x128xf32, #tpu.memory_space<vmem>>, vector<256x4xf32>,
    %c0_31 = arith.constant 0 : index
    %c1_32 = arith.constant 1 : index
    %c0_33 = arith.constant 0 : index
    %25 = vector.load %arg9[%c0_31, %c1_32, %c0_33] : memref<18x24x4xf32, #tpu.memory_space<vmem>>, vector<16x16x4xf32>
    %26 = vector.shape_cast %25 : vector<16x16x4xf32> to vector<256x4xf32>
    %c0_34 = arith.constant 0 : index
    %c4 = arith.constant 4 : index
    %27 = vector.load %arg10[%c0_34, %c4] : memref<256x128xf32, #tpu.memory_space<vmem>>, vector<256x4xf32>
    tpu.vector_store %arg10[%c0_34, %c4], %26 {strides = array<i32>} : memref<256x128xf32, #tpu.memory_space<vmem>>, vector<256x4xf32>,
    %c0_35 = arith.constant 0 : index
    %c2 = arith.constant 2 : index
    %c0_36 = arith.constant 0 : index
    %28 = vector.load %arg9[%c0_35, %c2, %c0_36] : memref<18x24x4xf32, #tpu.memory_space<vmem>>, vector<16x16x4xf32>
    %29 = vector.shape_cast %28 : vector<16x16x4xf32> to vector<256x4xf32>
    %c0_37 = arith.constant 0 : index
    %c8 = arith.constant 8 : index
    %30 = vector.load %arg10[%c0_37, %c8] : memref<256x128xf32, #tpu.memory_space<vmem>>, vector<256x4xf32>
    tpu.vector_store %arg10[%c0_37, %c8], %29 {strides = array<i32>} : memref<256x128xf32, #tpu.memory_space<vmem>>, vector<256x4xf32>,
    %c1_38 = arith.constant 1 : index
    %c0_39 = arith.constant 0 : index
    %c0_40 = arith.constant 0 : index
    %31 = vector.load %arg9[%c1_38, %c0_39, %c0_40] : memref<18x24x4xf32, #tpu.memory_space<vmem>>, vector<16x16x4xf32>
    %32 = vector.shape_cast %31 : vector<16x16x4xf32> to vector<256x4xf32>
    %c0_41 = arith.constant 0 : index
    %c12 = arith.constant 12 : index
    %33 = vector.load %arg10[%c0_41, %c12] : memref<256x128xf32, #tpu.memory_space<vmem>>, vector<256x4xf32>
    tpu.vector_store %arg10[%c0_41, %c12], %32 {strides = array<i32>} : memref<256x128xf32, #tpu.memory_space<vmem>>, vector<256x4xf32>,
    %c1_42 = arith.constant 1 : index
    %c1_43 = arith.constant 1 : index
    %c0_44 = arith.constant 0 : index
    %34 = vector.load %arg9[%c1_42, %c1_43, %c0_44] : memref<18x24x4xf32, #tpu.memory_space<vmem>>, vector<16x16x4xf32>
    %35 = vector.shape_cast %34 : vector<16x16x4xf32> to vector<256x4xf32>
    %c0_45 = arith.constant 0 : index
    %c16 = arith.constant 16 : index
    %36 = vector.load %arg10[%c0_45, %c16] : memref<256x128xf32, #tpu.memory_space<vmem>>, vector<256x4xf32>
    tpu.vector_store %arg10[%c0_45, %c16], %35 {strides = array<i32>} : memref<256x128xf32, #tpu.memory_space<vmem>>, vector<256x4xf32>,
    %c1_46 = arith.constant 1 : index
    %c2_47 = arith.constant 2 : index
    %c0_48 = arith.constant 0 : index
    %37 = vector.load %arg9[%c1_46, %c2_47, %c0_48] : memref<18x24x4xf32, #tpu.memory_space<vmem>>, vector<16x16x4xf32>
    %38 = vector.shape_cast %37 : vector<16x16x4xf32> to vector<256x4xf32>
    %c0_49 = arith.constant 0 : index
    %c20 = arith.constant 20 : index
    %39 = vector.load %arg10[%c0_49, %c20] : memref<256x128xf32, #tpu.memory_space<vmem>>, vector<256x4xf32>
    tpu.vector_store %arg10[%c0_49, %c20], %38 {strides = array<i32>} : memref<256x128xf32, #tpu.memory_space<vmem>>, vector<256x4xf32>,
    %c2_50 = arith.constant 2 : index
    %c0_51 = arith.constant 0 : index
    %c0_52 = arith.constant 0 : index
    %40 = vector.load %arg9[%c2_50, %c0_51, %c0_52] : memref<18x24x4xf32, #tpu.memory_space<vmem>>, vector<16x16x4xf32>
    %41 = vector.shape_cast %40 : vector<16x16x4xf32> to vector<256x4xf32>
    %c0_53 = arith.constant 0 : index
    %c24 = arith.constant 24 : index
    %42 = vector.load %arg10[%c0_53, %c24] : memref<256x128xf32, #tpu.memory_space<vmem>>, vector<256x4xf32>
    tpu.vector_store %arg10[%c0_53, %c24], %41 {strides = array<i32>} : memref<256x128xf32, #tpu.memory_space<vmem>>, vector<256x4xf32>,
    %c2_54 = arith.constant 2 : index
    %c1_55 = arith.constant 1 : index
    %c0_56 = arith.constant 0 : index
    %43 = vector.load %arg9[%c2_54, %c1_55, %c0_56] : memref<18x24x4xf32, #tpu.memory_space<vmem>>, vector<16x16x4xf32>
    %44 = vector.shape_cast %43 : vector<16x16x4xf32> to vector<256x4xf32>
    %c0_57 = arith.constant 0 : index
    %c28 = arith.constant 28 : index
    %45 = vector.load %arg10[%c0_57, %c28] : memref<256x128xf32, #tpu.memory_space<vmem>>, vector<256x4xf32>
    tpu.vector_store %arg10[%c0_57, %c28], %44 {strides = array<i32>} : memref<256x128xf32, #tpu.memory_space<vmem>>, vector<256x4xf32>,
    %c2_58 = arith.constant 2 : index
    %c2_59 = arith.constant 2 : index
    %c0_60 = arith.constant 0 : index
    %46 = vector.load %arg9[%c2_58, %c2_59, %c0_60] : memref<18x24x4xf32, #tpu.memory_space<vmem>>, vector<16x16x4xf32>
    %47 = vector.shape_cast %46 : vector<16x16x4xf32> to vector<256x4xf32>
    %c0_61 = arith.constant 0 : index
    %c32 = arith.constant 32 : index
    %48 = vector.load %arg10[%c0_61, %c32] : memref<256x128xf32, #tpu.memory_space<vmem>>, vector<256x4xf32>
    tpu.vector_store %arg10[%c0_61, %c32], %47 {strides = array<i32>} : memref<256x128xf32, #tpu.memory_space<vmem>>, vector<256x4xf32>,
    %c0_62 = arith.constant 0 : index
    %c0_63 = arith.constant 0 : index
    %49 = vector.load %arg10[%c0_62, %c0_63] : memref<256x128xf32, #tpu.memory_space<vmem>>, vector<256x128xf32>
    %c0_64 = arith.constant 0 : index
    %c0_65 = arith.constant 0 : index
    %50 = vector.load %arg4[%c0_64, %c0_65] : memref<128x128xf32, #tpu.memory_space<vmem>>, vector<128x128xf32>
    %cst_66 = arith.constant dense<0.000000e+00> : vector<256x128xf32>
    %51 = tpu.matmul %49, %50, %cst_66 {dimension_numbers = #tpu.dot_dimension_numbers<[1], [0], [0], [1], [0, 0, 1, 1], [], []>} : vector<256x128xf32>, vector<128x128xf32>, vector<256x128xf32> -> vector<256x128xf32>
    %c0_67 = arith.constant 0 : index
    %c0_68 = arith.constant 0 : index
    %52 = vector.load %arg5[%c0_67, %c0_68] : memref<1x128xf32, #tpu.memory_space<vmem>>, vector<1x128xf32>
    %53 = vector.broadcast %52 : vector<1x128xf32> to vector<256x128xf32>
    %54 = arith.addf %51, %53 : vector<256x128xf32>
    %cst_69 = arith.constant 0.000000e+00 : f32
    %55 = vector.broadcast %cst_69 : f32 to vector<256x128xf32>
    %56 = arith.maximumf %54, %55 : vector<256x128xf32>
    %c0_70 = arith.constant 0 : index
    %c0_71 = arith.constant 0 : index
    %57 = vector.load %arg6[%c0_70, %c0_71] : memref<128x128xf32, #tpu.memory_space<vmem>>, vector<128x128xf32>
    %cst_72 = arith.constant dense<0.000000e+00> : vector<256x128xf32>
    %58 = tpu.matmul %56, %57, %cst_72 {dimension_numbers = #tpu.dot_dimension_numbers<[1], [0], [0], [1], [0, 0, 1, 1], [], []>} : vector<256x128xf32>, vector<128x128xf32>, vector<256x128xf32> -> vector<256x128xf32>
    %c0_73 = arith.constant 0 : index
    %c0_74 = arith.constant 0 : index
    %59 = vector.load %arg7[%c0_73, %c0_74] : memref<1x128xf32, #tpu.memory_space<vmem>>, vector<1x128xf32>
    %60 = vector.broadcast %59 : vector<1x128xf32> to vector<256x128xf32>
    %61 = arith.addf %58, %60 : vector<256x128xf32>
    %62 = arith.addf %61, %3 : vector<256x128xf32>
    %cst_75 = arith.constant 0.000000e+00 : f32
    %63 = vector.broadcast %cst_75 : f32 to vector<256x128xf32>
    %64 = arith.maximumf %62, %63 : vector<256x128xf32>
    %c0_76 = arith.constant 0 : index
    %c0_77 = arith.constant 0 : index
    %c0_78 = arith.constant 0 : index
    %65 = vector.load %arg8[%c0_76, %c0_77, %c0_78] : memref<1x256x128xf32, #tpu.memory_space<vmem>>, vector<1x256x128xf32>
    %66 = vector.shape_cast %65 : vector<1x256x128xf32> to vector<256x128xf32>
    %67 = vector.shape_cast %64 : vector<256x128xf32> to vector<1x256x128xf32>
    tpu.vector_store %arg8[%c0_76, %c0_77, %c0_78], %67 {strides = array<i32>} : memref<1x256x128xf32, #tpu.memory_space<vmem>>, vector<1x256x128xf32>,
    return
  }
  func.func @transform_0(%arg0: i32) -> (i32, i32, i32) {
    %c0_i32 = arith.constant 0 : i32
    %c0_i32_0 = arith.constant 0 : i32
    %c0_i32_1 = arith.constant 0 : i32
    return %arg0, %c0_i32, %c0_i32_0 : i32, i32, i32
  }
  func.func @transform_1(%arg0: i32) -> (i32, i32) {
    %c0_i32 = arith.constant 0 : i32
    %c0_i32_0 = arith.constant 0 : i32
    %c0_i32_1 = arith.constant 0 : i32
    return %c0_i32, %c0_i32_0 : i32, i32
  }
  func.func @transform_2(%arg0: i32) -> (i32, i32) {
    %c0_i32 = arith.constant 0 : i32
    %c0_i32_0 = arith.constant 0 : i32
    %c0_i32_1 = arith.constant 0 : i32
    return %c0_i32, %c0_i32_0 : i32, i32
  }
  func.func @transform_3(%arg0: i32) -> (i32, i32) {
    %c0_i32 = arith.constant 0 : i32
    %c0_i32_0 = arith.constant 0 : i32
    %c0_i32_1 = arith.constant 0 : i32
    return %c0_i32, %c0_i32_0 : i32, i32
  }
  func.func @transform_4(%arg0: i32) -> (i32, i32) {
    %c0_i32 = arith.constant 0 : i32
    %c0_i32_0 = arith.constant 0 : i32
    %c0_i32_1 = arith.constant 0 : i32
    return %c0_i32, %c0_i32_0 : i32, i32
  }
  func.func @transform_5(%arg0: i32) -> (i32, i32) {
    %c0_i32 = arith.constant 0 : i32
    %c0_i32_0 = arith.constant 0 : i32
    %c0_i32_1 = arith.constant 0 : i32
    return %c0_i32, %c0_i32_0 : i32, i32
  }
  func.func @transform_6(%arg0: i32) -> (i32, i32) {
    %c0_i32 = arith.constant 0 : i32
    %c0_i32_0 = arith.constant 0 : i32
    %c0_i32_1 = arith.constant 0 : i32
    return %c0_i32, %c0_i32_0 : i32, i32
  }
  func.func @transform_7(%arg0: i32) -> (i32, i32, i32) {
    %c0_i32 = arith.constant 0 : i32
    %c0_i32_0 = arith.constant 0 : i32
    %c0_i32_1 = arith.constant 0 : i32
    return %arg0, %c0_i32, %c0_i32_0 : i32, i32, i32
  }
}

</mosaic_0001>

<bundles_post_ra>
// kernel: tpu_custom_call.1
= control target key start
LH: loop header
LB: loop body
LE: loop exit
PB: predicated region body
PF: predicated region fallthrough
CT: control target
= control target key end

     0   :  { %12 = vsyncpa [#allocation5], 0  ;;  %s5437_s0 = inlined_call_operand.hbm [shape: f32[2,256,128], index: 0, kind: input, shape index: {}]   ;;  %s5438_s1 = inlined_call_operand.hbm [shape: f32[128,128], index: 1, kind: input, shape index: {}]   ;;  %s5439_s2 = inlined_call_operand.vmem [shape: f32[1,128], index: 2, kind: input, shape index: {}]   ;;  %s5440_s3 = inlined_call_operand.hbm [shape: f32[128,128], index: 3, kind: input, shape index: {}]   ;;  %s5441_s4 = inlined_call_operand.vmem [shape: f32[1,128], index: 4, kind: input, shape index: {}]   ;;  %s5442_s5 = inlined_call_operand.hbm [shape: f32[128,128], index: 5, kind: input, shape index: {}]   ;;  %s5443_s6 = inlined_call_operand.vmem [shape: f32[1,128], index: 6, kind: input, shape index: {}]   ;;  %s5444_s7 = inlined_call_operand.hbm [shape: f32[2,256,128], index: 7, kind: output, shape index: {}]  }
   0x1   :  { %14 = vsyncpa [#allocation5 + $0x1], 0 }
   0x2   :  { %15 = vsyncpa [#allocation8], 0 }
   0x3   :  { %16 = vsyncpa [#allocation11], 0 }
   0x4   :  { %17 = vsyncpa [#allocation6], 0 }
   0x5   :  { %19 = vsyncpa [#allocation6 + $0x1], 0  ;;  %s4035_s24 = smov 0   ;;  %s4037_s25 = smov 0  }
   0x6   :  { %s4039_s26 = smov 0   ;;  %s4041_s27 = smov 0  }
   0x7 LB: > { %s4056_s28 = sadd.s32 4294967295, %s3976_s27   ;;  %s3145_s29 = sadd.s32 4294967294, %s3976_s27   ;;  %s3976_s27 = sphi %s4041_s27, %s5470_s27   ;;  %s3972_s26 = sphi %s4039_s26, %s5469_s26   ;;  %s3968_s25 = sphi %s4037_s25, %s5468_s25   ;;  %s3964_s24 = sphi %s4035_s24, %s5467_s24  }
   0x8   : > { %p45_p0 = scmp.ne.s32.totalorder %s3968_s25, %s3964_s24  ;;  %p5445_p1 = scmp.eq.s32.totalorder %s4056_s28, 0 }
   0x9   : > { %p201_p3 = scmp.eq.s32.totalorder %s3145_s29, 1  ;;  %p3146_p5 = scmp.ge.s32.totalorder %s3976_s27, 1 }
   0xa   : > { %p4065_p4 = por %p5445_p1, %p45_p0  ;;  %p208_p7 = scmp.lt.s32.totalorder %s3976_s27, 3 }
   0xb   : > { %p4070_p6 = por %p201_p3, %p45_p0  ;;  %s3978_s10 = smov [#allocation7]  }
   0xc   : > { %s5449_s30 = scalar_select %p4065_p4, 1, 0 }
   0xd   : > { %s5450_s8 = scalar_select %p4070_p6, 1, 0 }
   0xe   : > { %p4075_p8 = pnand %p3146_p5, %p208_p7  ;;  %s220_s11 = sshll.u32 %s3978_s10, 4  ;;  %s4079_s11 = int_to_ptr.vmem [resolvable:$true] %s220_s11 }
   0xf   : > { %5451 = sst [smem:[#allocation17_spill]] %s5450_s8  ;;  %s3979_s13 = smov [#allocation9]  }
  0x10   : > { %s5452_s9 = scalar_select %p4075_p8, 1, 0 }
  0x11   : > { %p3682_p9 = pneg %p4075_p8  ;;  %s236_s14 = sshll.u32 %s3979_s13, 4  ;;  %s4090_s14 = int_to_ptr.vmem [resolvable:$true] %s236_s14 }
  0x12   : > { %s3980_s15 = smov [#allocation10]   ;;  %s3788_s19 = scalar_lea.hbm %s5438_s1, 2048 }
  0x13   : > { %p4086_p11 = pnand %p3682_p9, %p5445_p1  ;;  %s4092_s16 = sshll.u32 %s3980_s15, 4  ;;  %s253_s16 = int_to_ptr.vmem [resolvable:$true] %s4092_s16 }
  0x14   : > { %p3789_p12 = scmp.ne.s32.totalorder %s5438_s1, %s3788_s19  ;;  %p3795_p5 = scmp.lt.u32.totalorder %s3788_s19, %s5438_s1 }
  0x15   : > { %p4102_p13 = pneg %p4086_p11 }
  0x17   : > { %p3791_p0 = pnand %p4102_p13, %p3789_p12 }
  0x19   : > { %p3792_p3 = pneg %p3791_p0 }
  0x1b   : > { %p3797_p7 = pnand %p3795_p5, %p3792_p3 }
  0x1d   : > { %3800 = shalt.err (!%p3797_p7)
}
  0x1e   : > { %s3801_s10 = scalar_lea.vmem %s4079_s11, 2048  ;;  %p3809_p2 = scmp.lt.s32.totalorder %s4079_s11, %s4079_s11 }
  0x1f   : > { %p3802_p9 = scmp.ne.s32.totalorder %s4079_s11, %s3801_s10  ;;  %p3810_p6 = scmp.lt.s32.totalorder %s3801_s10, %s3801_s10 }
  0x21   : > { %p3804_p10 = pnand %p3802_p9, %p4102_p13  ;;  %p3811_p12 = por %p3810_p6, %p3809_p2 }
  0x23   : > { %p3805_p1 = pneg %p3804_p10 }
  0x25   : > { %p3812_p0 = pnand %p3811_p12, %p3805_p1 }
  0x27   : > { %3815 = shalt.err (!%p3812_p0)
}
  0x28   : > { %s3981_s13 = smov 128   ;;  %s3982_s15 = smov 8  }
  0x29   : > { %3685 = dma.hbm_to_vmem [thread:$0]  (!%p4086_p11), %s5438_s1, 2048, %s4079_s11, [#allocation8], %s3981_s13, %s3981_s13, %s3982_s15  }
  0x2a   : > { %s3816_s21 = scalar_lea.hbm %s5440_s3, 2048 }
  0x2b   : > { %p3817_p1 = scmp.ne.s32.totalorder %s5440_s3, %s3816_s21  ;;  %p3823_p10 = scmp.lt.u32.totalorder %s3816_s21, %s5440_s3 }
  0x2d   : > { %p3819_p2 = pnand %p3817_p1, %p4102_p13 }
  0x2f   : > { %p3820_p6 = pneg %p3819_p2 }
  0x31   : > { %p3825_p3 = pnand %p3823_p10, %p3820_p6 }
  0x33   : > { %3828 = shalt.err (!%p3825_p3)
}
  0x34   : > { %s3829_s11 = scalar_lea.vmem %s4090_s14, 2048  ;;  %p3837_p12 = scmp.lt.s32.totalorder %s4090_s14, %s4090_s14 }
  0x35   : > { %p3830_p5 = scmp.ne.s32.totalorder %s4090_s14, %s3829_s11  ;;  %p3838_p0 = scmp.lt.s32.totalorder %s3829_s11, %s3829_s11 }
  0x37   : > { %p3832_p7 = pnand %p3830_p5, %p4102_p13  ;;  %p3839_p1 = por %p3838_p0, %p3837_p12 }
  0x39   : > { %p3833_p9 = pneg %p3832_p7 }
  0x3b   : > { %p3840_p2 = pnand %p3839_p1, %p3833_p9 }
  0x3d   : > { %3843 = shalt.err (!%p3840_p2)
}
  0x3e   : > { %3688 = dma.hbm_to_vmem [thread:$0]  (!%p4086_p11), %s5440_s3, 2048, %s4090_s14, [#allocation8], %s3981_s13, %s3981_s13, %s3982_s15  }
  0x3f   : > { %s3844_s20 = scalar_lea.hbm %s5442_s5, 2048 }
  0x40   : > { %p3845_p6 = scmp.ne.s32.totalorder %s5442_s5, %s3844_s20  ;;  %p3851_p5 = scmp.lt.u32.totalorder %s3844_s20, %s5442_s5 }
  0x42   : > { %p3847_p10 = pnand %p3845_p6, %p4102_p13 }
  0x44   : > { %p3848_p3 = pneg %p3847_p10 }
  0x46   : > { %p3853_p7 = pnand %p3851_p5, %p3848_p3 }
  0x48   : > { %3856 = shalt.err (!%p3853_p7)
}
  0x49   : > { %s3857_s11 = scalar_lea.vmem %s253_s16, 2048  ;;  %p3865_p1 = scmp.lt.s32.totalorder %s253_s16, %s253_s16 }
  0x4a   : > { %p3858_p9 = scmp.ne.s32.totalorder %s253_s16, %s3857_s11  ;;  %p3866_p2 = scmp.lt.s32.totalorder %s3857_s11, %s3857_s11 }
  0x4c   : > { %p3860_p12 = pnand %p3858_p9, %p4102_p13  ;;  %p3867_p4 = por %p3866_p2, %p3865_p1 }
  0x4e   : > { %p3861_p0 = pneg %p3860_p12 }
  0x50   : > { %p3868_p8 = pnand %p3867_p4, %p3861_p0 }
  0x52   : > { %3871 = shalt.err (!%p3868_p8)
}
  0x53   : > { %3691 = dma.hbm_to_vmem [thread:$0]  (!%p4086_p11), %s5442_s5, 2048, %s253_s16, [#allocation11], %s3981_s13, %s3981_s13, %s3982_s15  }
  0x54   : > { %s4175_s22 = sadd.s32 1, %s3976_s27   ;;  %s32_s17 = sadd.s32 1, %s3972_s26 }
  0x55   : > { %s29_s12 = ssub.s32 %s3976_s27, %s4175_s22  ;;  %p39_p8 = scmp.ne.s32.totalorder %s3972_s26, %s3968_s25 }
  0x56   : > { %p30_p4 = scmp.eq.s32.totalorder %s29_s12, 0  ;;  %p40_p13 = scmp.eq.s32.totalorder %s3976_s27, 0 }
  0x57   : > { %p3703_p6 = scmp.lt.s32.totalorder %s3976_s27, 2  ;;  %p5455_p3 = scmp.eq.s32.totalorder %s4056_s28, 1 }
  0x58   : > { %s4185_s18 = scalar_select %p30_p4, %s3972_s26, %s32_s17  }
  0x59   : > { %p41_p10 = por %p40_p13, %p39_p8  ;;  %p4189_p5 = por %p5455_p3, %p39_p8 }
  0x5a   : > { %s269_s20 = sand.u32 1, %s3972_s26   ;;  %s3168_s21 = sshll.u32 %s3976_s27, 12 }
  0x5b   : > { %s3151_s16 = sshll.u32 %s269_s20, 8  ;;  %s4198_s10 = scalar_lea.hbm %s5437_s0, %s3168_s21 }
  0x5c   : > { %s273_s11 = scalar_lea.vmem [#allocation4], %s3151_s16  ;;  %p4200_p11 = pnand %p3703_p6, %p41_p10 }
  0x5d   : > { %s280_s14 = sshll.u32 %s273_s11, 4  ;;  %s4206_s12 = scalar_lea.sflag [#allocation5], %s269_s20  ;;  %s4204_s14 = int_to_ptr.vmem [resolvable:$true] %s280_s14 }
  0x5e   : > { %s3872_s17 = scalar_lea.hbm %s4198_s10, 4096  ;;  %p3874_p9 = pneg %p4200_p11 }
  0x5f   : > { %p3873_p7 = scmp.ne.s32.totalorder %s4198_s10, %s3872_s17  ;;  %s3877_s23 = scalar_lea.hbm %s5437_s0, 8192 }
  0x60   : > { %p3878_p1 = scmp.lt.u32.totalorder %s4198_s10, %s5437_s0  ;;  %p3879_p2 = scmp.lt.u32.totalorder %s3877_s23, %s3872_s17 }
  0x61   : > { %p3875_p12 = pnand %p3874_p9, %p3873_p7  ;;  %p3881_p8 = scmp.lt.u32.totalorder %s3872_s17, %s4198_s10 }
  0x62   : > { %p3880_p4 = por %p3879_p2, %p3878_p1 }
  0x63   : > { %p3876_p0 = pneg %p3875_p12 }
  0x64   : > { %p3882_p13 = por %p3881_p8, %p3880_p4 }
  0x66   : > { %p3883_p6 = pnand %p3882_p13, %p3876_p0 }
  0x68   : > { %3886 = shalt.err (!%p3883_p6)
}
  0x69   : > { %s3887_s20 = scalar_lea.vmem %s4204_s14, 4096  ;;  %s3983_s21 = smov [#allocation4]  }
  0x6a   : > { %p3888_p10 = scmp.ne.s32.totalorder %s4204_s14, %s3887_s20  ;;  %s3892_s16 = sshll.u32 %s3983_s21, 4  ;;  %s3893_s16 = int_to_ptr.vmem [resolvable:$false] %s3892_s16 }
  0x6b   : > { %s3894_s29 = scalar_lea.vmem %s3893_s16, 8192  ;;  %p3895_p12 = scmp.lt.s32.totalorder %s4204_s14, %s3893_s16 }
  0x6c   : > { %p3890_p3 = pnand %p3888_p10, %p3874_p9  ;;  %p3896_p1 = scmp.lt.s32.totalorder %s3894_s29, %s3887_s20 }
  0x6e   : > { %p3891_p7 = pneg %p3890_p3  ;;  %p3897_p2 = por %p3896_p1, %p3895_p12 }
  0x70   : > { %p3898_p4 = pnand %p3897_p2, %p3891_p7 }
  0x72   : > { %3901 = shalt.err (!%p3898_p4)
}
  0x73   : > { %3695 = dma.hbm_to_vmem [thread:$0]  (!%p4200_p11), %s4198_s10, 4096, %s4204_s14, %s4206_s12, %s3981_s13, %s3981_s13, %s3982_s15  }
  0x74   : > { %p5458_p9 = scmp.ne.s32.totalorder %s5452_s9, 0 }
  0x75   : > { %s4240_s17 = sand.u32 (!%p5458_p9), 1, %s3968_s25   ;;  %p5459_p0 = scmp.ne.s32.totalorder (!%p5458_p9), %s5449_s30, 0 }
  0x76   : > { %292 = sbr.rel (%p5458_p9) target bundleno = 1469 (0x5bd), region = 48  ;;  %s3155_s23 = sshll.u32 (!%p5458_p9), %s4240_s17, 8 }
  0x77   : > { %s295_s11 = scalar_lea.sflag (!%p5458_p9), [#allocation5], %s4240_s17  ;;  %s4246_s8 = scalar_lea.vmem (!%p5458_p9), [#allocation4], %s3155_s23 }
  0x7d   : > { %3947 = dma.done.wait (%p5459_p0), %s295_s11, 4096  }
  0x7e   : > { %3949 = vsyncadd (%p5459_p0), %s295_s11, 4294963200  ;;  %p5460_p11 = scmp.eq.s32.totalorder %s4056_s28, 0 }
  0x80   : > { %3951 = dma.done.wait (%p5460_p11), [#allocation8], 4096   ;;  %p5461_p8 = pmov %p5460_p11 }
  0x82   : > { %3953 = vsyncadd (%p5461_p8), [#allocation8], 4294963200  ;;  %p5462_p13 = pmov %p5461_p8 }
  0x83   : > { %p5463_p6 = pmov %p5461_p8 }
  0x84   : > { %3955 = dma.done.wait (%p5462_p13), [#allocation11], 2048  }
  0x85   : > { %3957 = vsyncadd (%p5463_p6), [#allocation11], 4294965248  ;;  %v406_v0 = vld [vmem:[#allocation7] sm:$0xff]  ;;  %v407_v1 = vld [vmem:[#allocation7 + $0x8] sm:$0xff]  ;;  %vm686_vm0 = vcmask 31744   ;;  %v3984_v40 = vmov 0.0  }
  0x86   : > { %v408_v2 = vld [vmem:[#allocation7 + $0x10] sm:$0xff]  ;;  %v3554_v3 = vpack.c.bf16 %v407_v1, %v406_v0  ;;  %v409_v4 = vld [vmem:[#allocation7 + $0x18] sm:$0xff]  ;;  %v410_v6 = vld [vmem:[#allocation7 + $0x20] sm:$0xff]  ;;  %687 = vst.msk [vmem:[#allocation2] sm:$0xff] %vm686_vm0, %v3984_v40  ;;  %vm694_vm1 = vcmask 24576   ;;  %s3985_s30 = smov 8  }
  0x87   : > { %v3558_v5 = vpack.c.bf16 %v409_v4, %v408_v2  ;;  %v411_v7 = vld [vmem:[#allocation7 + $0x28] sm:$0xff]  ;;  %v374_v9 = vld [vmem:[%s4246_s8] sm:$0xff]  ;;  %v412_v11 = vld [vmem:[#allocation7 + $0x30] sm:$0xff]  ;;  %688 = vst.msk [vmem:[#allocation2 + $0x8] sm:$0xff] %vm686_vm0, %v3984_v40  ;;  %s3986_s9 = smov 4   ;;  %vm341_vm2 = vcmask 1047840  }
  0x88   : > { %3555 = vmatprep.subr.bf16.mxu0 %v3554_v3  ;;  %3650 = vmatprep.subr.bf16.mxu1 %v3554_v3  ;;  %v3562_v8 = vpack.c.bf16 %v411_v7, %v410_v6  ;;  %v390_v10 = vld [vmem:[%s4246_s8 + $0x80] sm:$0xff]  ;;  %v413_v12 = vld [vmem:[#allocation7 + $0x38] sm:$0xff]  ;;  %v415_v15 = vld [vmem:[#allocation7 + $0x48] sm:$0xff]  ;;  %689 = vst.msk [vmem:[#allocation2 + $0x10] sm:$0xff] %vm686_vm0, %v3984_v40  ;;  %vm988_vm3 = vcmask 64544   ;;  %vm1181_vm4 = vcmask 97344  }
  0x89   : > { %3557 = vmatpush3.bf16.msra.mxu0 %v3554_v3  ;;  %3658 = vmatpush3.bf16.msra.mxu1 %v3554_v3  ;;  %v3566_v13 = vpack.c.bf16 %v413_v12, %v412_v11  ;;  %v414_v14 = vld [vmem:[#allocation7 + $0x40] sm:$0xff]  ;;  %v416_v17 = vld [vmem:[#allocation7 + $0x50] sm:$0xff]  ;;  %v417_v18 = vld [vmem:[#allocation7 + $0x58] sm:$0xff]  ;;  %691 = vst.msk [vmem:[#allocation2 + $0x198] sm:$0xff] %vm686_vm0, %v3984_v40  ;;  %s3987_s10 = smov 16   ;;  %s3988_s14 = smov 32  }
  0x8a   : > { %3559 = vmatprep.subr.bf16.mxu0 %v3558_v5  ;;  %3651 = vmatprep.subr.bf16.mxu1 %v3558_v5  ;;  %v3570_v16 = vpack.c.bf16 %v415_v15, %v414_v14  ;;  %v3574_v19 = vpack.c.bf16 %v417_v18, %v416_v17  ;;  %v418_v20 = vld [vmem:[#allocation7 + $0x60] sm:$0xff]  ;;  %v419_v21 = vld [vmem:[#allocation7 + $0x68] sm:$0xff]  ;;  %v420_v23 = vld [vmem:[#allocation7 + $0x70] sm:$0xff]  ;;  %692 = vst.msk [vmem:[#allocation2 + $0x1a0] sm:$0xff] %vm686_vm0, %v3984_v40  ;;  %s3989_s12 = smov 20   ;;  %s3990_s20 = smov 12  }
  0x8b   : > { %3346 = vmatprep.mubr.f32.mxu0 %v374_v9  ;;  %3370 = vmatprep.mubr.f32.mxu1 %v390_v10  ;;  %v3578_v22 = vpack.c.bf16 %v419_v21, %v418_v20  ;;  %v421_v24 = vld [vmem:[#allocation7 + $0x78] sm:$0xff]  ;;  %v375_v26 = vld [vmem:[%s4246_s8 + $0x8] sm:$0xff]  ;;  %v376_v28 = vld [vmem:[%s4246_s8 + $0x10] sm:$0xff]  ;;  %693 = vst.msk [vmem:[#allocation2 + $0x1a8] sm:$0xff] %vm686_vm0, %v3984_v40  ;;  %s3991_s21 = smov 28   ;;  %s3992_s16 = smov 24  }
  0x8c   : > { %v3582_v25 = vpack.c.bf16 %v421_v24, %v420_v23  ;;  %v391_v27 = vld [vmem:[%s4246_s8 + $0x88] sm:$0xff]  ;;  %v392_v29 = vld [vmem:[%s4246_s8 + $0x90] sm:$0xff]  ;;  %v377_v30 = vld [vmem:[%s4246_s8 + $0x18] sm:$0xff]  ;;  %695 = vst.msk [vmem:[#allocation2] sm:$0x1] %vm694_vm1, %v3984_v40  ;;  %vm1374_vm5 = vcmask 130144  }
  0x8d   : > { %3561 = vmatpush3.bf16.msra.mxu0 %v3558_v5  ;;  %3659 = vmatpush3.bf16.msra.mxu1 %v3558_v5  ;;  %v393_v31 = vld [vmem:[%s4246_s8 + $0x98] sm:$0xff]  ;;  %v378_v32 = vld [vmem:[%s4246_s8 + $0x20] sm:$0xff]  ;;  %v379_v33 = vld [vmem:[%s4246_s8 + $0x28] sm:$0xff]  ;;  %696 = vst.msk [vmem:[#allocation2 + $0x18] sm:$0x1] %vm694_vm1, %v3984_v40  ;;  %vm1567_vm6 = vcmask 162944  }
  0x8e   : > { %3563 = vmatprep.subr.bf16.mxu0 %v3562_v8  ;;  %3652 = vmatprep.subr.bf16.mxu1 %v3562_v8  ;;  %v380_v34 = vld [vmem:[%s4246_s8 + $0x30] sm:$0xff]  ;;  %v381_v35 = vld [vmem:[%s4246_s8 + $0x38] sm:$0xff]  ;;  %v382_v36 = vld [vmem:[%s4246_s8 + $0x40] sm:$0xff]  ;;  %697 = vst.msk [vmem:[#allocation2 + $0x30] sm:$0x1] %vm694_vm1, %v3984_v40  ;;  %vm1760_vm7 = vcmask 195744  }
  0x8f   : > { %v383_v37 = vld [vmem:[%s4246_s8 + $0x48] sm:$0xff]  ;;  %v384_v38 = vld [vmem:[%s4246_s8 + $0x50] sm:$0xff]  ;;  %v385_v39 = vld [vmem:[%s4246_s8 + $0x58] sm:$0xff]  ;;  %698 = vst.msk [vmem:[#allocation2 + $0x48] sm:$0x1] %vm694_vm1, %v3984_v40  ;;  %vm1954_vm8 = vcmask 228544  }
  0x90   : > { %699 = vst.msk [vmem:[#allocation2 + $0x60] sm:$0x1] %vm694_vm1, %v3984_v40  ;;  %700 = vst.msk [vmem:[#allocation2 + $0x78] sm:$0x1] %vm694_vm1, %v3984_v40  ;;  %v1021_v41 = vld [vmem:[#allocation2 + $0x2] sm:$0xff]  ;;  %v386_v44 = vld [vmem:[%s4246_s8 + $0x60] sm:$0xff] }
  0x91   : > { %3565 = vmatpush3.bf16.msra.mxu0 %v3562_v8  ;;  %3660 = vmatpush3.bf16.msra.mxu1 %v3562_v8  ;;  %701 = vst.msk [vmem:[#allocation2 + $0x90] sm:$0x1] %vm694_vm1, %v3984_v40  ;;  %702 = vst.msk [vmem:[#allocation2 + $0xa8] sm:$0x1] %vm694_vm1, %v3984_v40  ;;  %v828_v42 = vld [vmem:[#allocation2 + $0x1] sm:$0xff]  ;;  %v829_v43 = vld [vmem:[#allocation2 + $0x9] sm:$0xff] }
  0x92   : > { %3567 = vmatprep.subr.bf16.mxu0 %v3566_v13  ;;  %3653 = vmatprep.subr.bf16.mxu1 %v3566_v13  ;;  %703 = vst.msk [vmem:[#allocation2 + $0xc0] sm:$0x1] %vm694_vm1, %v3984_v40  ;;  %704 = vst.msk [vmem:[#allocation2 + $0xd8] sm:$0x1] %vm694_vm1, %v3984_v40  ;;  %v387_v45 = vld [vmem:[%s4246_s8 + $0x68] sm:$0xff]  ;;  %v388_v47 = vld [vmem:[%s4246_s8 + $0x70] sm:$0xff] }
  0x93   : > { %705 = vst.msk [vmem:[#allocation2 + $0xf0] sm:$0x1] %vm694_vm1, %v3984_v40  ;;  %706 = vst.msk [vmem:[#allocation2 + $0x108] sm:$0x1] %vm694_vm1, %v3984_v40  ;;  %1085 = vrot.lane.b32.xlu1 %v1021_v41, %s3985_s30  ;;  %892 = vrot.lane.b32.xlu0 %v828_v42, %s3986_s9  ;;  %v389_v48 = vld [vmem:[%s4246_s8 + $0x78] sm:$0xff]  ;;  %v394_v49 = vld [vmem:[%s4246_s8 + $0xa0] sm:$0xff] }
  0x94   : > { %707 = vst.msk [vmem:[#allocation2 + $0x120] sm:$0x1] %vm694_vm1, %v3984_v40  ;;  %708 = vst.msk [vmem:[#allocation2 + $0x138] sm:$0x1] %vm694_vm1, %v3984_v40  ;;  %v395_v50 = vld [vmem:[%s4246_s8 + $0xa8] sm:$0xff]  ;;  %v764_v51 = vld [vmem:[#allocation2] sm:$0xff] }
  0x95   : > { %3569 = vmatpush3.bf16.msra.mxu0 %v3566_v13  ;;  %3661 = vmatpush3.bf16.msra.mxu1 %v3566_v13  ;;  %709 = vst.msk [vmem:[#allocation2 + $0x150] sm:$0x1] %vm694_vm1, %v3984_v40  ;;  %710 = vst.msk [vmem:[#allocation2 + $0x168] sm:$0x1] %vm694_vm1, %v3984_v40  ;;  %v765_v54 = vld [vmem:[#allocation2 + $0x8] sm:$0xff]  ;;  %v396_v55 = vld [vmem:[%s4246_s8 + $0xb0] sm:$0xff] }
  0x96   : > { %3571 = vmatprep.subr.bf16.mxu0 %v3570_v16  ;;  %3654 = vmatprep.subr.bf16.mxu1 %v3570_v16  ;;  %711 = vst.msk [vmem:[#allocation2 + $0x180] sm:$0x1] %vm694_vm1, %v3984_v40  ;;  %714 = vst.msk [vmem:[#allocation2 + $0x29] sm:$0x1] %vm694_vm1, %v3984_v40  ;;  %v397_v56 = vld [vmem:[%s4246_s8 + $0xb8] sm:$0xff]  ;;  %vm2147_vm9 = vcmask 261344  }
  0x97   : > { %715 = vst.msk [vmem:[#allocation2 + $0x41] sm:$0x1] %vm694_vm1, %v3984_v40  ;;  %716 = vst.msk [vmem:[#allocation2 + $0x59] sm:$0x1] %vm694_vm1, %v3984_v40  ;;  %894 = vrot.lane.b32.xlu0 %v829_v43, %s3986_s9  ;;  %v4445_v59 = vld [vmem:[%s5439_s2] ss:$0 sm:$0xff] }
  0x98   : > { %717 = vst.msk [vmem:[#allocation2 + $0x71] sm:$0x1] %vm694_vm1, %v3984_v40  ;;  %718 = vst.msk [vmem:[#allocation2 + $0x89] sm:$0x1] %vm694_vm1, %v3984_v40  ;;  %vm2340_vm10 = vcmask 294144  }
  0x99   : > { %3573 = vmatpush3.bf16.msra.mxu0 %v3570_v16  ;;  %3662 = vmatpush3.bf16.msra.mxu1 %v3570_v16  ;;  %719 = vst.msk [vmem:[#allocation2 + $0xa1] sm:$0x1] %vm694_vm1, %v3984_v40  ;;  %720 = vst.msk [vmem:[#allocation2 + $0xb9] sm:$0x1] %vm694_vm1, %v3984_v40 }
  0x9a   : > { %3575 = vmatprep.subr.bf16.mxu0 %v3574_v19  ;;  %3655 = vmatprep.subr.bf16.mxu1 %v3574_v19  ;;  %721 = vst.msk [vmem:[#allocation2 + $0xd1] sm:$0x1] %vm694_vm1, %v3984_v40  ;;  %722 = vst.msk [vmem:[#allocation2 + $0xe9] sm:$0x1] %vm694_vm1, %v3984_v40 }
  0x9b   : > { %723 = vst.msk [vmem:[#allocation2 + $0x101] sm:$0x1] %vm694_vm1, %v3984_v40  ;;  %724 = vst.msk [vmem:[#allocation2 + $0x119] sm:$0x1] %vm694_vm1, %v3984_v40 }
  0x9c   : > { %725 = vst.msk [vmem:[#allocation2 + $0x131] sm:$0x1] %vm694_vm1, %v3984_v40  ;;  %726 = vst.msk [vmem:[#allocation2 + $0x149] sm:$0x1] %vm694_vm1, %v3984_v40 }
  0x9d   : > { %3577 = vmatpush3.bf16.msra.mxu0 %v3574_v19  ;;  %3663 = vmatpush3.bf16.msra.mxu1 %v3574_v19  ;;  %727 = vst.msk [vmem:[#allocation2 + $0x161] sm:$0x1] %vm694_vm1, %v3984_v40  ;;  %728 = vst.msk [vmem:[#allocation2 + $0x179] sm:$0x1] %vm694_vm1, %v3984_v40 }
  0x9e   : > { %3579 = vmatprep.subr.bf16.mxu0 %v3578_v22  ;;  %3656 = vmatprep.subr.bf16.mxu1 %v3578_v22  ;;  %729 = vst.msk [vmem:[#allocation2 + $0x191] sm:$0x1] %vm694_vm1, %v3984_v40  ;;  %712 = vst.msk [vmem:[#allocation2 + $0x198] sm:$0x1] %vm694_vm1, %v3984_v40 }
  0x9f   : > { %713 = vst.msk [vmem:[#allocation2 + $0x11] sm:$0x1] %vm694_vm1, %v3984_v40  ;;  %730 = vst.msk [vmem:[#allocation2 + $0x1a9] sm:$0x1] %vm694_vm1, %v3984_v40 }
  0xa0   : > { %342 = vst.msk [vmem:[#allocation3] sm:$0xff] %vm341_vm2, %v3984_v40  ;;  %343 = vst.msk [vmem:[#allocation3 + $0x8] sm:$0xff] %vm341_vm2, %v3984_v40 }
  0xa1   : > { %3581 = vmatpush3.bf16.msra.mxu0 %v3578_v22  ;;  %3664 = vmatpush3.bf16.msra.mxu1 %v3578_v22  ;;  %344 = vst.msk [vmem:[#allocation3 + $0x10] sm:$0xff] %vm341_vm2, %v3984_v40  ;;  %345 = vst.msk [vmem:[#allocation3 + $0x18] sm:$0xff] %vm341_vm2, %v3984_v40 }
  0xa2   : > { %3583 = vmatprep.subr.bf16.mxu0 %v3582_v25  ;;  %3657 = vmatprep.subr.bf16.mxu1 %v3582_v25  ;;  %346 = vst.msk [vmem:[#allocation3 + $0x20] sm:$0xff] %vm341_vm2, %v3984_v40  ;;  %347 = vst.msk [vmem:[#allocation3 + $0x28] sm:$0xff] %vm341_vm2, %v3984_v40 }
  0xa3   : > { %348 = vst.msk [vmem:[#allocation3 + $0x30] sm:$0xff] %vm341_vm2, %v3984_v40  ;;  %349 = vst.msk [vmem:[#allocation3 + $0x38] sm:$0xff] %vm341_vm2, %v3984_v40 }
  0xa4   : > { %350 = vst.msk [vmem:[#allocation3 + $0x40] sm:$0xff] %vm341_vm2, %v3984_v40  ;;  %351 = vst.msk [vmem:[#allocation3 + $0x48] sm:$0xff] %vm341_vm2, %v3984_v40 }
  0xa5   : > { %3585 = vmatpush3.bf16.msra.mxu0 %v3582_v25  ;;  %3665 = vmatpush3.bf16.msra.mxu1 %v3582_v25  ;;  %352 = vst.msk [vmem:[#allocation3 + $0x50] sm:$0xff] %vm341_vm2, %v3984_v40  ;;  %353 = vst.msk [vmem:[#allocation3 + $0x58] sm:$0xff] %vm341_vm2, %v3984_v40 }
  0xa6   : > { %v1022_v46 = vld [vmem:[#allocation2 + $0xa] sm:$0xff]  ;;  %354 = vst.msk [vmem:[#allocation3 + $0x60] sm:$0xff] %vm341_vm2, %v3984_v40  ;;  %355 = vst.msk [vmem:[#allocation3 + $0x68] sm:$0xff] %vm341_vm2, %v3984_v40 }
  0xa7   : > { %1087 = vrot.lane.b32.xlu1 %v1022_v46, %s3985_s30  ;;  %356 = vst.msk [vmem:[#allocation3 + $0x70] sm:$0xff] %vm341_vm2, %v3984_v40  ;;  %357 = vst.msk [vmem:[#allocation3 + $0x78] sm:$0xff] %vm341_vm2, %v3984_v40 }
  0xa8   : > { %3347 = vmatmul.mubr.f32.vlgmr.msra.gmra.mrb[0].mxu0 %v375_v26  ;;  %3371 = vmatmul.mubr.f32.vlgmr.msra.gmra.mrb[0].mxu1 %v391_v27  ;;  %358 = vst.msk [vmem:[#allocation3 + $0x80] sm:$0xff] %vm341_vm2, %v3984_v40  ;;  %359 = vst.msk [vmem:[#allocation3 + $0x88] sm:$0xff] %vm341_vm2, %v3984_v40 }
  0xa9   : > { %3349 = vmatprep.mubr.f32.mxu0 %v376_v28  ;;  %3373 = vmatprep.mubr.f32.mxu1 %v392_v29  ;;  %360 = vst.msk [vmem:[#allocation3 + $0x90] sm:$0xff] %vm341_vm2, %v3984_v40  ;;  %361 = vst.msk [vmem:[#allocation3 + $0x98] sm:$0xff] %vm341_vm2, %v3984_v40 }
  0xaa   : > { %362 = vst.msk [vmem:[#allocation3 + $0xa0] sm:$0xff] %vm341_vm2, %v3984_v40  ;;  %363 = vst.msk [vmem:[#allocation3 + $0xa8] sm:$0xff] %vm341_vm2, %v3984_v40 }
  0xab   : > { %364 = vst.msk [vmem:[#allocation3 + $0xb0] sm:$0xff] %vm341_vm2, %v3984_v40  ;;  %365 = vst.msk [vmem:[#allocation3 + $0xb8] sm:$0xff] %vm341_vm2, %v3984_v40 }
  0xac   : > { %3350 = vmatmul.mubr.f32.gmra.mrb[2].mxu0 %v377_v30  ;;  %3374 = vmatmul.mubr.f32.gmra.mrb[2].mxu1 %v393_v31  ;;  %366 = vst.msk [vmem:[#allocation3 + $0xc0] sm:$0xff] %vm341_vm2, %v3984_v40  ;;  %367 = vst.msk [vmem:[#allocation3 + $0xc8] sm:$0xff] %vm341_vm2, %v3984_v40 }
  0xad   : > { %3352 = vmatprep.mubr.f32.mxu0 %v378_v32  ;;  %368 = vst.msk [vmem:[#allocation3 + $0xd0] sm:$0xff] %vm341_vm2, %v3984_v40  ;;  %369 = vst.msk [vmem:[#allocation3 + $0xd8] sm:$0xff] %vm341_vm2, %v3984_v40  ;;  %3376 = vmatprep.mubr.f32.mxu1 %v394_v49 }
  0xae   : > { %370 = vst.msk [vmem:[#allocation3 + $0xe0] sm:$0xff] %vm341_vm2, %v3984_v40  ;;  %371 = vst.msk [vmem:[#allocation3 + $0xe8] sm:$0xff] %vm341_vm2, %v3984_v40 }
  0xaf   : > { %372 = vst.msk [vmem:[#allocation3 + $0xf0] sm:$0xff] %vm341_vm2, %v3984_v40  ;;  %373 = vst.msk [vmem:[#allocation3 + $0xf8] sm:$0xff] %vm341_vm2, %v3984_v40 }
  0xb0   : > { %3353 = vmatmul.mubr.f32.gmra.mrb[4].mxu0 %v379_v33  ;;  %3377 = vmatmul.mubr.f32.gmra.mrb[4].mxu1 %v395_v50  ;;  %796 = vst.msk [vmem:[#allocation3] sm:$0xff] %vm686_vm0, %v764_v51  ;;  %797 = vst.msk [vmem:[#allocation3 + $0x8] sm:$0xff] %vm686_vm0, %v765_v54  ;;  %v399_v51 = vld [vmem:[%s4246_s8 + $0xc8] sm:$0xff] }
  0xb1   : > { %3355 = vmatprep.mubr.f32.mxu0 %v380_v34  ;;  %3379 = vmatprep.mubr.f32.mxu1 %v396_v55 }
  0xb4   : > { %3356 = vmatmul.mubr.f32.gmra.mrb[6].mxu0 %v381_v35  ;;  %3380 = vmatmul.mubr.f32.gmra.mrb[6].mxu1 %v397_v56 }
  0xb5   : > { %3358 = vmatprep.mubr.f32.mxu0 %v382_v36 }
  0xb8   : > { %3359 = vmatmul.mubr.f32.gmra.mrb[8].mxu0 %v383_v37 }
  0xb9   : > { %3361 = vmatprep.mubr.f32.mxu0 %v384_v38 }
  0xbc   : > { %3362 = vmatmul.mubr.f32.gmra.mrb[10].mxu0 %v385_v39 }
  0xbd   : > { %3364 = vmatprep.mubr.f32.mxu0 %v386_v44 }
  0xc0   : > { %3365 = vmatmul.mubr.f32.gmra.mrb[12].mxu0 %v387_v45 }
  0xc1   : > { %3367 = vmatprep.mubr.f32.mxu0 %v388_v47 }
  0xc4   : > { %3368 = vmatmul.mubr.f32.gmra.mrb[14].mxu0 %v389_v48  ;;  %v398_v48 = vld [vmem:[%s4246_s8 + $0xc0] sm:$0xff] }
  0xc5   : > { %3382 = vmatprep.mubr.f32.mxu1 %v398_v48 }
  0xc6   : > { %3383 = vmatmul.mubr.f32.gmra.mrb[8].mxu1 %v399_v51 }
 0x105   : > { %v1086_v52 = vpop.permute.xlu1 %1085  ;;  %v893_v53 = vpop.permute.xlu0 %892 }
 0x106   : > { %989 = vst.msk [vmem:[#allocation3] sm:$0xff] %vm988_vm3, %v893_v53 }
 0x107   : > { %1182 = vst.msk [vmem:[#allocation3] sm:$0xff] %vm1181_vm4, %v1086_v52 }
 0x109   : > { %v895_v58 = vpop.permute.xlu0 %894 }
 0x10a   : > { %990 = vst.msk [vmem:[#allocation3 + $0x8] sm:$0xff] %vm988_vm3, %v895_v58 }
 0x119   : > { %v1088_v57 = vpop.permute.xlu1 %1087 }
 0x11a   : > { %1183 = vst.msk [vmem:[#allocation3 + $0x8] sm:$0xff] %vm1181_vm4, %v1088_v57 }
 0x17b   : > { %v3348_v60 = vpop.f32.mrb[0].mxu0  ;;  %v3372_v61 = vpop.f32.mrb[0].mxu1 }
 0x17c   : > { %v501_v62 = vadd.f32 %v3348_v60, %v4445_v59  ;;  %v581_v63 = vadd.f32 %v3372_v61, %v4445_v59  ;;  %v495_v0 = vpop.f32.mrb[1].mxu0  ;;  %v575_v1 = vpop.f32.mrb[1].mxu1 }
 0x17d   : > { %v496_v2 = vadd.f32 %v4445_v59, %v495_v0  ;;  %v576_v3 = vadd.f32 %v4445_v59, %v575_v1 }
 0x17e   : > { %v655_v4 = vmax.f32 %v501_v62, 0.0  ;;  %v671_v5 = vmax.f32 %v581_v63, 0.0  ;;  %v2405_v62 = vld [vmem:[#allocation9] sm:$0xff]  ;;  %v2406_v63 = vld [vmem:[#allocation9 + $0x8] sm:$0xff] }
 0x17f   : > { %v654_v6 = vmax.f32 %v496_v2, 0.0  ;;  %v670_v7 = vmax.f32 %v576_v3, 0.0  ;;  %v3351_v8 = vpop.f32.mrb[2].mxu0  ;;  %v3375_v9 = vpop.f32.mrb[2].mxu1  ;;  %v3586_v0 = vpack.c.bf16 %v2406_v63, %v2405_v62  ;;  %v2407_v2 = vld [vmem:[#allocation9 + $0x10] sm:$0xff]  ;;  %v2408_v3 = vld [vmem:[#allocation9 + $0x18] sm:$0xff] }
 0x180   : > { %733 = vst.msk [vmem:[#allocation2 + $0x21] sm:$0xff] %vm686_vm0, %v655_v4  ;;  %749 = vst.msk [vmem:[#allocation2 + $0xe1] sm:$0xff] %vm686_vm0, %v671_v5  ;;  %v511_v10 = vadd.f32 %v3351_v8, %v4445_v59  ;;  %v505_v11 = vpop.f32.mrb[3].mxu0  ;;  %v591_v12 = vadd.f32 %v3375_v9, %v4445_v59  ;;  %v585_v13 = vpop.f32.mrb[3].mxu1  ;;  %v3590_v4 = vpack.c.bf16 %v2408_v3, %v2407_v2  ;;  %v2409_v5 = vld [vmem:[#allocation9 + $0x20] sm:$0xff] }
 0x181   : > { %732 = vst.msk [vmem:[#allocation2 + $0x19] sm:$0xff] %vm686_vm0, %v654_v6  ;;  %748 = vst.msk [vmem:[#allocation2 + $0xd9] sm:$0xff] %vm686_vm0, %v670_v7  ;;  %v506_v14 = vadd.f32 %v4445_v59, %v505_v11  ;;  %v586_v15 = vadd.f32 %v4445_v59, %v585_v13  ;;  %3587 = vmatprep.subr.bf16.mxu1 %v3586_v0  ;;  %v2410_v6 = vld [vmem:[#allocation9 + $0x28] sm:$0xff]  ;;  %v400_v7 = vld [vmem:[%s4246_s8 + $0xd0] sm:$0xff] }
 0x182   : > { %v657_v16 = vmax.f32 %v511_v10, 0.0  ;;  %v673_v17 = vmax.f32 %v591_v12, 0.0  ;;  %3589 = vmatpush3.bf16.msra.mxu1 %v3586_v0  ;;  %v3594_v9 = vpack.c.bf16 %v2410_v6, %v2409_v5  ;;  %3385 = vmatprep.mubr.f32.mxu1 %v400_v7  ;;  %v401_v10 = vld [vmem:[%s4246_s8 + $0xd8] sm:$0xff]  ;;  %v2411_v11 = vld [vmem:[#allocation9 + $0x30] sm:$0xff] }
 0x183   : > { %v656_v18 = vmax.f32 %v506_v14, 0.0  ;;  %v672_v19 = vmax.f32 %v586_v15, 0.0  ;;  %v3354_v20 = vpop.f32.mrb[4].mxu0  ;;  %3591 = vmatprep.subr.bf16.mxu1 %v3590_v4  ;;  %v2412_v12 = vld [vmem:[#allocation9 + $0x38] sm:$0xff]  ;;  %3386 = vmatmul.mubr.f32.gmra.mrb[10].mxu1 %v401_v10 }
 0x184   : > { %735 = vst.msk [vmem:[#allocation2 + $0x39] sm:$0xff] %vm686_vm0, %v657_v16  ;;  %751 = vst.msk [vmem:[#allocation2 + $0xf9] sm:$0xff] %vm686_vm0, %v673_v17  ;;  %v521_v21 = vadd.f32 %v3354_v20, %v4445_v59  ;;  %v515_v22 = vpop.f32.mrb[5].mxu0  ;;  %v3598_v14 = vpack.c.bf16 %v2412_v12, %v2411_v11  ;;  %v2413_v20 = vld [vmem:[#allocation9 + $0x40] sm:$0xff] }
 0x185   : > { %734 = vst.msk [vmem:[#allocation2 + $0x31] sm:$0xff] %vm686_vm0, %v656_v18  ;;  %750 = vst.msk [vmem:[#allocation2 + $0xf1] sm:$0xff] %vm686_vm0, %v672_v19  ;;  %v516_v23 = vadd.f32 %v4445_v59, %v515_v22 }
 0x186   : > { %v659_v24 = vmax.f32 %v521_v21, 0.0  ;;  %3593 = vmatpush3.bf16.msra.mxu1 %v3590_v4  ;;  %v2414_v21 = vld [vmem:[#allocation9 + $0x48] sm:$0xff] }
 0x187   : > { %v4465_v25 = vld [vmem:[#allocation2 + $0xe1] sm:$0xff]  ;;  %v658_v27 = vmax.f32 %v516_v23, 0.0  ;;  %v3357_v28 = vpop.f32.mrb[6].mxu0  ;;  %3595 = vmatprep.subr.bf16.mxu1 %v3594_v9  ;;  %v3602_v22 = vpack.c.bf16 %v2414_v21, %v2413_v20 }
 0x188   : > { %v1408_v26 = vld [vmem:[#allocation2 + $0x21] sm:$0xff]  ;;  %1505 = vrot.lane.b32.xlu1 %v4465_v25, %s3987_s10  ;;  %737 = vst.msk [vmem:[#allocation2 + $0x51] sm:$0xff] %vm686_vm0, %v659_v24  ;;  %v531_v30 = vadd.f32 %v3357_v28, %v4445_v59  ;;  %v525_v31 = vpop.f32.mrb[7].mxu0  ;;  %v1808_v32 = vld [vmem:[#allocation2 + $0xd8] sm:$0xff] }
 0x189   : > { %1473 = vrot.lane.b32.xlu0 %v1408_v26, %s3987_s10  ;;  %v1215_v29 = vld [vmem:[#allocation2 + $0x20] sm:$0xff]  ;;  %v4472_v33 = vld [vmem:[#allocation2 + $0x18] sm:$0xff]  ;;  %736 = vst.msk [vmem:[#allocation2 + $0x49] sm:$0xff] %vm686_vm0, %v658_v27  ;;  %v526_v34 = vadd.f32 %v4445_v59, %v525_v31  ;;  %814 = vst.msk [vmem:[#allocation3 + $0x90] sm:$0xff] %vm686_vm0, %v1808_v32 }
 0x18a   : > { %799 = vst.msk [vmem:[#allocation3 + $0x18] sm:$0xff] %vm686_vm0, %v1215_v29  ;;  %v4477_v35 = vld [vmem:[#allocation2 + $0xe0] sm:$0xff]  ;;  %v661_v36 = vmax.f32 %v531_v30, 0.0  ;;  %798 = vst.msk [vmem:[#allocation3 + $0x10] sm:$0xff] %vm686_vm0, %v4472_v33  ;;  %3597 = vmatpush3.bf16.msra.mxu1 %v3594_v9  ;;  %v2417_v27 = vld [vmem:[#allocation9 + $0x60] sm:$0xff] }
 0x18b   : > { %v2195_v37 = vld [vmem:[#allocation2 + $0xe2] sm:$0xff]  ;;  %v660_v38 = vmax.f32 %v526_v34, 0.0  ;;  %815 = vst.msk [vmem:[#allocation3 + $0x98] sm:$0xff] %vm686_vm0, %v4477_v35  ;;  %v830_v46 = vld [vmem:[#allocation2 + $0x19] sm:$0xff]  ;;  %v3360_v52 = vpop.f32.mrb[8].mxu0  ;;  %3599 = vmatprep.subr.bf16.mxu1 %v3598_v14 }
 0x18c   : > { %2274 = vrot.lane.b32.xlu1 %v2195_v37, %s3988_s14  ;;  %v4486_v39 = vld [vmem:[#allocation2 + $0x30] sm:$0xff]  ;;  %v4488_v40 = vld [vmem:[#allocation2 + $0x38] sm:$0xff]  ;;  %739 = vst.msk [vmem:[#allocation2 + $0x69] sm:$0xff] %vm686_vm0, %v661_v36  ;;  %v1601_v41 = vld [vmem:[#allocation2 + $0x22] sm:$0xff]  ;;  %v541_v53 = vadd.f32 %v3360_v52, %v4445_v59  ;;  %v535_v55 = vpop.f32.mrb[9].mxu0 }
 0x18d   : > { %898 = vrot.lane.b32.xlu0 %v1408_v26, %s3986_s9  ;;  %738 = vst.msk [vmem:[#allocation2 + $0x61] sm:$0xff] %vm686_vm0, %v660_v38  ;;  %801 = vst.msk [vmem:[#allocation3 + $0x28] sm:$0xff] %vm686_vm0, %v4488_v40  ;;  %v784_v44 = vld [vmem:[#allocation2 + $0xf0] sm:$0xff]  ;;  %v785_v45 = vld [vmem:[#allocation2 + $0xf8] sm:$0xff]  ;;  %v536_v56 = vadd.f32 %v4445_v59, %v535_v55 }
 0x18e   : > { %800 = vst.msk [vmem:[#allocation3 + $0x20] sm:$0xff] %vm686_vm0, %v4486_v39  ;;  %816 = vst.msk [vmem:[#allocation3 + $0xa0] sm:$0xff] %vm686_vm0, %v784_v44  ;;  %v1600_v50 = vld [vmem:[#allocation2 + $0x1a] sm:$0xff]  ;;  %v663_v54 = vmax.f32 %v541_v53, 0.0  ;;  %3601 = vmatpush3.bf16.msra.mxu1 %v3598_v14  ;;  %v2420_v34 = vld [vmem:[#allocation9 + $0x78] sm:$0xff] }
 0x18f   : > { %817 = vst.msk [vmem:[#allocation3 + $0xa8] sm:$0xff] %vm686_vm0, %v785_v45  ;;  %v662_v57 = vmax.f32 %v536_v56, 0.0  ;;  %v2001_v58 = vld [vmem:[#allocation2 + $0xd9] sm:$0xff]  ;;  %v3363_v13 = vpop.f32.mrb[10].mxu0  ;;  %3603 = vmatprep.subr.bf16.mxu1 %v3602_v22  ;;  %v405_v36 = vld [vmem:[%s4246_s8 + $0xf8] sm:$0xff]  ;;  %v1810_v44 = vld [vmem:[#allocation2 + $0xf0] sm:$0xff] }
 0x190   : > { %1280 = vrot.lane.b32.xlu1 %v1215_v29, %s3990_s20  ;;  %v4498_v42 = vld [vmem:[#allocation2 + $0x48] sm:$0xff]  ;;  %v4500_v43 = vld [vmem:[#allocation2 + $0x50] sm:$0xff]  ;;  %741 = vst.msk [vmem:[#allocation2 + $0x81] sm:$0xff] %vm686_vm0, %v663_v54  ;;  %v2194_v1 = vld [vmem:[#allocation2 + $0xda] sm:$0xff]  ;;  %v551_v15 = vadd.f32 %v3363_v13, %v4445_v59  ;;  %v545_v18 = vpop.f32.mrb[11].mxu0 }
 0x191   : > { %1666 = vrot.lane.b32.xlu0 %v1601_v41, %s3989_s12  ;;  %803 = vst.msk [vmem:[#allocation3 + $0x38] sm:$0xff] %vm686_vm0, %v4500_v43  ;;  %802 = vst.msk [vmem:[#allocation3 + $0x30] sm:$0xff] %vm686_vm0, %v4498_v42  ;;  %v1410_v8 = vld [vmem:[#allocation2 + $0x39] sm:$0xff]  ;;  %v546_v19 = vadd.f32 %v4445_v59, %v545_v18  ;;  %v402_v29 = vld [vmem:[%s4246_s8 + $0xe0] sm:$0xff] }
 0x192   : > { %740 = vst.msk [vmem:[#allocation2 + $0x79] sm:$0xff] %vm686_vm0, %v662_v57  ;;  %v2181_v16 = vld [vmem:[#allocation2 + $0x3a] sm:$0xff]  ;;  %v665_v17 = vmax.f32 %v551_v15, 0.0  ;;  %3605 = vmatpush3.bf16.msra.mxu1 %v3602_v22  ;;  %3388 = vmatprep.mubr.f32.mxu1 %v402_v29  ;;  %v2003_v53 = vld [vmem:[#allocation2 + $0xf1] sm:$0xff] }
 0x193   : > { %v664_v23 = vmax.f32 %v546_v19, 0.0  ;;  %v2415_v24 = vld [vmem:[#allocation9 + $0x50] sm:$0xff]  ;;  %v2418_v28 = vld [vmem:[#allocation9 + $0x68] sm:$0xff]  ;;  %v3366_v45 = vpop.f32.mrb[12].mxu0  ;;  %v2182_v7 = vld [vmem:[#allocation2 + $0x4a] sm:$0xff] }
 0x194   : > { %896 = vrot.lane.b32.xlu1 %v830_v46, %s3986_s9  ;;  %v4510_v47 = vld [vmem:[#allocation2 + $0x60] sm:$0xff]  ;;  %v4513_v49 = vld [vmem:[#allocation2 + $0x68] sm:$0xff]  ;;  %743 = vst.msk [vmem:[#allocation2 + $0x99] sm:$0xff] %vm686_vm0, %v665_v17  ;;  %v403_v30 = vld [vmem:[%s4246_s8 + $0xe8] sm:$0xff]  ;;  %v3610_v31 = vpack.c.bf16 %v2418_v28, %v2417_v27  ;;  %v555_v48 = vpop.f32.mrb[13].mxu0 }
 0x195   : > { %1091 = vrot.lane.b32.xlu0 %v1601_v41, %s3985_s30  ;;  %805 = vst.msk [vmem:[#allocation3 + $0x48] sm:$0xff] %vm686_vm0, %v4513_v49  ;;  %804 = vst.msk [vmem:[#allocation3 + $0x40] sm:$0xff] %vm686_vm0, %v4510_v47  ;;  %3389 = vmatmul.mubr.f32.gmra.mrb[12].mxu1 %v403_v30  ;;  %v2180_v41 = vld [vmem:[#allocation2 + $0x32] sm:$0xff]  ;;  %v556_v51 = vadd.f32 %v4445_v59, %v555_v48  ;;  %v1992_v9 = vld [vmem:[#allocation2 + $0x69] sm:$0xff] }
 0x196   : > { %742 = vst.msk [vmem:[#allocation2 + $0x91] sm:$0xff] %vm686_vm0, %v664_v23  ;;  %v1811_v52 = vld [vmem:[#allocation2 + $0xf8] sm:$0xff]  ;;  %v1991_v23 = vld [vmem:[#allocation2 + $0x61] sm:$0xff] }
 0x197   : > { %v1990_v54 = vld [vmem:[#allocation2 + $0x51] sm:$0xff]  ;;  %v3369_v62 = vpop.f32.mrb[14].mxu0  ;;  %v2184_v27 = vld [vmem:[#allocation2 + $0x62] sm:$0xff] }
 0x198   : > { %1664 = vrot.lane.b32.xlu1 %v1600_v50, %s3989_s12  ;;  %v2183_v57 = vld [vmem:[#allocation2 + $0x52] sm:$0xff]  ;;  %v565_v2 = vpop.f32.mrb[15].mxu0 }
 0x199   : > { %2081 = vrot.lane.b32.xlu0 %v4465_v25, %s3991_s21  ;;  %v4537_v60 = vld [vmem:[#allocation2 + $0x78] sm:$0xff]  ;;  %v4539_v61 = vld [vmem:[#allocation2 + $0x80] sm:$0xff] }
 0x19a   : > { %807 = vst.msk [vmem:[#allocation3 + $0x58] sm:$0xff] %vm686_vm0, %v4539_v61  ;;  %806 = vst.msk [vmem:[#allocation3 + $0x50] sm:$0xff] %vm686_vm0, %v4537_v60 }
 0x19c   : > { %1089 = vrot.lane.b32.xlu1 %v1600_v50, %s3985_s30 }
 0x19d   : > { %930 = vrot.lane.b32.xlu0 %v4465_v25, %s3986_s9  ;;  %v2416_v25 = vld [vmem:[#allocation9 + $0x58] sm:$0xff]  ;;  %v4575_v38 = vld [vmem:[#allocation2 + $0x90] sm:$0xff] }
 0x19e   : > { %v3606_v26 = vpack.c.bf16 %v2416_v25, %v2415_v24  ;;  %808 = vst.msk [vmem:[#allocation3 + $0x60] sm:$0xff] %vm686_vm0, %v4575_v38 }
 0x1a0   : > { %1886 = vrot.lane.b32.xlu1 %v1808_v32, %s3992_s16  ;;  %3607 = vmatprep.subr.bf16.mxu1 %v3606_v26 }
 0x1a1   : > { %1698 = vrot.lane.b32.xlu0 %v2195_v37, %s3989_s12  ;;  %3609 = vmatpush3.bf16.msra.mxu1 %v3606_v26 }
 0x1a2   : > { %3611 = vmatprep.subr.bf16.mxu1 %v3610_v31 }
 0x1a4   : > { %1310 = vrot.lane.b32.xlu1 %v1808_v32, %s3990_s20  ;;  %v1987_v32 = vld [vmem:[#allocation2 + $0x31] sm:$0xff] }
 0x1a5   : > { %1123 = vrot.lane.b32.xlu0 %v2195_v37, %s3985_s30  ;;  %3613 = vmatpush3.bf16.msra.mxu1 %v3610_v31 }
 0x1a8   : > { %2079 = vrot.lane.b32.xlu1 %v2001_v58, %s3991_s21 }
 0x1a9   : > { %1278 = vrot.lane.b32.xlu0 %v4472_v33, %s3990_s20  ;;  %v2419_v33 = vld [vmem:[#allocation9 + $0x70] sm:$0xff] }
 0x1aa   : > { %v3614_v37 = vpack.c.bf16 %v2420_v34, %v2419_v33 }
 0x1ac   : > { %1503 = vrot.lane.b32.xlu1 %v2001_v58, %s3987_s10  ;;  %3615 = vmatprep.subr.bf16.mxu1 %v3614_v37 }
 0x1ad   : > { %1471 = vrot.lane.b32.xlu0 %v830_v46, %s3987_s10  ;;  %3617 = vmatpush3.bf16.msra.mxu1 %v3614_v37  ;;  %v561_v46 = vadd.f32 %v3366_v45, %v4445_v59 }
 0x1af   : > { %v667_v50 = vmax.f32 %v561_v46, 0.0 }
 0x1b0   : > { %2272 = vrot.lane.b32.xlu1 %v2194_v1, %s3988_s14 }
 0x1b1   : > { %1888 = vrot.lane.b32.xlu0 %v4477_v35, %s3992_s16  ;;  %745 = vst.msk [vmem:[#allocation2 + $0xb1] sm:$0xff] %vm686_vm0, %v667_v50 }
 0x1b4   : > { %1121 = vrot.lane.b32.xlu1 %v2194_v1, %s3985_s30 }
 0x1b5   : > { %1312 = vrot.lane.b32.xlu0 %v4477_v35, %s3990_s20  ;;  %v404_v35 = vld [vmem:[%s4246_s8 + $0xf0] sm:$0xff] }
 0x1b6   : > { %3391 = vmatprep.mubr.f32.mxu1 %v404_v35 }
 0x1b7   : > { %3392 = vmatmul.mubr.f32.gmra.mrb[14].mxu1 %v405_v36  ;;  %v2187_v36 = vld [vmem:[#allocation2 + $0x82] sm:$0xff] }
 0x1b8   : > { %1477 = vrot.lane.b32.xlu1 %v1410_v8, %s3987_s10 }
 0x1b9   : > { %928 = vrot.lane.b32.xlu0 %v2001_v58, %s3986_s9  ;;  %v1989_v58 = vld [vmem:[#allocation2 + $0x49] sm:$0xff] }
 0x1bc   : > { %2246 = vrot.lane.b32.xlu1 %v2181_v16, %s3988_s14 }
 0x1bd   : > { %1696 = vrot.lane.b32.xlu0 %v2194_v1, %s3989_s12  ;;  %v571_v1 = vadd.f32 %v3369_v62, %v4445_v59 }
 0x1bf   : > { %v669_v3 = vmax.f32 %v571_v1, 0.0  ;;  %v2186_v1 = vld [vmem:[#allocation2 + $0x7a] sm:$0xff] }
 0x1c0   : > { %1858 = vrot.lane.b32.xlu1 %v4486_v39, %s3992_s16 }
 0x1c1   : > { %2053 = vrot.lane.b32.xlu0 %v1410_v8, %s3991_s21  ;;  %747 = vst.msk [vmem:[#allocation2 + $0xc9] sm:$0xff] %vm686_vm0, %v669_v3 }
 0x1c4   : > { %1282 = vrot.lane.b32.xlu1 %v4486_v39, %s3990_s20  ;;  %v4577_v39 = vld [vmem:[#allocation2 + $0x98] sm:$0xff] }
 0x1c5   : > { %902 = vrot.lane.b32.xlu0 %v1410_v8, %s3986_s9  ;;  %809 = vst.msk [vmem:[#allocation3 + $0x68] sm:$0xff] %vm686_vm0, %v4577_v39 }
 0x1c8   : > { %2051 = vrot.lane.b32.xlu1 %v1987_v32, %s3991_s21 }
 0x1c9   : > { %1670 = vrot.lane.b32.xlu0 %v2181_v16, %s3989_s12 }
 0x1cc   : > { %1475 = vrot.lane.b32.xlu1 %v1987_v32, %s3987_s10 }
 0x1cd   : > { %1095 = vrot.lane.b32.xlu0 %v2181_v16, %s3985_s30  ;;  %v2185_v16 = vld [vmem:[#allocation2 + $0x6a] sm:$0xff] }
 0x1d0   : > { %2244 = vrot.lane.b32.xlu1 %v2180_v41, %s3988_s14 }
 0x1d1   : > { %1860 = vrot.lane.b32.xlu0 %v4488_v40, %s3992_s16 }
 0x1d4   : > { %1093 = vrot.lane.b32.xlu1 %v2180_v41, %s3985_s30 }
 0x1d5   : > { %1284 = vrot.lane.b32.xlu0 %v4488_v40, %s3990_s20  ;;  %v666_v40 = vmax.f32 %v556_v51, 0.0 }
 0x1d7   : > { %744 = vst.msk [vmem:[#allocation2 + $0xa9] sm:$0xff] %vm686_vm0, %v666_v40 }
 0x1d8   : > { %1890 = vrot.lane.b32.xlu1 %v1810_v44, %s3992_s16 }
 0x1d9   : > { %900 = vrot.lane.b32.xlu0 %v1987_v32, %s3986_s9  ;;  %v3378_v32 = vpop.f32.mrb[4].mxu1 }
 0x1da   : > { %v601_v35 = vadd.f32 %v3378_v32, %v4445_v59 }
 0x1dc   : > { %1314 = vrot.lane.b32.xlu1 %v1810_v44, %s3990_s20  ;;  %v675_v37 = vmax.f32 %v601_v35, 0.0 }
 0x1dd   : > { %1668 = vrot.lane.b32.xlu0 %v2180_v41, %s3989_s12  ;;  %v595_v41 = vpop.f32.mrb[5].mxu1 }
 0x1de   : > { %v4605_v55 = vld [vmem:[#allocation2 + $0xa8] sm:$0xff]  ;;  %v4607_v56 = vld [vmem:[#allocation2 + $0xb0] sm:$0xff]  ;;  %753 = vst.msk [vmem:[#allocation2 + $0x111] sm:$0xff] %vm686_vm0, %v675_v37  ;;  %v596_v46 = vadd.f32 %v4445_v59, %v595_v41 }
 0x1df   : > { %811 = vst.msk [vmem:[#allocation3 + $0x78] sm:$0xff] %vm686_vm0, %v4607_v56  ;;  %810 = vst.msk [vmem:[#allocation3 + $0x70] sm:$0xff] %vm686_vm0, %v4605_v55  ;;  %v2188_v37 = vld [vmem:[#allocation2 + $0x92] sm:$0xff] }
 0x1e0   : > { %2083 = vrot.lane.b32.xlu1 %v2003_v53, %s3991_s21  ;;  %v674_v48 = vmax.f32 %v596_v46, 0.0 }
 0x1e1   : > { %1892 = vrot.lane.b32.xlu0 %v1811_v52, %s3992_s16 }
 0x1e2   : > { %752 = vst.msk [vmem:[#allocation2 + $0x109] sm:$0xff] %vm686_vm0, %v674_v48 }
 0x1e4   : > { %1507 = vrot.lane.b32.xlu1 %v2003_v53, %s3987_s10  ;;  %v1993_v53 = vld [vmem:[#allocation2 + $0x79] sm:$0xff] }
 0x1e5   : > { %1316 = vrot.lane.b32.xlu0 %v1811_v52, %s3990_s20 }
 0x1e8   : > { %1481 = vrot.lane.b32.xlu1 %v1990_v54, %s3987_s10 }
 0x1e9   : > { %2057 = vrot.lane.b32.xlu0 %v1990_v54, %s3991_s21 }
 0x1ec   : > { %2250 = vrot.lane.b32.xlu1 %v2183_v57, %s3988_s14 }
 0x1ed   : > { %906 = vrot.lane.b32.xlu0 %v1990_v54, %s3986_s9  ;;  %v4721_v54 = vld [vmem:[#allocation2 + $0x108] sm:$0xff] }
 0x1ee   : > { %818 = vst.msk [vmem:[#allocation3 + $0xb0] sm:$0xff] %vm686_vm0, %v4721_v54 }
 0x1f0   : > { %1862 = vrot.lane.b32.xlu1 %v4498_v42, %s3992_s16 }
 0x1f1   : > { %1674 = vrot.lane.b32.xlu0 %v2183_v57, %s3989_s12 }
 0x1f4   : > { %1286 = vrot.lane.b32.xlu1 %v4498_v42, %s3990_s20  ;;  %v566_v42 = vadd.f32 %v4445_v59, %v565_v2 }
 0x1f5   : > { %1099 = vrot.lane.b32.xlu0 %v2183_v57, %s3985_s30  ;;  %v4723_v57 = vld [vmem:[#allocation2 + $0x110] sm:$0xff] }
 0x1f6   : > { %v668_v6 = vmax.f32 %v566_v42, 0.0  ;;  %819 = vst.msk [vmem:[#allocation3 + $0xb8] sm:$0xff] %vm686_vm0, %v4723_v57 }
 0x1f8   : > { %2055 = vrot.lane.b32.xlu1 %v1989_v58, %s3991_s21  ;;  %746 = vst.msk [vmem:[#allocation2 + $0xc1] sm:$0xff] %vm686_vm0, %v668_v6  ;;  %v3381_v6 = vpop.f32.mrb[6].mxu1 }
 0x1f9   : > { %1864 = vrot.lane.b32.xlu0 %v4500_v43, %s3992_s16 }
 0x1fa   : > { %v4624_v63 = vpop.permute.xlu1 %1505 }
 0x1fb   : > { %v1474_v0 = vpop.permute.xlu0 %1473 }
 0x1fc   : > { %1479 = vrot.lane.b32.xlu1 %v1989_v58, %s3987_s10 }
 0x1fd   : > { %1288 = vrot.lane.b32.xlu0 %v4500_v43, %s3990_s20 }
 0x1fe   : > { %v4631_v4 = vpop.permute.xlu1 %2274 }
 0x1ff   : > { %v899_v5 = vpop.permute.xlu0 %898  ;;  %v4647_v12 = vld [vmem:[#allocation2 + $0xc0] sm:$0xff]  ;;  %v4649_v13 = vld [vmem:[#allocation2 + $0xc8] sm:$0xff] }
 0x200   : > { %992 = vst.msk [vmem:[#allocation3 + $0x18] sm:$0xff] %vm988_vm3, %v899_v5  ;;  %2248 = vrot.lane.b32.xlu1 %v2182_v7, %s3988_s14 }
 0x201   : > { %904 = vrot.lane.b32.xlu0 %v1989_v58, %s3986_s9  ;;  %813 = vst.msk [vmem:[#allocation3 + $0x88] sm:$0xff] %vm686_vm0, %v4649_v13  ;;  %812 = vst.msk [vmem:[#allocation3 + $0x80] sm:$0xff] %vm686_vm0, %v4647_v12 }
 0x202   : > { %v1281_v8 = vpop.permute.xlu1 %1280 }
 0x203   : > { %v1667_v43 = vpop.permute.xlu0 %1666  ;;  %1376 = vst.msk [vmem:[#allocation3 + $0x8] sm:$0xff] %vm1374_vm5, %v1281_v8 }
 0x204   : > { %1569 = vst.msk [vmem:[#allocation3 + $0x8] sm:$0xff] %vm1567_vm6, %v1474_v0  ;;  %1097 = vrot.lane.b32.xlu1 %v2182_v7, %s3985_s30 }
 0x205   : > { %1672 = vrot.lane.b32.xlu0 %v2182_v7, %s3989_s12  ;;  %1762 = vst.msk [vmem:[#allocation3 + $0x8] sm:$0xff] %vm1760_vm7, %v1667_v43 }
 0x206   : > { %v897_v11 = vpop.permute.xlu1 %896 }
 0x207   : > { %v1092_v10 = vpop.permute.xlu0 %1091  ;;  %991 = vst.msk [vmem:[#allocation3 + $0x10] sm:$0xff] %vm988_vm3, %v897_v11 }
 0x208   : > { %1185 = vst.msk [vmem:[#allocation3 + $0x18] sm:$0xff] %vm1181_vm4, %v1092_v10  ;;  %1485 = vrot.lane.b32.xlu1 %v1992_v9, %s3987_s10  ;;  %v2189_v10 = vld [vmem:[#allocation2 + $0x9a] sm:$0xff] }
 0x209   : > { %2061 = vrot.lane.b32.xlu0 %v1992_v9, %s3991_s21 }
 0x20a   : > { %v1665_v15 = vpop.permute.xlu1 %1664 }
 0x20b   : > { %v4651_v14 = vpop.permute.xlu0 %2081 }
 0x20c   : > { %2254 = vrot.lane.b32.xlu1 %v2185_v16, %s3988_s14 }
 0x20d   : > { %910 = vrot.lane.b32.xlu0 %v1992_v9, %s3986_s9  ;;  %v611_v9 = vadd.f32 %v3381_v6, %v4445_v59 }
 0x20e   : > { %v1090_v18 = vpop.permute.xlu1 %1089 }
 0x20f   : > { %v931_v17 = vpop.permute.xlu0 %930  ;;  %1184 = vst.msk [vmem:[#allocation3 + $0x10] sm:$0xff] %vm1181_vm4, %v1090_v18 }
 0x210   : > { %1008 = vst.msk [vmem:[#allocation3 + $0x98] sm:$0xff] %vm988_vm3, %v931_v17  ;;  %1866 = vrot.lane.b32.xlu1 %v4510_v47, %s3992_s16 }
 0x211   : > { %1678 = vrot.lane.b32.xlu0 %v2185_v16, %s3989_s12 }
 0x212   : > { %v4666_v20 = vpop.permute.xlu1 %1886 }
 0x213   : > { %v4664_v19 = vpop.permute.xlu0 %1698 }
 0x214   : > { %1290 = vrot.lane.b32.xlu1 %v4510_v47, %s3990_s20 }
 0x215   : > { %1103 = vrot.lane.b32.xlu0 %v2185_v16, %s3985_s30  ;;  %v605_v16 = vpop.f32.mrb[7].mxu1 }
 0x216   : > { %v4671_v22 = vpop.permute.xlu1 %1310 }
 0x217   : > { %v1124_v21 = vpop.permute.xlu0 %1123 }
 0x218   : > { %1201 = vst.msk [vmem:[#allocation3 + $0x98] sm:$0xff] %vm1181_vm4, %v1124_v21  ;;  %2059 = vrot.lane.b32.xlu1 %v1991_v23, %s3991_s21  ;;  %v606_v21 = vadd.f32 %v4445_v59, %v605_v16  ;;  %v2190_v16 = vld [vmem:[#allocation2 + $0xaa] sm:$0xff] }
 0x219   : > { %1868 = vrot.lane.b32.xlu0 %v4513_v49, %s3992_s16 }
 0x21a   : > { %v4677_v25 = vpop.permute.xlu1 %2079 }
 0x21b   : > { %v1279_v24 = vpop.permute.xlu0 %1278 }
 0x21c   : > { %1375 = vst.msk [vmem:[#allocation3] sm:$0xff] %vm1374_vm5, %v1279_v24  ;;  %1483 = vrot.lane.b32.xlu1 %v1991_v23, %s3987_s10 }
 0x21d   : > { %1292 = vrot.lane.b32.xlu0 %v4513_v49, %s3990_s20  ;;  %v1994_v49 = vld [vmem:[#allocation2 + $0x81] sm:$0xff] }
 0x21e   : > { %v4683_v26 = vpop.permute.xlu1 %1503 }
 0x21f   : > { %v1472_v47 = vpop.permute.xlu0 %1471 }
 0x220   : > { %1568 = vst.msk [vmem:[#allocation3] sm:$0xff] %vm1567_vm6, %v1472_v47  ;;  %2252 = vrot.lane.b32.xlu1 %v2184_v27, %s3988_s14 }
 0x221   : > { %908 = vrot.lane.b32.xlu0 %v1991_v23, %s3986_s9  ;;  %1761 = vst.msk [vmem:[#allocation3] sm:$0xff] %vm1760_vm7, %v1665_v15  ;;  %v677_v15 = vmax.f32 %v611_v9, 0.0  ;;  %v676_v23 = vmax.f32 %v606_v21, 0.0 }
 0x222   : > { %v4691_v29 = vpop.permute.xlu1 %2272 }
 0x223   : > { %v4689_v28 = vpop.permute.xlu0 %1888  ;;  %755 = vst.msk [vmem:[#allocation2 + $0x129] sm:$0xff] %vm686_vm0, %v677_v15  ;;  %754 = vst.msk [vmem:[#allocation2 + $0x121] sm:$0xff] %vm686_vm0, %v676_v23 }
 0x224   : > { %1101 = vrot.lane.b32.xlu1 %v2184_v27, %s3985_s30 }
 0x225   : > { %1676 = vrot.lane.b32.xlu0 %v2184_v27, %s3989_s12 }
 0x226   : > { %v1122_v31 = vpop.permute.xlu1 %1121 }
 0x227   : > { %v4695_v30 = vpop.permute.xlu0 %1312 }
 0x228   : > { %1489 = vrot.lane.b32.xlu1 %v1994_v49, %s3987_s10 }
 0x229   : > { %2065 = vrot.lane.b32.xlu0 %v1994_v49, %s3991_s21 }
 0x22a   : > { %v1478_v34 = vpop.permute.xlu1 %1477  ;;  %v4775_v32 = vld [vmem:[#allocation2 + $0x120] sm:$0xff] }
 0x22b   : > { %v929_v33 = vpop.permute.xlu0 %928  ;;  %820 = vst.msk [vmem:[#allocation3 + $0xc0] sm:$0xff] %vm686_vm0, %v4775_v32 }
 0x22c   : > { %1007 = vst.msk [vmem:[#allocation3 + $0x90] sm:$0xff] %vm988_vm3, %v929_v33  ;;  %2258 = vrot.lane.b32.xlu1 %v2187_v36, %s3988_s14  ;;  %v4777_v33 = vld [vmem:[#allocation2 + $0x128] sm:$0xff] }
 0x22d   : > { %1200 = vst.msk [vmem:[#allocation3 + $0x90] sm:$0xff] %vm1181_vm4, %v1122_v31  ;;  %914 = vrot.lane.b32.xlu0 %v1994_v49, %s3986_s9  ;;  %v1995_v31 = vld [vmem:[#allocation2 + $0x91] sm:$0xff] }
 0x22e   : > { %v2247_v45 = vpop.permute.xlu1 %2246  ;;  %821 = vst.msk [vmem:[#allocation3 + $0xc8] sm:$0xff] %vm686_vm0, %v4777_v33 }
 0x22f   : > { %v4704_v44 = vpop.permute.xlu0 %1696 }
 0x230   : > { %1870 = vrot.lane.b32.xlu1 %v4537_v60, %s3992_s16 }
 0x231   : > { %1682 = vrot.lane.b32.xlu0 %v2187_v36, %s3989_s12 }
 0x232   : > { %v1859_v51 = vpop.permute.xlu1 %1858 }
 0x233   : > { %v2054_v50 = vpop.permute.xlu0 %2053  ;;  %1955 = vst.msk [vmem:[#allocation3] sm:$0xff] %vm1954_vm8, %v1859_v51 }
 0x234   : > { %1294 = vrot.lane.b32.xlu1 %v4537_v60, %s3990_s20 }
 0x235   : > { %1107 = vrot.lane.b32.xlu0 %v2187_v36, %s3985_s30 }
 0x236   : > { %v1283_v52 = vpop.permute.xlu1 %1282 }
 0x237   : > { %v903_v40 = vpop.permute.xlu0 %902  ;;  %1377 = vst.msk [vmem:[#allocation3 + $0x10] sm:$0xff] %vm1374_vm5, %v1283_v52  ;;  %v3384_v52 = vpop.f32.mrb[8].mxu1 }
 0x238   : > { %994 = vst.msk [vmem:[#allocation3 + $0x28] sm:$0xff] %vm988_vm3, %v903_v40  ;;  %2063 = vrot.lane.b32.xlu1 %v1993_v53, %s3991_s21  ;;  %v2191_v40 = vld [vmem:[#allocation2 + $0xb2] sm:$0xff] }
 0x239   : > { %1872 = vrot.lane.b32.xlu0 %v4539_v61, %s3992_s16 }
 0x23a   : > { %v2052_v62 = vpop.permute.xlu1 %2051 }
 0x23b   : > { %v1671_v58 = vpop.permute.xlu0 %1670  ;;  %2148 = vst.msk [vmem:[#allocation3] sm:$0xff] %vm2147_vm9, %v2052_v62 }
 0x23c   : > { %1487 = vrot.lane.b32.xlu1 %v1993_v53, %s3987_s10 }
 0x23d   : > { %1296 = vrot.lane.b32.xlu0 %v4539_v61, %s3990_s20  ;;  %v1996_v61 = vld [vmem:[#allocation2 + $0x99] sm:$0xff] }
 0x23e   : > { %v1476_v0 = vpop.permute.xlu1 %1475 }
 0x23f   : > { %v1096_v60 = vpop.permute.xlu0 %1095  ;;  %1570 = vst.msk [vmem:[#allocation3 + $0x10] sm:$0xff] %vm1567_vm6, %v1476_v0 }
 0x240   : > { %1187 = vst.msk [vmem:[#allocation3 + $0x28] sm:$0xff] %vm1181_vm4, %v1096_v60  ;;  %2256 = vrot.lane.b32.xlu1 %v2186_v1, %s3988_s14 }
 0x241   : > { %912 = vrot.lane.b32.xlu0 %v1993_v53, %s3986_s9  ;;  %v621_v53 = vadd.f32 %v3384_v52, %v4445_v59 }
 0x242   : > { %v2245_v3 = vpop.permute.xlu1 %2244 }
 0x243   : > { %v1861_v2 = vpop.permute.xlu0 %1860  ;;  %2341 = vst.msk [vmem:[#allocation3] sm:$0xff] %vm2340_vm10, %v2245_v3 }
 0x244   : > { %1956 = vst.msk [vmem:[#allocation3 + $0x8] sm:$0xff] %vm1954_vm8, %v1861_v2  ;;  %1105 = vrot.lane.b32.xlu1 %v2186_v1, %s3985_s30 }
 0x245   : > { %2149 = vst.msk [vmem:[#allocation3 + $0x8] sm:$0xff] %vm2147_vm9, %v2054_v50  ;;  %1680 = vrot.lane.b32.xlu0 %v2186_v1, %s3989_s12  ;;  %v679_v1 = vmax.f32 %v621_v53, 0.0 }
 0x246   : > { %2342 = vst.msk [vmem:[#allocation3 + $0x8] sm:$0xff] %vm2340_vm10, %v2247_v45  ;;  %v1094_v5 = vpop.permute.xlu1 %1093 }
 0x247   : > { %v1285_v42 = vpop.permute.xlu0 %1284  ;;  %757 = vst.msk [vmem:[#allocation2 + $0x141] sm:$0xff] %vm686_vm0, %v679_v1 }
 0x248   : > { %1378 = vst.msk [vmem:[#allocation3 + $0x18] sm:$0xff] %vm1374_vm5, %v1285_v42  ;;  %1493 = vrot.lane.b32.xlu1 %v1996_v61, %s3987_s10 }
 0x249   : > { %1571 = vst.msk [vmem:[#allocation3 + $0x18] sm:$0xff] %vm1567_vm6, %v1478_v34  ;;  %2069 = vrot.lane.b32.xlu0 %v1996_v61, %s3991_s21 }
 0x24a   : > { %1764 = vst.msk [vmem:[#allocation3 + $0x18] sm:$0xff] %vm1760_vm7, %v1671_v58  ;;  %v4748_v43 = vpop.permute.xlu1 %1890  ;;  %v2373_v8 = vld [vmem:[#allocation3] sm:$0xff]  ;;  %v615_v58 = vpop.f32.mrb[9].mxu1 }
 0x24b   : > { %v901_v7 = vpop.permute.xlu0 %900  ;;  %3426 = vmatprep.mubr.f32.mxu1 %v2373_v8  ;;  %v616_v0 = vadd.f32 %v4445_v59, %v615_v58 }
 0x24c   : > { %993 = vst.msk [vmem:[#allocation3 + $0x20] sm:$0xff] %vm988_vm3, %v901_v7  ;;  %2262 = vrot.lane.b32.xlu1 %v2189_v10, %s3988_s14 }
 0x24d   : > { %1186 = vst.msk [vmem:[#allocation3 + $0x20] sm:$0xff] %vm1181_vm4, %v1094_v5  ;;  %918 = vrot.lane.b32.xlu0 %v1996_v61, %s3986_s9  ;;  %v2374_v11 = vld [vmem:[#allocation3 + $0x8] sm:$0xff]  ;;  %v678_v2 = vmax.f32 %v616_v0, 0.0  ;;  %v1997_v5 = vld [vmem:[#allocation2 + $0xa9] sm:$0xff] }
 0x24e   : > { %3427 = vmatmul.mubr.f32.vlgmr.msra.gmra.mrb[16].mxu1 %v2374_v11  ;;  %v1315_v18 = vpop.permute.xlu1 %1314 }
 0x24f   : > { %v1669_v17 = vpop.permute.xlu0 %1668  ;;  %1393 = vst.msk [vmem:[#allocation3 + $0x90] sm:$0xff] %vm1374_vm5, %v1315_v18 }
 0x250   : > { %1763 = vst.msk [vmem:[#allocation3 + $0x10] sm:$0xff] %vm1760_vm7, %v1669_v17  ;;  %1874 = vrot.lane.b32.xlu1 %v4575_v38, %s3992_s16 }
 0x251   : > { %1686 = vrot.lane.b32.xlu0 %v2189_v10, %s3989_s12  ;;  %756 = vst.msk [vmem:[#allocation2 + $0x139] sm:$0xff] %vm686_vm0, %v678_v2  ;;  %v2691_v2 = vld [vmem:[#allocation10 + $0x30] sm:$0xff] }
 0x252   : > { %v4764_v47 = vpop.permute.xlu1 %2083 }
 0x253   : > { %v4762_v24 = vpop.permute.xlu0 %1892 }
 0x254   : > { %1298 = vrot.lane.b32.xlu1 %v4575_v38, %s3990_s20 }
 0x255   : > { %1111 = vrot.lane.b32.xlu0 %v2189_v10, %s3985_s30 }
 0x256   : > { %v1508_v49 = vpop.permute.xlu1 %1507 }
 0x257   : > { %v1317_v27 = vpop.permute.xlu0 %1316  ;;  %1586 = vst.msk [vmem:[#allocation3 + $0x90] sm:$0xff] %vm1567_vm6, %v1508_v49  ;;  %v2686_v49 = vld [vmem:[#allocation10 + $0x8] sm:$0xff] }
 0x258   : > { %1394 = vst.msk [vmem:[#allocation3 + $0x98] sm:$0xff] %vm1374_vm5, %v1317_v27  ;;  %2067 = vrot.lane.b32.xlu1 %v1995_v31, %s3991_s21  ;;  %v4823_v6 = vld [vmem:[#allocation2 + $0x138] sm:$0xff]  ;;  %v4825_v7 = vld [vmem:[#allocation2 + $0x140] sm:$0xff]  ;;  %v2685_v27 = vld [vmem:[#allocation10] sm:$0xff] }
 0x259   : > { %1876 = vrot.lane.b32.xlu0 %v4577_v39, %s3992_s16  ;;  %822 = vst.msk [vmem:[#allocation3 + $0xd0] sm:$0xff] %vm686_vm0, %v4823_v6  ;;  %823 = vst.msk [vmem:[#allocation3 + $0xd8] sm:$0xff] %vm686_vm0, %v4825_v7 }
 0x25a   : > { %v1482_v35 = vpop.permute.xlu1 %1481 }
 0x25b   : > { %v2058_v34 = vpop.permute.xlu0 %2057 }
 0x25c   : > { %1491 = vrot.lane.b32.xlu1 %v1995_v31, %s3987_s10 }
 0x25d   : > { %1300 = vrot.lane.b32.xlu0 %v4577_v39, %s3990_s20  ;;  %v1998_v39 = vld [vmem:[#allocation2 + $0xb1] sm:$0xff] }
 0x25e   : > { %v2251_v36 = vpop.permute.xlu1 %2250 }
 0x25f   : > { %v907_v38 = vpop.permute.xlu0 %906 }
 0x260   : > { %996 = vst.msk [vmem:[#allocation3 + $0x38] sm:$0xff] %vm988_vm3, %v907_v38  ;;  %2260 = vrot.lane.b32.xlu1 %v2188_v37, %s3988_s14  ;;  %v2687_v38 = vld [vmem:[#allocation10 + $0x10] sm:$0xff] }
 0x261   : > { %916 = vrot.lane.b32.xlu0 %v1995_v31, %s3986_s9  ;;  %v3618_v31 = vpack.c.bf16 %v2686_v49, %v2685_v27 }
 0x262   : > { %v1863_v45 = vpop.permute.xlu1 %1862 }
 0x263   : > { %v1675_v41 = vpop.permute.xlu0 %1674  ;;  %1957 = vst.msk [vmem:[#allocation3 + $0x10] sm:$0xff] %vm1954_vm8, %v1863_v45  ;;  %3619 = vmatprep.subr.bf16.mxu0 %v3618_v31  ;;  %v3387_v45 = vpop.f32.mrb[10].mxu1 }
 0x264   : > { %1109 = vrot.lane.b32.xlu1 %v2188_v37, %s3985_s30  ;;  %3621 = vmatpush3.bf16.msra.mxu0 %v3618_v31  ;;  %v625_v52 = vpop.f32.mrb[11].mxu1 }
 0x265   : > { %1684 = vrot.lane.b32.xlu0 %v2188_v37, %s3989_s12  ;;  %v2193_v37 = vld [vmem:[#allocation2 + $0xca] sm:$0xff] }
 0x266   : > { %v1287_v48 = vpop.permute.xlu1 %1286 }
 0x267   : > { %v1100_v46 = vpop.permute.xlu0 %1099  ;;  %1379 = vst.msk [vmem:[#allocation3 + $0x20] sm:$0xff] %vm1374_vm5, %v1287_v48  ;;  %v4853_v48 = vld [vmem:[%s5439_s2] ss:$0 sm:$0xff] }
 0x268   : > { %1189 = vst.msk [vmem:[#allocation3 + $0x38] sm:$0xff] %vm1181_vm4, %v1100_v46  ;;  %1497 = vrot.lane.b32.xlu1 %v1998_v39, %s3987_s10 }
 0x269   : > { %2073 = vrot.lane.b32.xlu0 %v1998_v39, %s3991_s21 }
 0x26a   : > { %v2056_v51 = vpop.permute.xlu1 %2055 }
 0x26b   : > { %v1865_v50 = vpop.permute.xlu0 %1864  ;;  %2150 = vst.msk [vmem:[#allocation3 + $0x10] sm:$0xff] %vm2147_vm9, %v2056_v51  ;;  %v2689_v51 = vld [vmem:[#allocation10 + $0x20] sm:$0xff] }
 0x26c   : > { %1958 = vst.msk [vmem:[#allocation3 + $0x18] sm:$0xff] %vm1954_vm8, %v1865_v50  ;;  %2266 = vrot.lane.b32.xlu1 %v2191_v40, %s3988_s14  ;;  %v631_v50 = vadd.f32 %v4853_v48, %v3387_v45 }
 0x26d   : > { %2151 = vst.msk [vmem:[#allocation3 + $0x18] sm:$0xff] %vm2147_vm9, %v2058_v34  ;;  %922 = vrot.lane.b32.xlu0 %v1998_v39, %s3986_s9 }
 0x26e   : > { %2344 = vst.msk [vmem:[#allocation3 + $0x18] sm:$0xff] %vm2340_vm10, %v2251_v36  ;;  %v1480_v60 = vpop.permute.xlu1 %1479  ;;  %v2688_v36 = vld [vmem:[#allocation10 + $0x18] sm:$0xff]  ;;  %v681_v58 = vmax.f32 %v631_v50, 0.0 }
 0x26f   : > { %v1289_v62 = vpop.permute.xlu0 %1288  ;;  %1572 = vst.msk [vmem:[#allocation3 + $0x20] sm:$0xff] %vm1567_vm6, %v1480_v60 }
 0x270   : > { %1380 = vst.msk [vmem:[#allocation3 + $0x28] sm:$0xff] %vm1374_vm5, %v1289_v62  ;;  %1878 = vrot.lane.b32.xlu1 %v4605_v55, %s3992_s16  ;;  %v626_v62 = vadd.f32 %v4853_v48, %v625_v52 }
 0x271   : > { %1573 = vst.msk [vmem:[#allocation3 + $0x28] sm:$0xff] %vm1567_vm6, %v1482_v35  ;;  %1690 = vrot.lane.b32.xlu0 %v2191_v40, %s3989_s12 }
 0x272   : > { %1766 = vst.msk [vmem:[#allocation3 + $0x28] sm:$0xff] %vm1760_vm7, %v1675_v41  ;;  %v2249_v61 = vpop.permute.xlu1 %2248  ;;  %v3622_v41 = vpack.c.bf16 %v2688_v36, %v2687_v38  ;;  %v680_v1 = vmax.f32 %v626_v62, 0.0 }
 0x273   : > { %v905_v3 = vpop.permute.xlu0 %904  ;;  %2343 = vst.msk [vmem:[#allocation3 + $0x10] sm:$0xff] %vm2340_vm10, %v2249_v61 }
 0x274   : > { %995 = vst.msk [vmem:[#allocation3 + $0x30] sm:$0xff] %vm988_vm3, %v905_v3  ;;  %1302 = vrot.lane.b32.xlu1 %v4605_v55, %s3990_s20  ;;  %3623 = vmatprep.subr.bf16.mxu0 %v3622_v41  ;;  %v2692_v3 = vld [vmem:[#allocation10 + $0x38] sm:$0xff] }
 0x275   : > { %1115 = vrot.lane.b32.xlu0 %v2191_v40, %s3985_s30  ;;  %v2376_v55 = vld [vmem:[#allocation3 + $0x18] sm:$0xff]  ;;  %3625 = vmatpush3.bf16.msra.mxu0 %v3622_v41  ;;  %v2690_v40 = vld [vmem:[#allocation10 + $0x28] sm:$0xff]  ;;  %759 = vst.msk [vmem:[#allocation2 + $0x159] sm:$0xff] %vm686_vm0, %v681_v58  ;;  %v3630_v61 = vpack.c.bf16 %v2692_v3, %v2691_v2  ;;  %758 = vst.msk [vmem:[#allocation2 + $0x151] sm:$0xff] %vm686_vm0, %v680_v1 }
 0x276   : > { %v1098_v42 = vpop.permute.xlu1 %1097  ;;  %v3626_v53 = vpack.c.bf16 %v2690_v40, %v2689_v51  ;;  %v2700_v58 = vld [vmem:[#allocation10 + $0x78] sm:$0xff]  ;;  %v2196_v3 = vld [vmem:[#allocation2 + $0xf2] sm:$0xff] }
 0x277   : > { %v1673_v59 = vpop.permute.xlu0 %1672  ;;  %1188 = vst.msk [vmem:[#allocation3 + $0x30] sm:$0xff] %vm1181_vm4, %v1098_v42 }
 0x278   : > { %1765 = vst.msk [vmem:[#allocation3 + $0x20] sm:$0xff] %vm1760_vm7, %v1673_v59  ;;  %2071 = vrot.lane.b32.xlu1 %v1997_v5, %s3991_s21  ;;  %3627 = vmatprep.subr.bf16.mxu0 %v3626_v53 }
 0x279   : > { %1880 = vrot.lane.b32.xlu0 %v4607_v56, %s3992_s16  ;;  %3629 = vmatpush3.bf16.msra.mxu0 %v3626_v53  ;;  %v2699_v53 = vld [vmem:[#allocation10 + $0x70] sm:$0xff] }
 0x27a   : > { %v1486_v9 = vpop.permute.xlu1 %1485  ;;  %v2375_v10 = vld [vmem:[#allocation3 + $0x10] sm:$0xff]  ;;  %3631 = vmatprep.subr.bf16.mxu0 %v3630_v61 }
 0x27b   : > { %v2062_v8 = vpop.permute.xlu0 %2061  ;;  %3429 = vmatprep.mubr.f32.mxu1 %v2375_v10 }
 0x27c   : > { %1495 = vrot.lane.b32.xlu1 %v1997_v5, %s3987_s10  ;;  %3430 = vmatmul.mubr.f32.gmra.mrb[18].mxu1 %v2376_v55 }
 0x27d   : > { %1304 = vrot.lane.b32.xlu0 %v4607_v56, %s3990_s20  ;;  %v2000_v56 = vld [vmem:[#allocation2 + $0xc9] sm:$0xff]  ;;  %3633 = vmatpush3.bf16.msra.mxu0 %v3630_v61 }
 0x27e   : > { %v2255_v15 = vpop.permute.xlu1 %2254 }
 0x27f   : > { %v911_v11 = vpop.permute.xlu0 %910 }
 0x280   : > { %998 = vst.msk [vmem:[#allocation3 + $0x48] sm:$0xff] %vm988_vm3, %v911_v11  ;;  %2264 = vrot.lane.b32.xlu1 %v2190_v16, %s3988_s14 }
 0x281   : > { %920 = vrot.lane.b32.xlu0 %v1997_v5, %s3986_s9  ;;  %v2693_v5 = vld [vmem:[#allocation10 + $0x40] sm:$0xff] }
 0x282   : > { %v1867_v18 = vpop.permute.xlu1 %1866 }
 0x283   : > { %v1679_v17 = vpop.permute.xlu0 %1678  ;;  %1959 = vst.msk [vmem:[#allocation3 + $0x20] sm:$0xff] %vm1954_vm8, %v1867_v18 }
 0x284   : > { %1113 = vrot.lane.b32.xlu1 %v2190_v16, %s3985_s30 }
 0x285   : > { %1688 = vrot.lane.b32.xlu0 %v2190_v16, %s3989_s12  ;;  %v2696_v16 = vld [vmem:[#allocation10 + $0x58] sm:$0xff] }
 0x286   : > { %v1291_v23 = vpop.permute.xlu1 %1290 }
 0x287   : > { %v1104_v21 = vpop.permute.xlu0 %1103  ;;  %1381 = vst.msk [vmem:[#allocation3 + $0x30] sm:$0xff] %vm1374_vm5, %v1291_v23  ;;  %v3390_v23 = vpop.f32.mrb[12].mxu1 }
 0x288   : > { %1191 = vst.msk [vmem:[#allocation3 + $0x48] sm:$0xff] %vm1181_vm4, %v1104_v21  ;;  %1501 = vrot.lane.b32.xlu1 %v2000_v56, %s3987_s10  ;;  %v641_v31 = vadd.f32 %v4853_v48, %v3390_v23  ;;  %v635_v38 = vpop.f32.mrb[13].mxu1 }
 0x289   : > { %2077 = vrot.lane.b32.xlu0 %v2000_v56, %s3991_s21  ;;  %v636_v41 = vadd.f32 %v4853_v48, %v635_v38 }
 0x28a   : > { %v2060_v35 = vpop.permute.xlu1 %2059  ;;  %v3393_v45 = vpop.f32.mrb[14].mxu1 }
 0x28b   : > { %v1869_v34 = vpop.permute.xlu0 %1868  ;;  %2152 = vst.msk [vmem:[#allocation3 + $0x20] sm:$0xff] %vm2147_vm9, %v2060_v35  ;;  %v2698_v35 = vld [vmem:[#allocation10 + $0x68] sm:$0xff]  ;;  %v682_v40 = vmax.f32 %v636_v41, 0.0 }
 0x28c   : > { %1960 = vst.msk [vmem:[#allocation3 + $0x28] sm:$0xff] %vm1954_vm8, %v1869_v34  ;;  %2270 = vrot.lane.b32.xlu1 %v2193_v37, %s3988_s14  ;;  %v2697_v34 = vld [vmem:[#allocation10 + $0x60] sm:$0xff] }
 0x28d   : > { %2153 = vst.msk [vmem:[#allocation3 + $0x28] sm:$0xff] %vm2147_vm9, %v2062_v8  ;;  %926 = vrot.lane.b32.xlu0 %v2000_v56, %s3986_s9  ;;  %v2694_v8 = vld [vmem:[#allocation10 + $0x48] sm:$0xff]  ;;  %v3642_v36 = vpack.c.bf16 %v2698_v35, %v2697_v34  ;;  %v2005_v34 = vld [vmem:[#allocation2 + $0x109] sm:$0xff] }
 0x28e   : > { %2346 = vst.msk [vmem:[#allocation3 + $0x28] sm:$0xff] %vm2340_vm10, %v2255_v15  ;;  %v1484_v46 = vpop.permute.xlu1 %1483  ;;  %v3634_v10 = vpack.c.bf16 %v2694_v8, %v2693_v5  ;;  %v2695_v15 = vld [vmem:[#allocation10 + $0x50] sm:$0xff]  ;;  %v4882_v56 = vld [vmem:[#allocation2 + $0x158] sm:$0xff] }
 0x28f   : > { %v1293_v39 = vpop.permute.xlu0 %1292  ;;  %1574 = vst.msk [vmem:[#allocation3 + $0x30] sm:$0xff] %vm1567_vm6, %v1484_v46  ;;  %v3638_v18 = vpack.c.bf16 %v2696_v16, %v2695_v15  ;;  %v645_v46 = vpop.f32.mrb[15].mxu1 }
 0x290   : > { %1382 = vst.msk [vmem:[#allocation3 + $0x38] sm:$0xff] %vm1374_vm5, %v1293_v39  ;;  %1882 = vrot.lane.b32.xlu1 %v4647_v12, %s3992_s16  ;;  %3635 = vmatprep.subr.bf16.mxu0 %v3634_v10  ;;  %v651_v39 = vadd.f32 %v4853_v48, %v3393_v45  ;;  %v646_v52 = vadd.f32 %v4853_v48, %v645_v46  ;;  %v2004_v48 = vld [vmem:[#allocation2 + $0xf9] sm:$0xff] }
 0x291   : > { %1575 = vst.msk [vmem:[#allocation3 + $0x38] sm:$0xff] %vm1567_vm6, %v1486_v9  ;;  %1694 = vrot.lane.b32.xlu0 %v2193_v37, %s3989_s12  ;;  %v1999_v9 = vld [vmem:[#allocation2 + $0xc1] sm:$0xff]  ;;  %3637 = vmatpush3.bf16.msra.mxu0 %v3634_v10  ;;  %v2199_v46 = vld [vmem:[#allocation2 + $0x112] sm:$0xff] }
 0x292   : > { %1768 = vst.msk [vmem:[#allocation3 + $0x38] sm:$0xff] %vm1760_vm7, %v1679_v17  ;;  %v2253_v0 = vpop.permute.xlu1 %2252  ;;  %v4880_v17 = vld [vmem:[#allocation2 + $0x150] sm:$0xff]  ;;  %3639 = vmatprep.subr.bf16.mxu0 %v3638_v18  ;;  %v685_v62 = vmax.f32 %v651_v39, 0.0 }
 0x293   : > { %v909_v60 = vpop.permute.xlu0 %908  ;;  %2345 = vst.msk [vmem:[#allocation3 + $0x20] sm:$0xff] %vm2340_vm10, %v2253_v0  ;;  %v684_v0 = vmax.f32 %v646_v52, 0.0 }
 0x294   : > { %997 = vst.msk [vmem:[#allocation3 + $0x40] sm:$0xff] %vm988_vm3, %v909_v60  ;;  %1306 = vrot.lane.b32.xlu1 %v4647_v12, %s3990_s20  ;;  %v3646_v60 = vpack.c.bf16 %v2700_v58, %v2699_v53 }
 0x295   : > { %1119 = vrot.lane.b32.xlu0 %v2193_v37, %s3985_s30  ;;  %v2378_v21 = vld [vmem:[#allocation3 + $0x28] sm:$0xff]  ;;  %824 = vst.msk [vmem:[#allocation3 + $0xe0] sm:$0xff] %vm686_vm0, %v4880_v17  ;;  %825 = vst.msk [vmem:[#allocation3 + $0xe8] sm:$0xff] %vm686_vm0, %v4882_v56  ;;  %3641 = vmatpush3.bf16.msra.mxu0 %v3638_v18  ;;  %v683_v37 = vmax.f32 %v641_v31, 0.0 }
 0x296   : > { %v1102_v42 = vpop.permute.xlu1 %1101  ;;  %3643 = vmatprep.subr.bf16.mxu0 %v3642_v36  ;;  %760 = vst.msk [vmem:[#allocation2 + $0x169] sm:$0xff] %vm686_vm0, %v682_v40  ;;  %763 = vst.msk [vmem:[#allocation2 + $0x189] sm:$0xff] %vm686_vm0, %v685_v62 }
 0x297   : > { %v1677_v59 = vpop.permute.xlu0 %1676  ;;  %1190 = vst.msk [vmem:[#allocation3 + $0x40] sm:$0xff] %vm1181_vm4, %v1102_v42  ;;  %v848_v42 = vld [vmem:[#allocation2 + $0xf1] sm:$0xff] }
 0x298   : > { %1767 = vst.msk [vmem:[#allocation3 + $0x30] sm:$0xff] %vm1760_vm7, %v1677_v59  ;;  %2075 = vrot.lane.b32.xlu1 %v1999_v9, %s3991_s21 }
 0x299   : > { %1884 = vrot.lane.b32.xlu0 %v4649_v13, %s3992_s16  ;;  %761 = vst.msk [vmem:[#allocation2 + $0x171] sm:$0xff] %vm686_vm0, %v683_v37  ;;  %3645 = vmatpush3.bf16.msra.mxu0 %v3642_v36  ;;  %762 = vst.msk [vmem:[#allocation2 + $0x181] sm:$0xff] %vm686_vm0, %v684_v0  ;;  %v2006_v36 = vld [vmem:[#allocation2 + $0x111] sm:$0xff] }
 0x29a   : > { %v4878_v55 = vpop.permute.xlu1 %1489  ;;  %v2377_v11 = vld [vmem:[#allocation3 + $0x20] sm:$0xff]  ;;  %3647 = vmatprep.subr.bf16.mxu0 %v3646_v60 }
 0x29b   : > { %v4876_v12 = vpop.permute.xlu0 %2065  ;;  %3432 = vmatprep.mubr.f32.mxu1 %v2377_v11  ;;  %v2198_v37 = vld [vmem:[#allocation2 + $0x10a] sm:$0xff] }
 0x29c   : > { %1499 = vrot.lane.b32.xlu1 %v1999_v9, %s3987_s10  ;;  %3433 = vmatmul.mubr.f32.gmra.mrb[20].mxu1 %v2378_v21 }
 0x29d   : > { %1308 = vrot.lane.b32.xlu0 %v4649_v13, %s3990_s20  ;;  %v2192_v13 = vld [vmem:[#allocation2 + $0xc2] sm:$0xff]  ;;  %3649 = vmatpush3.bf16.msra.mxu0 %v3646_v60 }
 0x29e   : > { %v2259_v49 = vpop.permute.xlu1 %2258 }
 0x29f   : > { %v915_v27 = vpop.permute.xlu0 %914 }
 0x2a0   : > { %1000 = vst.msk [vmem:[#allocation3 + $0x58] sm:$0xff] %vm988_vm3, %v915_v27  ;;  %2268 = vrot.lane.b32.xlu1 %v2192_v13, %s3988_s14  ;;  %v4934_v16 = vld [vmem:[#allocation2 + $0x170] sm:$0xff] }
 0x2a1   : > { %924 = vrot.lane.b32.xlu0 %v1999_v9, %s3986_s9  ;;  %v2197_v9 = vld [vmem:[#allocation2 + $0xfa] sm:$0xff]  ;;  %827 = vst.msk [vmem:[#allocation3 + $0xf8] sm:$0xff] %vm686_vm0, %v4934_v16 }
 0x2a2   : > { %v1871_v51 = vpop.permute.xlu1 %1870 }
 0x2a3   : > { %v1683_v50 = vpop.permute.xlu0 %1682  ;;  %1961 = vst.msk [vmem:[#allocation3 + $0x30] sm:$0xff] %vm1954_vm8, %v1871_v51 }
 0x2a4   : > { %1117 = vrot.lane.b32.xlu1 %v2192_v13, %s3985_s30 }
 0x2a5   : > { %1692 = vrot.lane.b32.xlu0 %v2192_v13, %s3989_s12 }
 0x2a6   : > { %v1295_v2 = vpop.permute.xlu1 %1294 }
 0x2a7   : > { %v1108_v1 = vpop.permute.xlu0 %1107  ;;  %1383 = vst.msk [vmem:[#allocation3 + $0x40] sm:$0xff] %vm1374_vm5, %v1295_v2  ;;  %v2007_v2 = vld [vmem:[#allocation2 + $0x121] sm:$0xff] }
 0x2a8   : > { %1193 = vst.msk [vmem:[#allocation3 + $0x58] sm:$0xff] %vm1181_vm4, %v1108_v1  ;;  %2276 = vrot.lane.b32.xlu1 %v2196_v3, %s3988_s14 }
 0x2a9   : > { %2085 = vrot.lane.b32.xlu0 %v2004_v48, %s3991_s21 }
 0x2aa   : > { %v2064_v59 = vpop.permute.xlu1 %2063 }
 0x2ab   : > { %v1873_v61 = vpop.permute.xlu0 %1872  ;;  %2154 = vst.msk [vmem:[#allocation3 + $0x30] sm:$0xff] %vm2147_vm9, %v2064_v59  ;;  %v2008_v59 = vld [vmem:[#allocation2 + $0x129] sm:$0xff] }
 0x2ac   : > { %1962 = vst.msk [vmem:[#allocation3 + $0x38] sm:$0xff] %vm1954_vm8, %v1873_v61  ;;  %1509 = vrot.lane.b32.xlu1 %v2004_v48, %s3987_s10 }
 0x2ad   : > { %2155 = vst.msk [vmem:[#allocation3 + $0x38] sm:$0xff] %vm2147_vm9, %v4876_v12  ;;  %932 = vrot.lane.b32.xlu0 %v848_v42, %s3986_s9  ;;  %v2200_v42 = vld [vmem:[#allocation2 + $0x122] sm:$0xff] }
 0x2ae   : > { %2348 = vst.msk [vmem:[#allocation3 + $0x38] sm:$0xff] %vm2340_vm10, %v2259_v49  ;;  %v1488_v8 = vpop.permute.xlu1 %1487 }
 0x2af   : > { %v1297_v5 = vpop.permute.xlu0 %1296  ;;  %1576 = vst.msk [vmem:[#allocation3 + $0x40] sm:$0xff] %vm1567_vm6, %v1488_v8 }
 0x2b0   : > { %1384 = vst.msk [vmem:[#allocation3 + $0x48] sm:$0xff] %vm1374_vm5, %v1297_v5  ;;  %2278 = vrot.lane.b32.xlu1 %v2197_v9, %s3988_s14 }
 0x2b1   : > { %1577 = vst.msk [vmem:[#allocation3 + $0x48] sm:$0xff] %vm1567_vm6, %v4878_v55  ;;  %1700 = vrot.lane.b32.xlu0 %v2196_v3, %s3989_s12  ;;  %v4932_v55 = vld [vmem:[#allocation2 + $0x168] sm:$0xff] }
 0x2b2   : > { %1770 = vst.msk [vmem:[#allocation3 + $0x48] sm:$0xff] %vm1760_vm7, %v1683_v50  ;;  %v2257_v12 = vpop.permute.xlu1 %2256 }
 0x2b3   : > { %v913_v10 = vpop.permute.xlu0 %912  ;;  %2347 = vst.msk [vmem:[#allocation3 + $0x30] sm:$0xff] %vm2340_vm10, %v2257_v12 }
 0x2b4   : > { %999 = vst.msk [vmem:[#allocation3 + $0x50] sm:$0xff] %vm988_vm3, %v913_v10  ;;  %1125 = vrot.lane.b32.xlu1 %v2196_v3, %s3985_s30  ;;  %v2201_v10 = vld [vmem:[#allocation2 + $0x12a] sm:$0xff] }
 0x2b5   : > { %934 = vrot.lane.b32.xlu0 %v2004_v48, %s3986_s9  ;;  %826 = vst.msk [vmem:[#allocation3 + $0xf0] sm:$0xff] %vm686_vm0, %v4932_v55  ;;  %v2380_v27 = vld [vmem:[#allocation3 + $0x38] sm:$0xff] }
 0x2b6   : > { %v1106_v15 = vpop.permute.xlu1 %1105 }
 0x2b7   : > { %v1681_v11 = vpop.permute.xlu0 %1680  ;;  %1192 = vst.msk [vmem:[#allocation3 + $0x50] sm:$0xff] %vm1181_vm4, %v1106_v15 }
 0x2b8   : > { %1769 = vst.msk [vmem:[#allocation3 + $0x40] sm:$0xff] %vm1760_vm7, %v1681_v11  ;;  %1894 = vrot.lane.b32.xlu1 %v4721_v54, %s3992_s16 }
 0x2b9   : > { %1702 = vrot.lane.b32.xlu0 %v2197_v9, %s3989_s12 }
 0x2ba   : > { %v1494_v21 = vpop.permute.xlu1 %1493  ;;  %v2379_v23 = vld [vmem:[#allocation3 + $0x30] sm:$0xff] }
 0x2bb   : > { %v2070_v18 = vpop.permute.xlu0 %2069  ;;  %3435 = vmatprep.mubr.f32.mxu1 %v2379_v23 }
 0x2bc   : > { %1318 = vrot.lane.b32.xlu1 %v4721_v54, %s3990_s20  ;;  %3436 = vmatmul.mubr.f32.gmra.mrb[22].mxu1 %v2380_v27 }
 0x2bd   : > { %1127 = vrot.lane.b32.xlu0 %v2197_v9, %s3985_s30 }
 0x2be   : > { %v2263_v31 = vpop.permute.xlu1 %2262 }
 0x2bf   : > { %v919_v49 = vpop.permute.xlu0 %918 }
 0x2c0   : > { %1002 = vst.msk [vmem:[#allocation3 + $0x68] sm:$0xff] %vm988_vm3, %v919_v49  ;;  %2087 = vrot.lane.b32.xlu1 %v2005_v34, %s3991_s21 }
 0x2c1   : > { %1896 = vrot.lane.b32.xlu0 %v4723_v57, %s3992_s16 }
 0x2c2   : > { %v1875_v13 = vpop.permute.xlu1 %1874 }
 0x2c3   : > { %v1687_v35 = vpop.permute.xlu0 %1686  ;;  %1963 = vst.msk [vmem:[#allocation3 + $0x40] sm:$0xff] %vm1954_vm8, %v1875_v13 }
 0x2c4   : > { %1511 = vrot.lane.b32.xlu1 %v2005_v34, %s3987_s10 }
 0x2c5   : > { %1320 = vrot.lane.b32.xlu0 %v4723_v57, %s3990_s20 }
 0x2c6   : > { %v1299_v38 = vpop.permute.xlu1 %1298 }
 0x2c7   : > { %v1112_v54 = vpop.permute.xlu0 %1111  ;;  %1385 = vst.msk [vmem:[#allocation3 + $0x50] sm:$0xff] %vm1374_vm5, %v1299_v38 }
 0x2c8   : > { %1195 = vst.msk [vmem:[#allocation3 + $0x68] sm:$0xff] %vm1181_vm4, %v1112_v54  ;;  %2280 = vrot.lane.b32.xlu1 %v2198_v37, %s3988_s14 }
 0x2c9   : > { %2089 = vrot.lane.b32.xlu0 %v2006_v36, %s3991_s21 }
 0x2ca   : > { %v2068_v45 = vpop.permute.xlu1 %2067 }
 0x2cb   : > { %v1877_v41 = vpop.permute.xlu0 %1876  ;;  %2156 = vst.msk [vmem:[#allocation3 + $0x40] sm:$0xff] %vm2147_vm9, %v2068_v45 }
 0x2cc   : > { %1964 = vst.msk [vmem:[#allocation3 + $0x48] sm:$0xff] %vm1954_vm8, %v1877_v41  ;;  %1513 = vrot.lane.b32.xlu1 %v2006_v36, %s3987_s10 }
 0x2cd   : > { %2157 = vst.msk [vmem:[#allocation3 + $0x48] sm:$0xff] %vm2147_vm9, %v2070_v18  ;;  %936 = vrot.lane.b32.xlu0 %v2005_v34, %s3986_s9 }
 0x2ce   : > { %2350 = vst.msk [vmem:[#allocation3 + $0x48] sm:$0xff] %vm2340_vm10, %v2263_v31  ;;  %v1492_v39 = vpop.permute.xlu1 %1491 }
 0x2cf   : > { %v1301_v57 = vpop.permute.xlu0 %1300  ;;  %1578 = vst.msk [vmem:[#allocation3 + $0x50] sm:$0xff] %vm1567_vm6, %v1492_v39 }
 0x2d0   : > { %1386 = vst.msk [vmem:[#allocation3 + $0x58] sm:$0xff] %vm1374_vm5, %v1301_v57  ;;  %2282 = vrot.lane.b32.xlu1 %v2199_v46, %s3988_s14 }
 0x2d1   : > { %1579 = vst.msk [vmem:[#allocation3 + $0x58] sm:$0xff] %vm1567_vm6, %v1494_v21  ;;  %1704 = vrot.lane.b32.xlu0 %v2198_v37, %s3989_s12 }
 0x2d2   : > { %1772 = vst.msk [vmem:[#allocation3 + $0x58] sm:$0xff] %vm1760_vm7, %v1687_v35  ;;  %v2261_v51 = vpop.permute.xlu1 %2260  ;;  %v2009_v35 = vld [vmem:[#allocation2 + $0x139] sm:$0xff] }
 0x2d3   : > { %v917_v50 = vpop.permute.xlu0 %916  ;;  %2349 = vst.msk [vmem:[#allocation3 + $0x40] sm:$0xff] %vm2340_vm10, %v2261_v51 }
 0x2d4   : > { %1001 = vst.msk [vmem:[#allocation3 + $0x60] sm:$0xff] %vm988_vm3, %v917_v50  ;;  %1129 = vrot.lane.b32.xlu1 %v2198_v37, %s3985_s30  ;;  %v2202_v37 = vld [vmem:[#allocation2 + $0x13a] sm:$0xff] }
 0x2d5   : > { %938 = vrot.lane.b32.xlu0 %v2006_v36, %s3986_s9  ;;  %v2382_v60 = vld [vmem:[#allocation3 + $0x48] sm:$0xff]  ;;  %v2010_v36 = vld [vmem:[#allocation2 + $0x141] sm:$0xff] }
 0x2d6   : > { %v1110_v52 = vpop.permute.xlu1 %1109 }
 0x2d7   : > { %v1685_v40 = vpop.permute.xlu0 %1684  ;;  %1194 = vst.msk [vmem:[#allocation3 + $0x60] sm:$0xff] %vm1181_vm4, %v1110_v52 }
 0x2d8   : > { %1771 = vst.msk [vmem:[#allocation3 + $0x50] sm:$0xff] %vm1760_vm7, %v1685_v40  ;;  %1898 = vrot.lane.b32.xlu1 %v4775_v32, %s3992_s16 }
 0x2d9   : > { %1706 = vrot.lane.b32.xlu0 %v2199_v46, %s3989_s12 }
 0x2da   : > { %v1498_v58 = vpop.permute.xlu1 %1497  ;;  %v2381_v62 = vld [vmem:[#allocation3 + $0x40] sm:$0xff] }
 0x2db   : > { %v2074_v53 = vpop.permute.xlu0 %2073  ;;  %3438 = vmatprep.mubr.f32.mxu1 %v2381_v62 }
 0x2dc   : > { %1322 = vrot.lane.b32.xlu1 %v4775_v32, %s3990_s20  ;;  %3439 = vmatmul.mubr.f32.gmra.mrb[24].mxu1 %v2382_v60 }
 0x2dd   : > { %1131 = vrot.lane.b32.xlu0 %v2199_v46, %s3985_s30 }
 0x2de   : > { %v2267_v1 = vpop.permute.xlu1 %2266 }
 0x2df   : > { %v923_v0 = vpop.permute.xlu0 %922 }
 0x2e0   : > { %1004 = vst.msk [vmem:[#allocation3 + $0x78] sm:$0xff] %vm988_vm3, %v923_v0  ;;  %2091 = vrot.lane.b32.xlu1 %v2007_v2, %s3991_s21  ;;  %v2012_v0 = vld [vmem:[#allocation2 + $0x159] sm:$0xff] }
 0x2e1   : > { %1900 = vrot.lane.b32.xlu0 %v4777_v33, %s3992_s16 }
 0x2e2   : > { %v1879_v3 = vpop.permute.xlu1 %1878 }
 0x2e3   : > { %v1691_v48 = vpop.permute.xlu0 %1690  ;;  %1965 = vst.msk [vmem:[#allocation3 + $0x50] sm:$0xff] %vm1954_vm8, %v1879_v3 }
 0x2e4   : > { %1515 = vrot.lane.b32.xlu1 %v2007_v2, %s3987_s10 }
 0x2e5   : > { %1324 = vrot.lane.b32.xlu0 %v4777_v33, %s3990_s20 }
 0x2e6   : > { %v1303_v61 = vpop.permute.xlu1 %1302 }
 0x2e7   : > { %v1116_v32 = vpop.permute.xlu0 %1115  ;;  %1387 = vst.msk [vmem:[#allocation3 + $0x60] sm:$0xff] %vm1374_vm5, %v1303_v61  ;;  %v2205_v61 = vld [vmem:[#allocation2 + $0x15a] sm:$0xff] }
 0x2e8   : > { %1197 = vst.msk [vmem:[#allocation3 + $0x78] sm:$0xff] %vm1181_vm4, %v1116_v32  ;;  %2284 = vrot.lane.b32.xlu1 %v2200_v42, %s3988_s14 }
 0x2e9   : > { %2093 = vrot.lane.b32.xlu0 %v2008_v59, %s3991_s21 }
 0x2ea   : > { %v2072_v8 = vpop.permute.xlu1 %2071 }
 0x2eb   : > { %v1881_v5 = vpop.permute.xlu0 %1880  ;;  %2158 = vst.msk [vmem:[#allocation3 + $0x50] sm:$0xff] %vm2147_vm9, %v2072_v8 }
 0x2ec   : > { %1966 = vst.msk [vmem:[#allocation3 + $0x58] sm:$0xff] %vm1954_vm8, %v1881_v5  ;;  %1517 = vrot.lane.b32.xlu1 %v2008_v59, %s3987_s10 }
 0x2ed   : > { %2159 = vst.msk [vmem:[#allocation3 + $0x58] sm:$0xff] %vm2147_vm9, %v2074_v53  ;;  %940 = vrot.lane.b32.xlu0 %v2007_v2, %s3986_s9 }
 0x2ee   : > { %2352 = vst.msk [vmem:[#allocation3 + $0x58] sm:$0xff] %vm2340_vm10, %v2267_v1  ;;  %v1496_v9 = vpop.permute.xlu1 %1495  ;;  %v2204_v1 = vld [vmem:[#allocation2 + $0x152] sm:$0xff] }
 0x2ef   : > { %v1305_v33 = vpop.permute.xlu0 %1304  ;;  %1580 = vst.msk [vmem:[#allocation3 + $0x60] sm:$0xff] %vm1567_vm6, %v1496_v9 }
 0x2f0   : > { %1388 = vst.msk [vmem:[#allocation3 + $0x68] sm:$0xff] %vm1374_vm5, %v1305_v33  ;;  %2286 = vrot.lane.b32.xlu1 %v2201_v10, %s3988_s14 }
 0x2f1   : > { %1581 = vst.msk [vmem:[#allocation3 + $0x68] sm:$0xff] %vm1567_vm6, %v1498_v58  ;;  %1708 = vrot.lane.b32.xlu0 %v2200_v42, %s3989_s12 }
 0x2f2   : > { %1774 = vst.msk [vmem:[#allocation3 + $0x68] sm:$0xff] %vm1760_vm7, %v1691_v48  ;;  %v2265_v11 = vpop.permute.xlu1 %2264 }
 0x2f3   : > { %v921_v12 = vpop.permute.xlu0 %920  ;;  %2351 = vst.msk [vmem:[#allocation3 + $0x50] sm:$0xff] %vm2340_vm10, %v2265_v11  ;;  %v2013_v11 = vld [vmem:[#allocation2 + $0x169] sm:$0xff] }
 0x2f4   : > { %1003 = vst.msk [vmem:[#allocation3 + $0x70] sm:$0xff] %vm988_vm3, %v921_v12  ;;  %1133 = vrot.lane.b32.xlu1 %v2200_v42, %s3985_s30 }
 0x2f5   : > { %942 = vrot.lane.b32.xlu0 %v2008_v59, %s3986_s9  ;;  %v2384_v49 = vld [vmem:[#allocation3 + $0x58] sm:$0xff] }
 0x2f6   : > { %v1114_v18 = vpop.permute.xlu1 %1113 }
 0x2f7   : > { %v1689_v15 = vpop.permute.xlu0 %1688  ;;  %1196 = vst.msk [vmem:[#allocation3 + $0x70] sm:$0xff] %vm1181_vm4, %v1114_v18 }
 0x2f8   : > { %1773 = vst.msk [vmem:[#allocation3 + $0x60] sm:$0xff] %vm1760_vm7, %v1689_v15  ;;  %1902 = vrot.lane.b32.xlu1 %v4823_v6, %s3992_s16 }
 0x2f9   : > { %1710 = vrot.lane.b32.xlu0 %v2201_v10, %s3989_s12 }
 0x2fa   : > { %v1502_v23 = vpop.permute.xlu1 %1501  ;;  %v2383_v27 = vld [vmem:[#allocation3 + $0x50] sm:$0xff] }
 0x2fb   : > { %v2078_v21 = vpop.permute.xlu0 %2077  ;;  %3441 = vmatprep.mubr.f32.mxu1 %v2383_v27  ;;  %v2014_v27 = vld [vmem:[#allocation2 + $0x171] sm:$0xff] }
 0x2fc   : > { %1326 = vrot.lane.b32.xlu1 %v4823_v6, %s3990_s20  ;;  %3442 = vmatmul.mubr.f32.gmra.mrb[26].mxu1 %v2384_v49  ;;  %v2206_v49 = vld [vmem:[#allocation2 + $0x16a] sm:$0xff] }
 0x2fd   : > { %1135 = vrot.lane.b32.xlu0 %v2201_v10, %s3985_s30 }
 0x2fe   : > { %v2271_v34 = vpop.permute.xlu1 %2270 }
 0x2ff   : > { %v927_v31 = vpop.permute.xlu0 %926 }
 0x300   : > { %1006 = vst.msk [vmem:[#allocation3 + $0x88] sm:$0xff] %vm988_vm3, %v927_v31  ;;  %2095 = vrot.lane.b32.xlu1 %v2009_v35, %s3991_s21 }
 0x301   : > { %1904 = vrot.lane.b32.xlu0 %v4825_v7, %s3992_s16 }
 0x302   : > { %v1883_v54 = vpop.permute.xlu1 %1882 }
 0x303   : > { %v1695_v13 = vpop.permute.xlu0 %1694  ;;  %1967 = vst.msk [vmem:[#allocation3 + $0x60] sm:$0xff] %vm1954_vm8, %v1883_v54  ;;  %v2207_v54 = vld [vmem:[#allocation2 + $0x172] sm:$0xff] }
 0x304   : > { %1519 = vrot.lane.b32.xlu1 %v2009_v35, %s3987_s10 }
 0x305   : > { %1328 = vrot.lane.b32.xlu0 %v4825_v7, %s3990_s20 }
 0x306   : > { %v1307_v38 = vpop.permute.xlu1 %1306 }
 0x307   : > { %v1120_v6 = vpop.permute.xlu0 %1119  ;;  %1389 = vst.msk [vmem:[#allocation3 + $0x70] sm:$0xff] %vm1374_vm5, %v1307_v38 }
 0x308   : > { %1199 = vst.msk [vmem:[#allocation3 + $0x88] sm:$0xff] %vm1181_vm4, %v1120_v6  ;;  %2288 = vrot.lane.b32.xlu1 %v2202_v37, %s3988_s14 }
 0x309   : > { %1392 = vst.msk [vmem:[#allocation3 + $0x88] sm:$0xff] %vm1374_vm5, %v4695_v30  ;;  %2097 = vrot.lane.b32.xlu0 %v2010_v36, %s3991_s21 }
 0x30a   : > { %1585 = vst.msk [vmem:[#allocation3 + $0x88] sm:$0xff] %vm1567_vm6, %v4624_v63  ;;  %v2076_v41 = vpop.permute.xlu1 %2075 }
 0x30b   : > { %1778 = vst.msk [vmem:[#allocation3 + $0x88] sm:$0xff] %vm1760_vm7, %v4664_v19  ;;  %v1885_v7 = vpop.permute.xlu0 %1884  ;;  %v2203_v19 = vld [vmem:[#allocation2 + $0x142] sm:$0xff] }
 0x30c   : > { %1972 = vst.msk [vmem:[#allocation3 + $0x88] sm:$0xff] %vm1954_vm8, %v4762_v24  ;;  %1968 = vst.msk [vmem:[#allocation3 + $0x68] sm:$0xff] %vm1954_vm8, %v1885_v7  ;;  %1521 = vrot.lane.b32.xlu1 %v2010_v36, %s3987_s10 }
 0x30d   : > { %2160 = vst.msk [vmem:[#allocation3 + $0x60] sm:$0xff] %vm2147_vm9, %v2076_v41  ;;  %2161 = vst.msk [vmem:[#allocation3 + $0x68] sm:$0xff] %vm2147_vm9, %v2078_v21  ;;  %944 = vrot.lane.b32.xlu0 %v2009_v35, %s3986_s9 }
 0x30e   : > { %2354 = vst.msk [vmem:[#allocation3 + $0x68] sm:$0xff] %vm2340_vm10, %v2271_v34  ;;  %v1500_v30 = vpop.permute.xlu1 %1499 }
 0x30f   : > { %v1309_v63 = vpop.permute.xlu0 %1308  ;;  %1582 = vst.msk [vmem:[#allocation3 + $0x70] sm:$0xff] %vm1567_vm6, %v1500_v30 }
 0x310   : > { %1390 = vst.msk [vmem:[#allocation3 + $0x78] sm:$0xff] %vm1374_vm5, %v1309_v63  ;;  %2290 = vrot.lane.b32.xlu1 %v2203_v19, %s3988_s14 }
 0x311   : > { %1583 = vst.msk [vmem:[#allocation3 + $0x78] sm:$0xff] %vm1567_vm6, %v1502_v23  ;;  %1712 = vrot.lane.b32.xlu0 %v2202_v37, %s3989_s12 }
 0x312   : > { %1776 = vst.msk [vmem:[#allocation3 + $0x78] sm:$0xff] %vm1760_vm7, %v1695_v13  ;;  %v2269_v45 = vpop.permute.xlu1 %2268 }
 0x313   : > { %1970 = vst.msk [vmem:[#allocation3 + $0x78] sm:$0xff] %vm1954_vm8, %v4689_v28  ;;  %v925_v24 = vpop.permute.xlu0 %924  ;;  %v5086_v28 = vld [vmem:[%s5441_s4] ss:$0 sm:$0xff] }
 0x314   : > { %2163 = vst.msk [vmem:[#allocation3 + $0x78] sm:$0xff] %vm2147_vm9, %v4651_v14  ;;  %1137 = vrot.lane.b32.xlu1 %v2202_v37, %s3985_s30 }
 0x315   : > { %1005 = vst.msk [vmem:[#allocation3 + $0x80] sm:$0xff] %vm988_vm3, %v925_v24  ;;  %946 = vrot.lane.b32.xlu0 %v2010_v36, %s3986_s9 }
 0x316   : > { %2353 = vst.msk [vmem:[#allocation3 + $0x60] sm:$0xff] %vm2340_vm10, %v2269_v45  ;;  %2356 = vst.msk [vmem:[#allocation3 + $0x78] sm:$0xff] %vm2340_vm10, %v4631_v4  ;;  %v1118_v39 = vpop.permute.xlu1 %1117 }
 0x317   : > { %v1693_v57 = vpop.permute.xlu0 %1692  ;;  %1198 = vst.msk [vmem:[#allocation3 + $0x80] sm:$0xff] %vm1181_vm4, %v1118_v39 }
 0x318   : > { %1775 = vst.msk [vmem:[#allocation3 + $0x70] sm:$0xff] %vm1760_vm7, %v1693_v57  ;;  %1906 = vrot.lane.b32.xlu1 %v4880_v17, %s3992_s16 }
 0x319   : > { %1969 = vst.msk [vmem:[#allocation3 + $0x70] sm:$0xff] %vm1954_vm8, %v4666_v20  ;;  %1714 = vrot.lane.b32.xlu0 %v2203_v19, %s3989_s12 }
 0x31a   : > { %1391 = vst.msk [vmem:[#allocation3 + $0x80] sm:$0xff] %vm1374_vm5, %v4671_v22  ;;  %v2277_v14 = vpop.permute.xlu1 %2276  ;;  %v2386_v22 = vld [vmem:[#allocation3 + $0x68] sm:$0xff] }
 0x31b   : > { %2162 = vst.msk [vmem:[#allocation3 + $0x70] sm:$0xff] %vm2147_vm9, %v4677_v25  ;;  %v2086_v4 = vpop.permute.xlu0 %2085 }
 0x31c   : > { %1584 = vst.msk [vmem:[#allocation3 + $0x80] sm:$0xff] %vm1567_vm6, %v4683_v26  ;;  %1330 = vrot.lane.b32.xlu1 %v4880_v17, %s3990_s20 }
 0x31d   : > { %2355 = vst.msk [vmem:[#allocation3 + $0x70] sm:$0xff] %vm2340_vm10, %v4691_v29  ;;  %v2385_v20 = vld [vmem:[#allocation3 + $0x60] sm:$0xff]  ;;  %1139 = vrot.lane.b32.xlu0 %v2203_v19, %s3985_s30  ;;  %v2388_v40 = vld [vmem:[#allocation3 + $0x78] sm:$0xff]  ;;  %v1822_v19 = vld [vmem:[#allocation2 + $0x180] sm:$0xff] }
 0x31e   : > { %1777 = vst.msk [vmem:[#allocation3 + $0x80] sm:$0xff] %vm1760_vm7, %v4704_v44  ;;  %3444 = vmatprep.mubr.f32.mxu1 %v2385_v20  ;;  %v1510_v26 = vpop.permute.xlu1 %1509  ;;  %v2011_v29 = vld [vmem:[#allocation2 + $0x151] sm:$0xff]  ;;  %v1823_v20 = vld [vmem:[#allocation2 + $0x188] sm:$0xff] }
 0x31f   : > { %1971 = vst.msk [vmem:[#allocation3 + $0x80] sm:$0xff] %vm1954_vm8, %v4748_v43  ;;  %3445 = vmatmul.mubr.f32.gmra.mrb[28].mxu1 %v2386_v22  ;;  %v933_v25 = vpop.permute.xlu0 %932  ;;  %v2015_v22 = vld [vmem:[#allocation2 + $0x181] sm:$0xff] }
 0x320   : > { %2165 = vst.msk [vmem:[#allocation3 + $0x88] sm:$0xff] %vm2147_vm9, %v2086_v4  ;;  %2164 = vst.msk [vmem:[#allocation3 + $0x80] sm:$0xff] %vm2147_vm9, %v4764_v47  ;;  %2099 = vrot.lane.b32.xlu1 %v2011_v29, %s3991_s21 }
 0x321   : > { %2357 = vst.msk [vmem:[#allocation3 + $0x80] sm:$0xff] %vm2340_vm10, %v2277_v14  ;;  %1908 = vrot.lane.b32.xlu0 %v4882_v56, %s3992_s16  ;;  %v3428_v44 = vpop.f32.mrb[16].mxu1 }
 0x322   : > { %1009 = vst.msk [vmem:[#allocation3 + $0xa0] sm:$0xff] %vm988_vm3, %v933_v25  ;;  %v2500_v43 = vadd.f32 %v3428_v44, %v5086_v28  ;;  %v2494_v47 = vpop.f32.mrb[17].mxu1  ;;  %v2279_v51 = vpop.permute.xlu1 %2278 }
 0x323   : > { %1587 = vst.msk [vmem:[#allocation3 + $0x98] sm:$0xff] %vm1567_vm6, %v1510_v26  ;;  %v2495_v46 = vadd.f32 %v5086_v28, %v2494_v47  ;;  %v1701_v50 = vpop.permute.xlu0 %1700  ;;  %v2016_v47 = vld [vmem:[#allocation2 + $0x189] sm:$0xff] }
 0x324   : > { %v2387_v17 = vld [vmem:[#allocation3 + $0x70] sm:$0xff]  ;;  %1779 = vst.msk [vmem:[#allocation3 + $0x90] sm:$0xff] %vm1760_vm7, %v1701_v50  ;;  %1523 = vrot.lane.b32.xlu1 %v2011_v29, %s3987_s10  ;;  %v2654_v58 = vmax.f32 %v2500_v43, 0.0 }
 0x325   : > { %3447 = vmatprep.mubr.f32.mxu1 %v2387_v17  ;;  %2358 = vst.msk [vmem:[#allocation3 + $0x88] sm:$0xff] %vm2340_vm10, %v2279_v51  ;;  %v2653_v52 = vmax.f32 %v2495_v46, 0.0  ;;  %1332 = vrot.lane.b32.xlu0 %v4882_v56, %s3990_s20  ;;  %v2208_v17 = vld [vmem:[#allocation2 + $0x182] sm:$0xff] }
 0x326   : > { %3448 = vmatmul.mubr.f32.gmra.mrb[30].mxu1 %v2388_v40  ;;  %v1126_v60 = vpop.permute.xlu1 %1125 }
 0x327   : > { %v935_v62 = vpop.permute.xlu0 %934  ;;  %3506 = vmatprep.mubr.f32.mxu0 %v2653_v52  ;;  %1202 = vst.msk [vmem:[#allocation3 + $0xa0] sm:$0xff] %vm1181_vm4, %v1126_v60 }
 0x328   : > { %v2389_v53 = vld [vmem:[#allocation3 + $0x80] sm:$0xff]  ;;  %1010 = vst.msk [vmem:[#allocation3 + $0xa8] sm:$0xff] %vm988_vm3, %v935_v62  ;;  %3507 = vmatmul.mubr.f32.vlgmr.msra.gmra.mrb[16].mxu0 %v2654_v58  ;;  %2292 = vrot.lane.b32.xlu1 %v2204_v1, %s3988_s14 }
 0x329   : > { %3450 = vmatprep.mubr.f32.mxu1 %v2389_v53  ;;  %2101 = vrot.lane.b32.xlu0 %v2012_v0, %s3991_s21  ;;  %v2209_v53 = vld [vmem:[#allocation2 + $0x18a] sm:$0xff] }
 0x32a   : > { %v1895_v2 = vpop.permute.xlu1 %1894 }
 0x32b   : > { %v1703_v56 = vpop.permute.xlu0 %1702  ;;  %1973 = vst.msk [vmem:[#allocation3 + $0x90] sm:$0xff] %vm1954_vm8, %v1895_v2 }
 0x32c   : > { %v2390_v48 = vld [vmem:[#allocation3 + $0x88] sm:$0xff]  ;;  %1780 = vst.msk [vmem:[#allocation3 + $0x98] sm:$0xff] %vm1760_vm7, %v1703_v56  ;;  %1525 = vrot.lane.b32.xlu1 %v2012_v0, %s3987_s10 }
 0x32d   : > { %3451 = vmatmul.mubr.f32.gmra.mrb[32].mxu1 %v2390_v48  ;;  %948 = vrot.lane.b32.xlu0 %v2011_v29, %s3986_s9 }
 0x32e   : > { %v1319_v32 = vpop.permute.xlu1 %1318 }
 0x32f   : > { %v1128_v3 = vpop.permute.xlu0 %1127  ;;  %1395 = vst.msk [vmem:[#allocation3 + $0xa0] sm:$0xff] %vm1374_vm5, %v1319_v32 }
 0x330   : > { %1203 = vst.msk [vmem:[#allocation3 + $0xa8] sm:$0xff] %vm1181_vm4, %v1128_v3  ;;  %2294 = vrot.lane.b32.xlu1 %v2205_v61, %s3988_s14 }
 0x331   : > { %1716 = vrot.lane.b32.xlu0 %v2204_v1, %s3989_s12 }
 0x332   : > { %v2088_v42 = vpop.permute.xlu1 %2087 }
 0x333   : > { %v1897_v59 = vpop.permute.xlu0 %1896  ;;  %2166 = vst.msk [vmem:[#allocation3 + $0x90] sm:$0xff] %vm2147_vm9, %v2088_v42 }
 0x334   : > { %1974 = vst.msk [vmem:[#allocation3 + $0x98] sm:$0xff] %vm1954_vm8, %v1897_v59  ;;  %1141 = vrot.lane.b32.xlu1 %v2204_v1, %s3985_s30  ;;  %v1825_v1 = vld [vmem:[#allocation2 + $0x1a0] sm:$0xff] }
 0x335   : > { %950 = vrot.lane.b32.xlu0 %v2012_v0, %s3986_s9  ;;  %v1824_v0 = vld [vmem:[#allocation2 + $0x198] sm:$0xff]  ;;  %v2018_v59 = vld [vmem:[#allocation2 + $0x1a1] sm:$0xff] }
 0x336   : > { %v1512_v8 = vpop.permute.xlu1 %1511 }
 0x337   : > { %v1321_v5 = vpop.permute.xlu0 %1320  ;;  %1588 = vst.msk [vmem:[#allocation3 + $0xa0] sm:$0xff] %vm1567_vm6, %v1512_v8  ;;  %v2210_v8 = vld [vmem:[#allocation2 + $0x19a] sm:$0xff] }
 0x338   : > { %1396 = vst.msk [vmem:[#allocation3 + $0xa8] sm:$0xff] %vm1374_vm5, %v1321_v5  ;;  %1910 = vrot.lane.b32.xlu1 %v4932_v55, %s3992_s16 }
 0x339   : > { %1718 = vrot.lane.b32.xlu0 %v2205_v61, %s3989_s12 }
 0x33a   : > { %v2281_v9 = vpop.permute.xlu1 %2280 }
 0x33b   : > { %v2090_v33 = vpop.permute.xlu0 %2089  ;;  %2359 = vst.msk [vmem:[#allocation3 + $0x90] sm:$0xff] %vm2340_vm10, %v2281_v9 }
 0x33c   : > { %2167 = vst.msk [vmem:[#allocation3 + $0x98] sm:$0xff] %vm2147_vm9, %v2090_v33  ;;  %1334 = vrot.lane.b32.xlu1 %v4932_v55, %s3990_s20  ;;  %v2211_v33 = vld [vmem:[#allocation2 + $0x1a2] sm:$0xff] }
 0x33d   : > { %1143 = vrot.lane.b32.xlu0 %v2205_v61, %s3985_s30  ;;  %v2017_v61 = vld [vmem:[#allocation2 + $0x199] sm:$0xff] }
 0x33e   : > { %v1514_v12 = vpop.permute.xlu1 %1513 }
 0x33f   : > { %v937_v10 = vpop.permute.xlu0 %936  ;;  %1589 = vst.msk [vmem:[#allocation3 + $0xa8] sm:$0xff] %vm1567_vm6, %v1514_v12 }
 0x340   : > { %1011 = vst.msk [vmem:[#allocation3 + $0xb0] sm:$0xff] %vm988_vm3, %v937_v10  ;;  %2103 = vrot.lane.b32.xlu1 %v2013_v11, %s3991_s21 }
 0x341   : > { %1912 = vrot.lane.b32.xlu0 %v4934_v16, %s3992_s16 }
 0x342   : > { %v2283_v18 = vpop.permute.xlu1 %2282  ;;  %v2391_v21 = vld [vmem:[#allocation3 + $0x90] sm:$0xff] }
 0x343   : > { %v1705_v15 = vpop.permute.xlu0 %1704  ;;  %2360 = vst.msk [vmem:[#allocation3 + $0x98] sm:$0xff] %vm2340_vm10, %v2283_v18  ;;  %3453 = vmatprep.mubr.f32.mxu1 %v2391_v21 }
 0x344   : > { %1781 = vst.msk [vmem:[#allocation3 + $0xa0] sm:$0xff] %vm1760_vm7, %v1705_v15  ;;  %1527 = vrot.lane.b32.xlu1 %v2013_v11, %s3987_s10 }
 0x345   : > { %1336 = vrot.lane.b32.xlu0 %v4934_v16, %s3990_s20 }
 0x346   : > { %v1130_v23 = vpop.permute.xlu1 %1129 }
 0x347   : > { %v939_v55 = vpop.permute.xlu0 %938  ;;  %1204 = vst.msk [vmem:[#allocation3 + $0xb0] sm:$0xff] %vm1181_vm4, %v1130_v23 }
 0x348   : > { %1012 = vst.msk [vmem:[#allocation3 + $0xb8] sm:$0xff] %vm988_vm3, %v939_v55  ;;  %2296 = vrot.lane.b32.xlu1 %v2206_v49, %s3988_s14 }
 0x349   : > { %2105 = vrot.lane.b32.xlu0 %v2014_v27, %s3991_s21 }
 0x34a   : > { %v1899_v34 = vpop.permute.xlu1 %1898  ;;  %v2392_v35 = vld [vmem:[#allocation3 + $0x98] sm:$0xff] }
 0x34b   : > { %v1707_v31 = vpop.permute.xlu0 %1706  ;;  %1975 = vst.msk [vmem:[#allocation3 + $0xa0] sm:$0xff] %vm1954_vm8, %v1899_v34  ;;  %3454 = vmatmul.mubr.f32.gmra.mrb[34].mxu1 %v2392_v35 }
 0x34c   : > { %1782 = vst.msk [vmem:[#allocation3 + $0xa8] sm:$0xff] %vm1760_vm7, %v1707_v31  ;;  %1529 = vrot.lane.b32.xlu1 %v2014_v27, %s3987_s10 }
 0x34d   : > { %952 = vrot.lane.b32.xlu0 %v2013_v11, %s3986_s9 }
 0x34e   : > { %v1323_v13 = vpop.permute.xlu1 %1322 }
 0x34f   : > { %v1132_v16 = vpop.permute.xlu0 %1131  ;;  %1397 = vst.msk [vmem:[#allocation3 + $0xb0] sm:$0xff] %vm1374_vm5, %v1323_v13  ;;  %v3431_v6 = vpop.f32.mrb[18].mxu1 }
 0x350   : > { %1205 = vst.msk [vmem:[#allocation3 + $0xb8] sm:$0xff] %vm1181_vm4, %v1132_v16  ;;  %2298 = vrot.lane.b32.xlu1 %v2207_v54, %s3988_s14  ;;  %v2510_v38 = vadd.f32 %v3431_v6, %v5086_v28  ;;  %v2504_v36 = vpop.f32.mrb[19].mxu1 }
 0x351   : > { %1720 = vrot.lane.b32.xlu0 %v2206_v49, %s3989_s12  ;;  %v2505_v37 = vadd.f32 %v5086_v28, %v2504_v36 }
 0x352   : > { %v2092_v41 = vpop.permute.xlu1 %2091  ;;  %v2656_v30 = vmax.f32 %v2510_v38, 0.0 }
 0x353   : > { %v1901_v7 = vpop.permute.xlu0 %1900  ;;  %2168 = vst.msk [vmem:[#allocation3 + $0xa0] sm:$0xff] %vm2147_vm9, %v2092_v41  ;;  %v2655_v63 = vmax.f32 %v2505_v37, 0.0 }
 0x354   : > { %1976 = vst.msk [vmem:[#allocation3 + $0xa8] sm:$0xff] %vm1954_vm8, %v1901_v7  ;;  %1145 = vrot.lane.b32.xlu1 %v2206_v49, %s3985_s30 }
 0x355   : > { %954 = vrot.lane.b32.xlu0 %v2014_v27, %s3986_s9  ;;  %3509 = vmatprep.mubr.f32.mxu0 %v2655_v63 }
 0x356   : > { %v1516_v45 = vpop.permute.xlu1 %1515  ;;  %3510 = vmatmul.mubr.f32.gmra.mrb[18].mxu0 %v2656_v30 }
 0x357   : > { %v1325_v24 = vpop.permute.xlu0 %1324  ;;  %1590 = vst.msk [vmem:[#allocation3 + $0xb0] sm:$0xff] %vm1567_vm6, %v1516_v45 }
 0x358   : > { %1398 = vst.msk [vmem:[#allocation3 + $0xb8] sm:$0xff] %vm1374_vm5, %v1325_v24  ;;  %1914 = vrot.lane.b32.xlu1 %v1822_v19, %s3992_s16 }
 0x359   : > { %1722 = vrot.lane.b32.xlu0 %v2207_v54, %s3989_s12 }
 0x35a   : > { %v2285_v39 = vpop.permute.xlu1 %2284 }
 0x35b   : > { %v2094_v57 = vpop.permute.xlu0 %2093  ;;  %2361 = vst.msk [vmem:[#allocation3 + $0xa0] sm:$0xff] %vm2340_vm10, %v2285_v39 }
 0x35c   : > { %2169 = vst.msk [vmem:[#allocation3 + $0xa8] sm:$0xff] %vm2147_vm9, %v2094_v57  ;;  %1338 = vrot.lane.b32.xlu1 %v1822_v19, %s3990_s20 }
 0x35d   : > { %1147 = vrot.lane.b32.xlu0 %v2207_v54, %s3985_s30 }
 0x35e   : > { %v1518_v14 = vpop.permute.xlu1 %1517 }
 0x35f   : > { %v941_v4 = vpop.permute.xlu0 %940  ;;  %1591 = vst.msk [vmem:[#allocation3 + $0xb8] sm:$0xff] %vm1567_vm6, %v1518_v14 }
 0x360   : > { %1013 = vst.msk [vmem:[#allocation3 + $0xc0] sm:$0xff] %vm988_vm3, %v941_v4  ;;  %2107 = vrot.lane.b32.xlu1 %v2015_v22, %s3991_s21 }
 0x361   : > { %1916 = vrot.lane.b32.xlu0 %v1823_v20, %s3992_s16 }
 0x362   : > { %v2287_v26 = vpop.permute.xlu1 %2286  ;;  %v2393_v29 = vld [vmem:[#allocation3 + $0xa0] sm:$0xff] }
 0x363   : > { %v1709_v25 = vpop.permute.xlu0 %1708  ;;  %2362 = vst.msk [vmem:[#allocation3 + $0xa8] sm:$0xff] %vm2340_vm10, %v2287_v26  ;;  %3456 = vmatprep.mubr.f32.mxu1 %v2393_v29 }
 0x364   : > { %1783 = vst.msk [vmem:[#allocation3 + $0xb0] sm:$0xff] %vm1760_vm7, %v1709_v25  ;;  %1531 = vrot.lane.b32.xlu1 %v2015_v22, %s3987_s10 }
 0x365   : > { %1340 = vrot.lane.b32.xlu0 %v1823_v20, %s3990_s20 }
 0x366   : > { %v1134_v43 = vpop.permute.xlu1 %1133 }
 0x367   : > { %v943_v44 = vpop.permute.xlu0 %942  ;;  %1206 = vst.msk [vmem:[#allocation3 + $0xc0] sm:$0xff] %vm1181_vm4, %v1134_v43 }
 0x368   : > { %1014 = vst.msk [vmem:[#allocation3 + $0xc8] sm:$0xff] %vm988_vm3, %v943_v44  ;;  %2300 = vrot.lane.b32.xlu1 %v2208_v17, %s3988_s14 }
 0x369   : > { %2109 = vrot.lane.b32.xlu0 %v2016_v47, %s3991_s21 }
 0x36a   : > { %v1903_v50 = vpop.permute.xlu1 %1902  ;;  %v2394_v51 = vld [vmem:[#allocation3 + $0xa8] sm:$0xff] }
 0x36b   : > { %v1711_v46 = vpop.permute.xlu0 %1710  ;;  %1977 = vst.msk [vmem:[#allocation3 + $0xb0] sm:$0xff] %vm1954_vm8, %v1903_v50  ;;  %3457 = vmatmul.mubr.f32.gmra.mrb[36].mxu1 %v2394_v51 }
 0x36c   : > { %1784 = vst.msk [vmem:[#allocation3 + $0xb8] sm:$0xff] %vm1760_vm7, %v1711_v46  ;;  %1724 = vrot.lane.b32.xlu1 %v2208_v17, %s3989_s12 }
 0x36d   : > { %1533 = vrot.lane.b32.xlu0 %v2016_v47, %s3987_s10 }
 0x36e   : > { %v1327_v52 = vpop.permute.xlu1 %1326 }
 0x36f   : > { %v1136_v40 = vpop.permute.xlu0 %1135  ;;  %1399 = vst.msk [vmem:[#allocation3 + $0xc0] sm:$0xff] %vm1374_vm5, %v1327_v52  ;;  %v3434_v58 = vpop.f32.mrb[20].mxu1 }
 0x370   : > { %1207 = vst.msk [vmem:[#allocation3 + $0xc8] sm:$0xff] %vm1181_vm4, %v1136_v40  ;;  %1726 = vrot.lane.b32.xlu1 %v2209_v53, %s3989_s12  ;;  %v2520_v62 = vadd.f32 %v3434_v58, %v5086_v28  ;;  %v2514_v60 = vpop.f32.mrb[21].mxu1 }
 0x371   : > { %2302 = vrot.lane.b32.xlu0 %v2209_v53, %s3988_s14  ;;  %v2515_v56 = vadd.f32 %v5086_v28, %v2514_v60 }
 0x372   : > { %v2096_v48 = vpop.permute.xlu1 %2095  ;;  %v2658_v32 = vmax.f32 %v2520_v62, 0.0 }
 0x373   : > { %v1905_v2 = vpop.permute.xlu0 %1904  ;;  %2170 = vst.msk [vmem:[#allocation3 + $0xb0] sm:$0xff] %vm2147_vm9, %v2096_v48  ;;  %v2657_v3 = vmax.f32 %v2515_v56, 0.0 }
 0x374   : > { %1978 = vst.msk [vmem:[#allocation3 + $0xb8] sm:$0xff] %vm1954_vm8, %v1905_v2  ;;  %1920 = vrot.lane.b32.xlu1 %v1825_v1, %s3992_s16 }
 0x375   : > { %1918 = vrot.lane.b32.xlu0 %v1824_v0, %s3992_s16  ;;  %3512 = vmatprep.mubr.f32.mxu0 %v2657_v3 }
 0x376   : > { %v1520_v5 = vpop.permute.xlu1 %1519  ;;  %3513 = vmatmul.mubr.f32.gmra.mrb[20].mxu0 %v2658_v32 }
 0x377   : > { %v1329_v42 = vpop.permute.xlu0 %1328  ;;  %1592 = vst.msk [vmem:[#allocation3 + $0xc0] sm:$0xff] %vm1567_vm6, %v1520_v5 }
 0x378   : > { %1400 = vst.msk [vmem:[#allocation3 + $0xc8] sm:$0xff] %vm1374_vm5, %v1329_v42  ;;  %2113 = vrot.lane.b32.xlu1 %v2018_v59, %s3991_s21 }
 0x379   : > { %2111 = vrot.lane.b32.xlu0 %v2017_v61, %s3991_s21 }
 0x37a   : > { %v2289_v10 = vpop.permute.xlu1 %2288 }
 0x37b   : > { %v2098_v9 = vpop.permute.xlu0 %2097  ;;  %2363 = vst.msk [vmem:[#allocation3 + $0xb0] sm:$0xff] %vm2340_vm10, %v2289_v10 }
 0x37c   : > { %2171 = vst.msk [vmem:[#allocation3 + $0xb8] sm:$0xff] %vm2147_vm9, %v2098_v9  ;;  %2306 = vrot.lane.b32.xlu1 %v2211_v33, %s3988_s14 }
 0x37d   : > { %2304 = vrot.lane.b32.xlu0 %v2210_v8, %s3988_s14  ;;  %s5277_s14 = scalar_lea.vmem [#allocation12], %s3155_s23  ;;  %s3169_s23 = sshll.u32 %s4056_s28, 12 }
 0x37e   : > { %v1522_v11 = vpop.permute.xlu1 %1521  ;;  %s3043_s12 = sshll.u32 %s5277_s14, 4  ;;  %s5388_s16 = scalar_lea.hbm %s5444_s7, %s3169_s23  ;;  %s5390_s12 = int_to_ptr.vmem [resolvable:$true] %s3043_s12 }
 0x37f   : > { %v945_v12 = vpop.permute.xlu0 %944  ;;  %1593 = vst.msk [vmem:[#allocation3 + $0xc8] sm:$0xff] %vm1567_vm6, %v1522_v11  ;;  %s3030_s28 = scalar_lea.sflag [#allocation6], %s4240_s17  ;;  %s3902_s29 = scalar_lea.vmem %s5390_s12, 4096 }
 0x380   : > { %1015 = vst.msk [vmem:[#allocation3 + $0xd0] sm:$0xff] %vm988_vm3, %v945_v12  ;;  %p3903_p10 = scmp.ne.s32.totalorder %s5390_s12, %s3902_s29 }
 0x382   : > { %v2291_v18 = vpop.permute.xlu1 %2290  ;;  %v2395_v21 = vld [vmem:[#allocation3 + $0xb0] sm:$0xff]  ;;  %p3904_p3 = pnand %p3903_p10, %p4189_p5 }
 0x383   : > { %v1713_v15 = vpop.permute.xlu0 %1712  ;;  %2364 = vst.msk [vmem:[#allocation3 + $0xb8] sm:$0xff] %vm2340_vm10, %v2291_v18  ;;  %3459 = vmatprep.mubr.f32.mxu1 %v2395_v21 }
 0x384   : > { %1785 = vst.msk [vmem:[#allocation3 + $0xc0] sm:$0xff] %vm1760_vm7, %v1713_v15  ;;  %p3905_p7 = pneg %p3904_p3 }
 0x386   : > { %v1138_v23 = vpop.permute.xlu1 %1137 }
 0x387   : > { %v947_v55 = vpop.permute.xlu0 %946  ;;  %1208 = vst.msk [vmem:[#allocation3 + $0xd0] sm:$0xff] %vm1181_vm4, %v1138_v23 }
 0x388   : > { %1016 = vst.msk [vmem:[#allocation3 + $0xd8] sm:$0xff] %vm988_vm3, %v947_v55 }
 0x38a   : > { %v1907_v49 = vpop.permute.xlu1 %1906  ;;  %v2396_v31 = vld [vmem:[#allocation3 + $0xb8] sm:$0xff] }
 0x38b   : > { %v1715_v27 = vpop.permute.xlu0 %1714  ;;  %1979 = vst.msk [vmem:[#allocation3 + $0xc0] sm:$0xff] %vm1954_vm8, %v1907_v49  ;;  %3460 = vmatmul.mubr.f32.gmra.mrb[38].mxu1 %v2396_v31 }
 0x38c   : > { %1786 = vst.msk [vmem:[#allocation3 + $0xc8] sm:$0xff] %vm1760_vm7, %v1715_v27 }
 0x38e   : > { %v1331_v35 = vpop.permute.xlu1 %1330 }
 0x38f   : > { %v1140_v34 = vpop.permute.xlu0 %1139  ;;  %1401 = vst.msk [vmem:[#allocation3 + $0xd0] sm:$0xff] %vm1374_vm5, %v1331_v35  ;;  %v3437_v16 = vpop.f32.mrb[22].mxu1 }
 0x390   : > { %1209 = vst.msk [vmem:[#allocation3 + $0xd8] sm:$0xff] %vm1181_vm4, %v1140_v34  ;;  %v2530_v13 = vadd.f32 %v3437_v16, %v5086_v28  ;;  %v2524_v54 = vpop.f32.mrb[23].mxu1 }
 0x391   : > { %v2525_v6 = vadd.f32 %v5086_v28, %v2524_v54 }
 0x392   : > { %v2100_v36 = vpop.permute.xlu1 %2099  ;;  %v2660_v7 = vmax.f32 %v2530_v13, 0.0 }
 0x393   : > { %v1909_v38 = vpop.permute.xlu0 %1908  ;;  %2172 = vst.msk [vmem:[#allocation3 + $0xc0] sm:$0xff] %vm2147_vm9, %v2100_v36  ;;  %v2659_v37 = vmax.f32 %v2525_v6, 0.0 }
 0x394   : > { %1980 = vst.msk [vmem:[#allocation3 + $0xc8] sm:$0xff] %vm1954_vm8, %v1909_v38 }
 0x395   : > { %3515 = vmatprep.mubr.f32.mxu0 %v2659_v37 }
 0x396   : > { %v1524_v63 = vpop.permute.xlu1 %1523  ;;  %3516 = vmatmul.mubr.f32.gmra.mrb[22].mxu0 %v2660_v7 }
 0x397   : > { %v1333_v41 = vpop.permute.xlu0 %1332  ;;  %1594 = vst.msk [vmem:[#allocation3 + $0xd0] sm:$0xff] %vm1567_vm6, %v1524_v63 }
 0x398   : > { %1402 = vst.msk [vmem:[#allocation3 + $0xd8] sm:$0xff] %vm1374_vm5, %v1333_v41 }
 0x39a   : > { %v2293_v19 = vpop.permute.xlu1 %2292 }
 0x39b   : > { %v2102_v30 = vpop.permute.xlu0 %2101  ;;  %2365 = vst.msk [vmem:[#allocation3 + $0xc0] sm:$0xff] %vm2340_vm10, %v2293_v19 }
 0x39c   : > { %2173 = vst.msk [vmem:[#allocation3 + $0xc8] sm:$0xff] %vm2147_vm9, %v2102_v30 }
 0x39e   : > { %v1526_v45 = vpop.permute.xlu1 %1525 }
 0x39f   : > { %v949_v24 = vpop.permute.xlu0 %948  ;;  %1595 = vst.msk [vmem:[#allocation3 + $0xd8] sm:$0xff] %vm1567_vm6, %v1526_v45 }
 0x3a0   : > { %1017 = vst.msk [vmem:[#allocation3 + $0xe0] sm:$0xff] %vm988_vm3, %v949_v24 }
 0x3a2   : > { %v2295_v39 = vpop.permute.xlu1 %2294  ;;  %v2397_v4 = vld [vmem:[#allocation3 + $0xc0] sm:$0xff] }
 0x3a3   : > { %v1717_v57 = vpop.permute.xlu0 %1716  ;;  %2366 = vst.msk [vmem:[#allocation3 + $0xc8] sm:$0xff] %vm2340_vm10, %v2295_v39  ;;  %3462 = vmatprep.mubr.f32.mxu1 %v2397_v4 }
 0x3a4   : > { %1787 = vst.msk [vmem:[#allocation3 + $0xd0] sm:$0xff] %vm1760_vm7, %v1717_v57 }
 0x3a6   : > { %v1142_v20 = vpop.permute.xlu1 %1141 }
 0x3a7   : > { %v951_v14 = vpop.permute.xlu0 %950  ;;  %1210 = vst.msk [vmem:[#allocation3 + $0xe0] sm:$0xff] %vm1181_vm4, %v1142_v20 }
 0x3a8   : > { %1018 = vst.msk [vmem:[#allocation3 + $0xe8] sm:$0xff] %vm988_vm3, %v951_v14 }
 0x3aa   : > { %v1911_v25 = vpop.permute.xlu1 %1910  ;;  %v2398_v26 = vld [vmem:[#allocation3 + $0xc8] sm:$0xff] }
 0x3ab   : > { %v1719_v22 = vpop.permute.xlu0 %1718  ;;  %1981 = vst.msk [vmem:[#allocation3 + $0xd0] sm:$0xff] %vm1954_vm8, %v1911_v25  ;;  %3463 = vmatmul.mubr.f32.gmra.mrb[40].mxu1 %v2398_v26  ;;  %v5267_v26 = vld [vmem:[%s5443_s6] ss:$0 sm:$0xff] }
 0x3ac   : > { %1788 = vst.msk [vmem:[#allocation3 + $0xd8] sm:$0xff] %vm1760_vm7, %v1719_v22 }
 0x3ae   : > { %v1335_v44 = vpop.permute.xlu1 %1334 }
 0x3af   : > { %v1144_v29 = vpop.permute.xlu0 %1143  ;;  %1403 = vst.msk [vmem:[#allocation3 + $0xe0] sm:$0xff] %vm1374_vm5, %v1335_v44  ;;  %v3440_v43 = vpop.f32.mrb[24].mxu1 }
 0x3b0   : > { %1211 = vst.msk [vmem:[#allocation3 + $0xe8] sm:$0xff] %vm1181_vm4, %v1144_v29  ;;  %v2540_v47 = vadd.f32 %v3440_v43, %v5086_v28  ;;  %v2534_v17 = vpop.f32.mrb[25].mxu1 }
 0x3b1   : > { %v2535_v46 = vadd.f32 %v5086_v28, %v2534_v17 }
 0x3b2   : > { %v2104_v51 = vpop.permute.xlu1 %2103  ;;  %v2662_v52 = vmax.f32 %v2540_v47, 0.0 }
 0x3b3   : > { %v1913_v50 = vpop.permute.xlu0 %1912  ;;  %2174 = vst.msk [vmem:[#allocation3 + $0xd0] sm:$0xff] %vm2147_vm9, %v2104_v51  ;;  %v2661_v40 = vmax.f32 %v2535_v46, 0.0 }
 0x3b4   : > { %1982 = vst.msk [vmem:[#allocation3 + $0xd8] sm:$0xff] %vm1954_vm8, %v1913_v50  ;;  %v3756_v50 = vld [vmem:[%s4246_s8 + $0x8] sm:$0xff] }
 0x3b5   : > { %3518 = vmatprep.mubr.f32.mxu0 %v2661_v40  ;;  %v3757_v40 = vld [vmem:[%s4246_s8] sm:$0xff] }
 0x3b6   : > { %v1528_v58 = vpop.permute.xlu1 %1527  ;;  %3519 = vmatmul.mubr.f32.gmra.mrb[24].mxu0 %v2662_v52 }
 0x3b7   : > { %v1337_v53 = vpop.permute.xlu0 %1336  ;;  %1596 = vst.msk [vmem:[#allocation3 + $0xe0] sm:$0xff] %vm1567_vm6, %v1528_v58 }
 0x3b8   : > { %1404 = vst.msk [vmem:[#allocation3 + $0xe8] sm:$0xff] %vm1374_vm5, %v1337_v53 }
 0x3ba   : > { %v2297_v60 = vpop.permute.xlu1 %2296 }
 0x3bb   : > { %v2106_v62 = vpop.permute.xlu0 %2105  ;;  %2367 = vst.msk [vmem:[#allocation3 + $0xd0] sm:$0xff] %vm2340_vm10, %v2297_v60 }
 0x3bc   : > { %2175 = vst.msk [vmem:[#allocation3 + $0xd8] sm:$0xff] %vm2147_vm9, %v2106_v62 }
 0x3be   : > { %v1530_v1 = vpop.permute.xlu1 %1529 }
 0x3bf   : > { %v953_v0 = vpop.permute.xlu0 %952  ;;  %1597 = vst.msk [vmem:[#allocation3 + $0xe8] sm:$0xff] %vm1567_vm6, %v1530_v1 }
 0x3c0   : > { %1019 = vst.msk [vmem:[#allocation3 + $0xf0] sm:$0xff] %vm988_vm3, %v953_v0 }
 0x3c2   : > { %v2299_v2 = vpop.permute.xlu1 %2298  ;;  %v2399_v48 = vld [vmem:[#allocation3 + $0xd0] sm:$0xff] }
 0x3c3   : > { %v1721_v56 = vpop.permute.xlu0 %1720  ;;  %2368 = vst.msk [vmem:[#allocation3 + $0xd8] sm:$0xff] %vm2340_vm10, %v2299_v2  ;;  %3465 = vmatprep.mubr.f32.mxu1 %v2399_v48 }
 0x3c4   : > { %1789 = vst.msk [vmem:[#allocation3 + $0xe0] sm:$0xff] %vm1760_vm7, %v1721_v56 }
 0x3c6   : > { %v1146_v32 = vpop.permute.xlu1 %1145 }
 0x3c7   : > { %v955_v3 = vpop.permute.xlu0 %954  ;;  %1212 = vst.msk [vmem:[#allocation3 + $0xf0] sm:$0xff] %vm1181_vm4, %v1146_v32 }
 0x3c8   : > { %1020 = vst.msk [vmem:[#allocation3 + $0xf8] sm:$0xff] %vm988_vm3, %v955_v3 }
 0x3ca   : > { %v1915_v59 = vpop.permute.xlu1 %1914  ;;  %v2400_v42 = vld [vmem:[#allocation3 + $0xd8] sm:$0xff] }
 0x3cb   : > { %v1723_v61 = vpop.permute.xlu0 %1722  ;;  %1983 = vst.msk [vmem:[#allocation3 + $0xe0] sm:$0xff] %vm1954_vm8, %v1915_v59  ;;  %3466 = vmatmul.mubr.f32.gmra.mrb[42].mxu1 %v2400_v42 }
 0x3cc   : > { %1790 = vst.msk [vmem:[#allocation3 + $0xe8] sm:$0xff] %vm1760_vm7, %v1723_v61 }
 0x3ce   : > { %v1339_v8 = vpop.permute.xlu1 %1338 }
 0x3cf   : > { %v1148_v5 = vpop.permute.xlu0 %1147  ;;  %1405 = vst.msk [vmem:[#allocation3 + $0xf0] sm:$0xff] %vm1374_vm5, %v1339_v8  ;;  %v3443_v33 = vpop.f32.mrb[26].mxu1 }
 0x3d0   : > { %1213 = vst.msk [vmem:[#allocation3 + $0xf8] sm:$0xff] %vm1181_vm4, %v1148_v5  ;;  %v2550_v9 = vadd.f32 %v3443_v33, %v5086_v28  ;;  %v2544_v10 = vpop.f32.mrb[27].mxu1 }
 0x3d1   : > { %v2545_v12 = vadd.f32 %v5086_v28, %v2544_v10  ;;  %v3758_v10 = vld [vmem:[%s4246_s8 + $0x18] sm:$0xff] }
 0x3d2   : > { %v2108_v15 = vpop.permute.xlu1 %2107  ;;  %v2664_v21 = vmax.f32 %v2550_v9, 0.0 }
 0x3d3   : > { %v1917_v11 = vpop.permute.xlu0 %1916  ;;  %2176 = vst.msk [vmem:[#allocation3 + $0xe0] sm:$0xff] %vm2147_vm9, %v2108_v15  ;;  %v2663_v18 = vmax.f32 %v2545_v12, 0.0 }
 0x3d4   : > { %1984 = vst.msk [vmem:[#allocation3 + $0xe8] sm:$0xff] %vm1954_vm8, %v1917_v11  ;;  %v3759_v11 = vld [vmem:[%s4246_s8 + $0x10] sm:$0xff] }
 0x3d5   : > { %3521 = vmatprep.mubr.f32.mxu0 %v2663_v18 }
 0x3d6   : > { %v1532_v23 = vpop.permute.xlu1 %1531  ;;  %3522 = vmatmul.mubr.f32.gmra.mrb[26].mxu0 %v2664_v21 }
 0x3d7   : > { %v1341_v55 = vpop.permute.xlu0 %1340  ;;  %1598 = vst.msk [vmem:[#allocation3 + $0xf0] sm:$0xff] %vm1567_vm6, %v1532_v23 }
 0x3d8   : > { %1406 = vst.msk [vmem:[#allocation3 + $0xf8] sm:$0xff] %vm1374_vm5, %v1341_v55 }
 0x3da   : > { %v2301_v49 = vpop.permute.xlu1 %2300 }
 0x3db   : > { %v2110_v27 = vpop.permute.xlu0 %2109  ;;  %2369 = vst.msk [vmem:[#allocation3 + $0xe0] sm:$0xff] %vm2340_vm10, %v2301_v49 }
 0x3dc   : > { %2177 = vst.msk [vmem:[#allocation3 + $0xe8] sm:$0xff] %vm2147_vm9, %v2110_v27 }
 0x3de   : > { %v1725_v34 = vpop.permute.xlu1 %1724 }
 0x3df   : > { %v1534_v31 = vpop.permute.xlu0 %1533  ;;  %1791 = vst.msk [vmem:[#allocation3 + $0xf0] sm:$0xff] %vm1760_vm7, %v1725_v34 }
 0x3e0   : > { %1599 = vst.msk [vmem:[#allocation3 + $0xf8] sm:$0xff] %vm1567_vm6, %v1534_v31 }
 0x3e2   : > { %v1727_v16 = vpop.permute.xlu1 %1726  ;;  %v2401_v13 = vld [vmem:[#allocation3 + $0xe0] sm:$0xff] }
 0x3e3   : > { %v2303_v35 = vpop.permute.xlu0 %2302  ;;  %1792 = vst.msk [vmem:[#allocation3 + $0xf8] sm:$0xff] %vm1760_vm7, %v1727_v16  ;;  %3468 = vmatprep.mubr.f32.mxu1 %v2401_v13 }
 0x3e4   : > { %2370 = vst.msk [vmem:[#allocation3 + $0xe8] sm:$0xff] %vm2340_vm10, %v2303_v35 }
 0x3e6   : > { %v1921_v6 = vpop.permute.xlu1 %1920 }
 0x3e7   : > { %v1919_v54 = vpop.permute.xlu0 %1918  ;;  %1986 = vst.msk [vmem:[#allocation3 + $0xf8] sm:$0xff] %vm1954_vm8, %v1921_v6  ;;  %v3760_v6 = vld [vmem:[%s4246_s8 + $0x28] sm:$0xff] }
 0x3e8   : > { %1985 = vst.msk [vmem:[#allocation3 + $0xf0] sm:$0xff] %vm1954_vm8, %v1919_v54 }
 0x3ea   : > { %v2114_v36 = vpop.permute.xlu1 %2113 }
 0x3eb   : > { %v2112_v38 = vpop.permute.xlu0 %2111  ;;  %v2402_v37 = vld [vmem:[#allocation3 + $0xe8] sm:$0xff]  ;;  %2179 = vst.msk [vmem:[#allocation3 + $0xf8] sm:$0xff] %vm2147_vm9, %v2114_v36  ;;  %v3761_v36 = vld [vmem:[%s4246_s8 + $0x20] sm:$0xff] }
 0x3ec   : > { %2178 = vst.msk [vmem:[#allocation3 + $0xf0] sm:$0xff] %vm2147_vm9, %v2112_v38  ;;  %3469 = vmatmul.mubr.f32.gmra.mrb[44].mxu1 %v2402_v37 }
 0x3ee   : > { %v2307_v41 = vpop.permute.xlu1 %2306 }
 0x3ef   : > { %v2305_v7 = vpop.permute.xlu0 %2304  ;;  %2372 = vst.msk [vmem:[#allocation3 + $0xf8] sm:$0xff] %vm2340_vm10, %v2307_v41 }
 0x3f0   : > { %2371 = vst.msk [vmem:[#allocation3 + $0xf0] sm:$0xff] %vm2340_vm10, %v2305_v7 }
 0x3f2   : > { %v3446_v63 = vpop.f32.mrb[28].mxu1 }
 0x3f3   : > { %v2560_v30 = vadd.f32 %v3446_v63, %v5086_v28  ;;  %v2554_v19 = vpop.f32.mrb[29].mxu1 }
 0x3f4   : > { %v2555_v24 = vadd.f32 %v5086_v28, %v2554_v19 }
 0x3f5   : > { %v2666_v57 = vmax.f32 %v2560_v30, 0.0 }
 0x3f6   : > { %v2665_v45 = vmax.f32 %v2555_v24, 0.0  ;;  %v2404_v14 = vld [vmem:[#allocation3 + $0xf8] sm:$0xff] }
 0x3f7   : > { %v2403_v4 = vld [vmem:[#allocation3 + $0xf0] sm:$0xff] }
 0x3f8   : > { %3524 = vmatprep.mubr.f32.mxu0 %v2665_v45  ;;  %3471 = vmatprep.mubr.f32.mxu1 %v2403_v4 }
 0x3f9   : > { %v3449_v39 = vpop.f32.mrb[30].mxu1  ;;  %3525 = vmatmul.mubr.f32.gmra.mrb[28].mxu0 %v2666_v57  ;;  %3472 = vmatmul.mubr.f32.gmra.mrb[46].mxu1 %v2404_v14 }
 0x3fa   : > { %v2570_v20 = vadd.f32 %v3449_v39, %v5086_v28  ;;  %v2564_v22 = vpop.f32.mrb[31].mxu1 }
 0x3fb   : > { %v2565_v25 = vadd.f32 %v5086_v28, %v2564_v22  ;;  %v3508_v44 = vpop.f32.mrb[16].mxu0  ;;  %v3762_v22 = vld [vmem:[%s4246_s8 + $0x38] sm:$0xff] }
 0x3fc   : > { %v2668_v43 = vmax.f32 %v2570_v20, 0.0  ;;  %v2780_v47 = vadd.f32 %v3508_v44, %v5267_v26  ;;  %v2774_v17 = vpop.f32.mrb[17].mxu0 }
 0x3fd   : > { %v2667_v29 = vmax.f32 %v2565_v25, 0.0  ;;  %v2775_v46 = vadd.f32 %v5267_v26, %v2774_v17 }
 0x3fe   : > { %v2934_v51 = vadd.f32 %v3756_v50, %v2780_v47 }
 0x3ff   : > { %3527 = vmatprep.mubr.f32.mxu0 %v2667_v29  ;;  %v2933_v52 = vadd.f32 %v3757_v40, %v2775_v46  ;;  %v3763_v29 = vld [vmem:[%s4246_s8 + $0x30] sm:$0xff] }
 0x400   : > { %3528 = vmatmul.mubr.f32.gmra.mrb[30].mxu0 %v2668_v43  ;;  %v3452_v53 = vpop.f32.mrb[32].mxu1  ;;  %v2966_v58 = vmax.f32 %v2934_v51, 0.0 }
 0x401   : > { %v2580_v62 = vadd.f32 %v3452_v53, %v5086_v28  ;;  %v2574_v60 = vpop.f32.mrb[33].mxu1  ;;  %v2965_v0 = vmax.f32 %v2933_v52, 0.0 }
 0x402   : > { %v2575_v1 = vadd.f32 %v5086_v28, %v2574_v60  ;;  %2998 = vst [vmem:[%s5277_s14 + $0x8] sm:$0xff] %v2966_v58 }
 0x403   : > { %2997 = vst [vmem:[%s5277_s14] sm:$0xff] %v2965_v0  ;;  %v2670_v2 = vmax.f32 %v2580_v62, 0.0  ;;  %v3764_v0 = vld [vmem:[%s4246_s8 + $0x48] sm:$0xff] }
 0x404   : > { %v2669_v56 = vmax.f32 %v2575_v1, 0.0 }
 0x406   : > { %3530 = vmatprep.mubr.f32.mxu0 %v2669_v56  ;;  %v3765_v56 = vld [vmem:[%s4246_s8 + $0x40] sm:$0xff] }
 0x407   : > { %3531 = vmatmul.mubr.f32.gmra.mrb[32].mxu0 %v2670_v2 }
 0x41e   : > { %v3455_v48 = vpop.f32.mrb[34].mxu1 }
 0x41f   : > { %v2590_v3 = vadd.f32 %v3455_v48, %v5086_v28  ;;  %v2584_v32 = vpop.f32.mrb[35].mxu1 }
 0x420   : > { %v2585_v61 = vadd.f32 %v5086_v28, %v2584_v32 }
 0x421   : > { %v2672_v42 = vmax.f32 %v2590_v3, 0.0 }
 0x422   : > { %v2671_v59 = vmax.f32 %v2585_v61, 0.0 }
 0x424   : > { %3533 = vmatprep.mubr.f32.mxu0 %v2671_v59 }
 0x425   : > { %3534 = vmatmul.mubr.f32.gmra.mrb[34].mxu0 %v2672_v42 }
 0x429   : > { %v3511_v5 = vpop.f32.mrb[18].mxu0 }
 0x42a   : > { %v2790_v8 = vadd.f32 %v3511_v5, %v5267_v26  ;;  %v2784_v33 = vpop.f32.mrb[19].mxu0 }
 0x42b   : > { %v2785_v9 = vadd.f32 %v5267_v26, %v2784_v33 }
 0x42c   : > { %v2936_v12 = vadd.f32 %v3758_v10, %v2790_v8 }
 0x42d   : > { %v2935_v15 = vadd.f32 %v3759_v11, %v2785_v9  ;;  %v3766_v11 = vld [vmem:[%s4246_s8 + $0x58] sm:$0xff] }
 0x42e   : > { %v2968_v18 = vmax.f32 %v2936_v12, 0.0 }
 0x42f   : > { %v2967_v21 = vmax.f32 %v2935_v15, 0.0 }
 0x430   : > { %3000 = vst [vmem:[%s5277_s14 + $0x18] sm:$0xff] %v2968_v18  ;;  %v3767_v18 = vld [vmem:[%s4246_s8 + $0x50] sm:$0xff] }
 0x431   : > { %2999 = vst [vmem:[%s5277_s14 + $0x10] sm:$0xff] %v2967_v21 }
 0x43e   : > { %v3458_v55 = vpop.f32.mrb[36].mxu1 }
 0x43f   : > { %v2600_v23 = vadd.f32 %v3458_v55, %v5086_v28  ;;  %v2594_v27 = vpop.f32.mrb[37].mxu1 }
 0x440   : > { %v2595_v49 = vadd.f32 %v5086_v28, %v2594_v27 }
 0x441   : > { %v2674_v34 = vmax.f32 %v2600_v23, 0.0 }
 0x442   : > { %v2673_v31 = vmax.f32 %v2595_v49, 0.0 }
 0x444   : > { %3536 = vmatprep.mubr.f32.mxu0 %v2673_v31 }
 0x445   : > { %3537 = vmatmul.mubr.f32.gmra.mrb[36].mxu0 %v2674_v34 }
 0x449   : > { %v3514_v35 = vpop.f32.mrb[20].mxu0 }
 0x44a   : > { %v2800_v16 = vadd.f32 %v3514_v35, %v5267_v26  ;;  %v2794_v13 = vpop.f32.mrb[21].mxu0 }
 0x44b   : > { %v2795_v54 = vadd.f32 %v5267_v26, %v2794_v13 }
 0x44c   : > { %v2938_v38 = vadd.f32 %v3760_v6, %v2800_v16 }
 0x44d   : > { %v2937_v37 = vadd.f32 %v3761_v36, %v2795_v54 }
 0x44e   : > { %v2970_v7 = vmax.f32 %v2938_v38, 0.0 }
 0x44f   : > { %v2969_v41 = vmax.f32 %v2937_v37, 0.0 }
 0x450   : > { %3002 = vst [vmem:[%s5277_s14 + $0x28] sm:$0xff] %v2970_v7 }
 0x451   : > { %3001 = vst [vmem:[%s5277_s14 + $0x20] sm:$0xff] %v2969_v41  ;;  %v3768_v41 = vld [vmem:[%s4246_s8 + $0x68] sm:$0xff] }
 0x45e   : > { %v3461_v63 = vpop.f32.mrb[38].mxu1 }
 0x45f   : > { %v2610_v30 = vadd.f32 %v3461_v63, %v5086_v28  ;;  %v2604_v19 = vpop.f32.mrb[39].mxu1 }
 0x460   : > { %v2605_v24 = vadd.f32 %v5086_v28, %v2604_v19  ;;  %v3769_v19 = vld [vmem:[%s4246_s8 + $0x60] sm:$0xff] }
 0x461   : > { %v2676_v57 = vmax.f32 %v2610_v30, 0.0 }
 0x462   : > { %v2675_v45 = vmax.f32 %v2605_v24, 0.0 }
 0x464   : > { %3539 = vmatprep.mubr.f32.mxu0 %v2675_v45 }
 0x465   : > { %3540 = vmatmul.mubr.f32.gmra.mrb[38].mxu0 %v2676_v57 }
 0x469   : > { %v3517_v39 = vpop.f32.mrb[22].mxu0 }
 0x46a   : > { %v2810_v4 = vadd.f32 %v3517_v39, %v5267_v26  ;;  %v2804_v14 = vpop.f32.mrb[23].mxu0 }
 0x46b   : > { %v2805_v20 = vadd.f32 %v5267_v26, %v2804_v14 }
 0x46c   : > { %v2940_v25 = vadd.f32 %v3762_v22, %v2810_v4 }
 0x46d   : > { %v2939_v44 = vadd.f32 %v3763_v29, %v2805_v20 }
 0x46e   : > { %v2972_v43 = vmax.f32 %v2940_v25, 0.0 }
 0x46f   : > { %v2971_v47 = vmax.f32 %v2939_v44, 0.0  ;;  %v3771_v44 = vld [vmem:[%s4246_s8 + $0x70] sm:$0xff] }
 0x470   : > { %3004 = vst [vmem:[%s5277_s14 + $0x38] sm:$0xff] %v2972_v43 }
 0x471   : > { %3003 = vst [vmem:[%s5277_s14 + $0x30] sm:$0xff] %v2971_v47 }
 0x47e   : > { %v3464_v17 = vpop.f32.mrb[40].mxu1 }
 0x47f   : > { %v2620_v46 = vadd.f32 %v3464_v17, %v5086_v28  ;;  %v2614_v50 = vpop.f32.mrb[41].mxu1 }
 0x480   : > { %v2615_v51 = vadd.f32 %v5086_v28, %v2614_v50 }
 0x481   : > { %v2678_v52 = vmax.f32 %v2620_v46, 0.0 }
 0x482   : > { %v2677_v40 = vmax.f32 %v2615_v51, 0.0 }
 0x484   : > { %3542 = vmatprep.mubr.f32.mxu0 %v2677_v40 }
 0x485   : > { %3543 = vmatmul.mubr.f32.gmra.mrb[40].mxu0 %v2678_v52  ;;  %v3772_v52 = vld [vmem:[%s4246_s8 + $0x88] sm:$0xff] }
 0x489   : > { %v3520_v53 = vpop.f32.mrb[24].mxu0 }
 0x48a   : > { %v2820_v58 = vadd.f32 %v3520_v53, %v5267_v26  ;;  %v2814_v62 = vpop.f32.mrb[25].mxu0 }
 0x48b   : > { %v2815_v60 = vadd.f32 %v5267_v26, %v2814_v62 }
 0x48c   : > { %v2942_v1 = vadd.f32 %v3764_v0, %v2820_v58  ;;  %v3773_v58 = vld [vmem:[%s4246_s8 + $0x80] sm:$0xff] }
 0x48d   : > { %v2941_v2 = vadd.f32 %v3765_v56, %v2815_v60 }
 0x48e   : > { %v2974_v48 = vmax.f32 %v2942_v1, 0.0 }
 0x48f   : > { %v2973_v3 = vmax.f32 %v2941_v2, 0.0 }
 0x490   : > { %3006 = vst [vmem:[%s5277_s14 + $0x48] sm:$0xff] %v2974_v48 }
 0x491   : > { %3005 = vst [vmem:[%s5277_s14 + $0x40] sm:$0xff] %v2973_v3  ;;  %v3774_v3 = vld [vmem:[%s4246_s8 + $0x98] sm:$0xff] }
 0x49e   : > { %v3467_v32 = vpop.f32.mrb[42].mxu1 }
 0x49f   : > { %v2630_v61 = vadd.f32 %v3467_v32, %v5086_v28  ;;  %v2624_v59 = vpop.f32.mrb[43].mxu1 }
 0x4a0   : > { %v2625_v42 = vadd.f32 %v5086_v28, %v2624_v59 }
 0x4a1   : > { %v2680_v8 = vmax.f32 %v2630_v61, 0.0  ;;  %v3775_v61 = vld [vmem:[%s4246_s8 + $0x90] sm:$0xff] }
 0x4a2   : > { %v2679_v5 = vmax.f32 %v2625_v42, 0.0 }
 0x4a4   : > { %3545 = vmatprep.mubr.f32.mxu0 %v2679_v5 }
 0x4a5   : > { %3546 = vmatmul.mubr.f32.gmra.mrb[42].mxu0 %v2680_v8 }
 0x4a9   : > { %v3523_v33 = vpop.f32.mrb[26].mxu0 }
 0x4aa   : > { %v2830_v9 = vadd.f32 %v3523_v33, %v5267_v26  ;;  %v2824_v10 = vpop.f32.mrb[27].mxu0 }
 0x4ab   : > { %v2825_v12 = vadd.f32 %v5267_v26, %v2824_v10 }
 0x4ac   : > { %v2944_v15 = vadd.f32 %v3766_v11, %v2830_v9 }
 0x4ad   : > { %v2943_v21 = vadd.f32 %v3767_v18, %v2825_v12  ;;  %v3776_v12 = vld [vmem:[%s4246_s8 + $0xa8] sm:$0xff] }
 0x4ae   : > { %v2976_v55 = vmax.f32 %v2944_v15, 0.0  ;;  %v3777_v15 = vld [vmem:[%s4246_s8 + $0xa0] sm:$0xff] }
 0x4af   : > { %v2975_v23 = vmax.f32 %v2943_v21, 0.0 }
 0x4b0   : > { %3008 = vst [vmem:[%s5277_s14 + $0x58] sm:$0xff] %v2976_v55 }
 0x4b1   : > { %3007 = vst [vmem:[%s5277_s14 + $0x50] sm:$0xff] %v2975_v23 }
 0x4bf   : > { %v3470_v27 = vpop.f32.mrb[44].mxu1 }
 0x4c0   : > { %v2640_v49 = vadd.f32 %v3470_v27, %v5086_v28  ;;  %v2634_v31 = vpop.f32.mrb[45].mxu1 }
 0x4c1   : > { %v2635_v34 = vadd.f32 %v5086_v28, %v2634_v31 }
 0x4c2   : > { %v2682_v16 = vmax.f32 %v2640_v49, 0.0 }
 0x4c3   : > { %v2681_v35 = vmax.f32 %v2635_v34, 0.0  ;;  %v3778_v34 = vld [vmem:[%s4246_s8 + $0xb8] sm:$0xff] }
 0x4c5   : > { %3548 = vmatprep.mubr.f32.mxu0 %v2681_v35 }
 0x4c6   : > { %3549 = vmatmul.mubr.f32.gmra.mrb[44].mxu0 %v2682_v16  ;;  %v3779_v16 = vld [vmem:[%s4246_s8 + $0xb0] sm:$0xff] }
 0x4cc   : > { %v3526_v13 = vpop.f32.mrb[28].mxu0  ;;  %v3473_v38 = vpop.f32.mrb[46].mxu1 }
 0x4cd   : > { %v2840_v54 = vadd.f32 %v3526_v13, %v5267_v26  ;;  %v2834_v6 = vpop.f32.mrb[29].mxu0  ;;  %v2650_v37 = vadd.f32 %v3473_v38, %v5086_v28  ;;  %v2644_v7 = vpop.f32.mrb[47].mxu1 }
 0x4ce   : > { %v2835_v36 = vadd.f32 %v5267_v26, %v2834_v6  ;;  %v2645_v30 = vadd.f32 %v5086_v28, %v2644_v7  ;;  %v3770_v28 = vld [vmem:[%s4246_s8 + $0x78] sm:$0xff] }
 0x4cf   : > { %v2946_v63 = vadd.f32 %v3768_v41, %v2840_v54  ;;  %v2684_v4 = vmax.f32 %v2650_v37, 0.0  ;;  %v3780_v41 = vld [vmem:[%s4246_s8 + $0xc8] sm:$0xff] }
 0x4d0   : > { %v2945_v24 = vadd.f32 %v3769_v19, %v2835_v36  ;;  %v2683_v57 = vmax.f32 %v2645_v30, 0.0  ;;  %v3781_v30 = vld [vmem:[%s4246_s8 + $0xc0] sm:$0xff] }
 0x4d1   : > { %v2978_v45 = vmax.f32 %v2946_v63, 0.0 }
 0x4d2   : > { %v2977_v39 = vmax.f32 %v2945_v24, 0.0  ;;  %3551 = vmatprep.mubr.f32.mxu0 %v2683_v57 }
 0x4d3   : > { %v3529_v14 = vpop.f32.mrb[30].mxu0  ;;  %3010 = vst [vmem:[%s5277_s14 + $0x68] sm:$0xff] %v2978_v45  ;;  %3552 = vmatmul.mubr.f32.gmra.mrb[46].mxu0 %v2684_v4 }
 0x4d4   : > { %v2850_v20 = vadd.f32 %v3529_v14, %v5267_v26  ;;  %v2844_v22 = vpop.f32.mrb[31].mxu0  ;;  %3009 = vst [vmem:[%s5277_s14 + $0x60] sm:$0xff] %v2977_v39 }
 0x4d5   : > { %v2845_v25 = vadd.f32 %v5267_v26, %v2844_v22 }
 0x4d6   : > { %v2948_v29 = vadd.f32 %v3770_v28, %v2850_v20  ;;  %v3782_v20 = vld [vmem:[%s4246_s8 + $0xd8] sm:$0xff] }
 0x4d7   : > { %v2947_v43 = vadd.f32 %v3771_v44, %v2845_v25  ;;  %v3783_v25 = vld [vmem:[%s4246_s8 + $0xd0] sm:$0xff] }
 0x4d8   : > { %v2980_v47 = vmax.f32 %v2948_v29, 0.0 }
 0x4d9   : > { %v2979_v17 = vmax.f32 %v2947_v43, 0.0 }
 0x4da   : > { %3012 = vst [vmem:[%s5277_s14 + $0x78] sm:$0xff] %v2980_v47  ;;  %v3532_v46 = vpop.f32.mrb[32].mxu0 }
 0x4db   : > { %3011 = vst [vmem:[%s5277_s14 + $0x70] sm:$0xff] %v2979_v17  ;;  %v2860_v50 = vadd.f32 %v3532_v46, %v5267_v26  ;;  %v2854_v51 = vpop.f32.mrb[33].mxu0 }
 0x4dc   : > { %v2855_v40 = vadd.f32 %v5267_v26, %v2854_v51 }
 0x4dd   : > { %v2950_v53 = vadd.f32 %v3772_v52, %v2860_v50  ;;  %v3784_v50 = vld [vmem:[%s4246_s8 + $0xe8] sm:$0xff] }
 0x4de   : > { %v2949_v62 = vadd.f32 %v3773_v58, %v2855_v40  ;;  %v3785_v40 = vld [vmem:[%s4246_s8 + $0xe0] sm:$0xff] }
 0x4df   : > { %v2982_v60 = vmax.f32 %v2950_v53, 0.0 }
 0x4e0   : > { %v2981_v0 = vmax.f32 %v2949_v62, 0.0 }
 0x4e1   : > { %3014 = vst [vmem:[%s5277_s14 + $0x88] sm:$0xff] %v2982_v60 }
 0x4e2   : > { %3013 = vst [vmem:[%s5277_s14 + $0x80] sm:$0xff] %v2981_v0 }
 0x4f8   : > { %v3535_v1 = vpop.f32.mrb[34].mxu0 }
 0x4f9   : > { %v2870_v56 = vadd.f32 %v3535_v1, %v5267_v26  ;;  %v2864_v2 = vpop.f32.mrb[35].mxu0 }
 0x4fa   : > { %v2865_v48 = vadd.f32 %v5267_v26, %v2864_v2 }
 0x4fb   : > { %v2952_v32 = vadd.f32 %v3774_v3, %v2870_v56  ;;  %v3786_v56 = vld [vmem:[%s4246_s8 + $0xf8] sm:$0xff] }
 0x4fc   : > { %v2951_v59 = vadd.f32 %v3775_v61, %v2865_v48  ;;  %v3787_v48 = vld [vmem:[%s4246_s8 + $0xf0] sm:$0xff]  ;;  %s3993_s8 = smov [#allocation12]  }
 0x4fd   : > { %v2984_v42 = vmax.f32 %v2952_v32, 0.0  ;;  %s3906_s11 = sshll.u32 %s3993_s8, 4  ;;  %s3907_s11 = int_to_ptr.vmem [resolvable:$false] %s3906_s11 }
 0x4fe   : > { %v2983_v5 = vmax.f32 %v2951_v59, 0.0  ;;  %s3908_s13 = scalar_lea.vmem %s3907_s11, 8192  ;;  %p3909_p12 = scmp.lt.s32.totalorder %s5390_s12, %s3907_s11 }
 0x4ff   : > { %3016 = vst [vmem:[%s5277_s14 + $0x98] sm:$0xff] %v2984_v42  ;;  %p3910_p1 = scmp.lt.s32.totalorder %s3908_s13, %s3902_s29 }
 0x500   : > { %3015 = vst [vmem:[%s5277_s14 + $0x90] sm:$0xff] %v2983_v5 }
 0x501   : > { %p3911_p2 = por %p3910_p1, %p3909_p12 }
 0x503   : > { %p3912_p4 = pnand %p3911_p2, %p3905_p7 }
 0x518   : > { %v3538_v8 = vpop.f32.mrb[36].mxu0 }
 0x519   : > { %v2880_v33 = vadd.f32 %v3538_v8, %v5267_v26  ;;  %v2874_v9 = vpop.f32.mrb[37].mxu0 }
 0x51a   : > { %v2875_v10 = vadd.f32 %v5267_v26, %v2874_v9 }
 0x51b   : > { %v2954_v11 = vadd.f32 %v3776_v12, %v2880_v33 }
 0x51c   : > { %v2953_v18 = vadd.f32 %v3777_v15, %v2875_v10 }
 0x51d   : > { %v2986_v21 = vmax.f32 %v2954_v11, 0.0 }
 0x51e   : > { %v2985_v55 = vmax.f32 %v2953_v18, 0.0 }
 0x51f   : > { %3018 = vst [vmem:[%s5277_s14 + $0xa8] sm:$0xff] %v2986_v21 }
 0x520   : > { %3017 = vst [vmem:[%s5277_s14 + $0xa0] sm:$0xff] %v2985_v55 }
 0x538   : > { %v3541_v23 = vpop.f32.mrb[38].mxu0 }
 0x539   : > { %v2890_v27 = vadd.f32 %v3541_v23, %v5267_v26  ;;  %v2884_v49 = vpop.f32.mrb[39].mxu0 }
 0x53a   : > { %v2885_v31 = vadd.f32 %v5267_v26, %v2884_v49 }
 0x53b   : > { %v2956_v35 = vadd.f32 %v3778_v34, %v2890_v27 }
 0x53c   : > { %v2955_v13 = vadd.f32 %v3779_v16, %v2885_v31 }
 0x53d   : > { %v2988_v54 = vmax.f32 %v2956_v35, 0.0 }
 0x53e   : > { %v2987_v6 = vmax.f32 %v2955_v13, 0.0 }
 0x53f   : > { %3020 = vst [vmem:[%s5277_s14 + $0xb8] sm:$0xff] %v2988_v54 }
 0x540   : > { %3019 = vst [vmem:[%s5277_s14 + $0xb0] sm:$0xff] %v2987_v6 }
 0x558   : > { %v3544_v38 = vpop.f32.mrb[40].mxu0 }
 0x559   : > { %v2900_v36 = vadd.f32 %v3544_v38, %v5267_v26  ;;  %v2894_v37 = vpop.f32.mrb[41].mxu0 }
 0x55a   : > { %v2895_v7 = vadd.f32 %v5267_v26, %v2894_v37 }
 0x55b   : > { %v2958_v63 = vadd.f32 %v3780_v41, %v2900_v36 }
 0x55c   : > { %v2957_v19 = vadd.f32 %v3781_v30, %v2895_v7 }
 0x55d   : > { %v2990_v24 = vmax.f32 %v2958_v63, 0.0 }
 0x55e   : > { %v2989_v45 = vmax.f32 %v2957_v19, 0.0 }
 0x55f   : > { %3022 = vst [vmem:[%s5277_s14 + $0xc8] sm:$0xff] %v2990_v24 }
 0x560   : > { %3021 = vst [vmem:[%s5277_s14 + $0xc0] sm:$0xff] %v2989_v45 }
 0x578   : > { %v3547_v57 = vpop.f32.mrb[42].mxu0 }
 0x579   : > { %v2910_v39 = vadd.f32 %v3547_v57, %v5267_v26  ;;  %v2904_v4 = vpop.f32.mrb[43].mxu0 }
 0x57a   : > { %v2905_v14 = vadd.f32 %v5267_v26, %v2904_v4 }
 0x57b   : > { %v2960_v22 = vadd.f32 %v3782_v20, %v2910_v39 }
 0x57c   : > { %v2959_v28 = vadd.f32 %v3783_v25, %v2905_v14 }
 0x57d   : > { %v2992_v29 = vmax.f32 %v2960_v22, 0.0 }
 0x57e   : > { %v2991_v44 = vmax.f32 %v2959_v28, 0.0 }
 0x57f   : > { %3024 = vst [vmem:[%s5277_s14 + $0xd8] sm:$0xff] %v2992_v29 }
 0x580   : > { %3023 = vst [vmem:[%s5277_s14 + $0xd0] sm:$0xff] %v2991_v44 }
 0x599   : > { %v3550_v43 = vpop.f32.mrb[44].mxu0 }
 0x59a   : > { %v2920_v47 = vadd.f32 %v3550_v43, %v5267_v26  ;;  %v2914_v17 = vpop.f32.mrb[45].mxu0 }
 0x59b   : > { %v2915_v46 = vadd.f32 %v5267_v26, %v2914_v17 }
 0x59c   : > { %v2962_v51 = vadd.f32 %v3784_v50, %v2920_v47 }
 0x59d   : > { %v2961_v52 = vadd.f32 %v3785_v40, %v2915_v46 }
 0x59e   : > { %v2994_v53 = vmax.f32 %v2962_v51, 0.0 }
 0x59f   : > { %v2993_v58 = vmax.f32 %v2961_v52, 0.0 }
 0x5a0   : > { %3026 = vst [vmem:[%s5277_s14 + $0xe8] sm:$0xff] %v2994_v53 }
 0x5a1   : > { %3025 = vst [vmem:[%s5277_s14 + $0xe0] sm:$0xff] %v2993_v58 }
 0x5a6   : > { %v3553_v62 = vpop.f32.mrb[46].mxu0 }
 0x5a7   : > { %v2930_v60 = vadd.f32 %v3553_v62, %v5267_v26  ;;  %v2924_v0 = vpop.f32.mrb[47].mxu0 }
 0x5a8   : > { %v2925_v1 = vadd.f32 %v5267_v26, %v2924_v0 }
 0x5a9   : > { %v2964_v2 = vadd.f32 %v3786_v56, %v2930_v60 }
 0x5aa   : > { %v2963_v3 = vadd.f32 %v3787_v48, %v2925_v1 }
 0x5ab   : > { %v2996_v32 = vmax.f32 %v2964_v2, 0.0 }
 0x5ac   : > { %v2995_v61 = vmax.f32 %v2963_v3, 0.0 }
 0x5ad   : > { %3028 = vst [vmem:[%s5277_s14 + $0xf8] sm:$0xff] %v2996_v32 }
 0x5ae   : > { %3027 = vst [vmem:[%s5277_s14 + $0xf0] sm:$0xff] %v2995_v61 }
 0x5af   : > { %3915 = shalt.err (!%p3912_p4)
}
 0x5b0   : > { %s3916_s15 = scalar_lea.hbm %s5388_s16, 4096  ;;  %s3920_s14 = scalar_lea.hbm %s5444_s7, 8192 }
 0x5b1   : > { %p3917_p9 = scmp.ne.s32.totalorder %s5388_s16, %s3916_s15  ;;  %p3921_p8 = scmp.lt.u32.totalorder %s5388_s16, %s5444_s7 }
 0x5b2   : > { %p3922_p13 = scmp.lt.u32.totalorder %s3920_s14, %s3916_s15  ;;  %p3924_p10 = scmp.lt.u32.totalorder %s3916_s15, %s5388_s16 }
 0x5b3   : > { %p3918_p0 = pnand %p3917_p9, %p4189_p5 }
 0x5b4   : > { %p3923_p6 = por %p3922_p13, %p3921_p8 }
 0x5b5   : > { %p3919_p11 = pneg %p3918_p0 }
 0x5b6   : > { %p3925_p3 = por %p3924_p10, %p3923_p6 }
 0x5b8   : > { %p3926_p7 = pnand %p3925_p3, %p3919_p11 }
 0x5ba   : > { %3929 = shalt.err (!%p3926_p7)
}
 0x5bb   : > { %s3994_s21 = smov 128  }
 0x5bc   : > { %3680 = dma.vmem_to_hbm [thread:$0]  (%p4189_p5), %s5390_s12, 4096, %s5388_s16, %s3030_s28, %s3994_s21, %s3994_s21, %s3985_s30  }
 0x5bd PF: > { %s5464_s29 = sld [smem:[#allocation17_spill]]  ;;  %s3058_s8 = sand.u32 1, %s3964_s24  }
 0x5be   : > { %p5466_p1 = scmp.ge.s32.totalorder %s3976_s27, 2  ;;  %s3059_s11 = scalar_lea.sflag [#allocation6], %s3058_s8 }
 0x5c3   : > { %p5465_p12 = scmp.ne.s32.totalorder %s5464_s29, 0 }
 0x5c5   : > { %p3697_p2 = pnand %p5466_p1, %p5465_p12 }
 0x5c7   : > { %3959 = dma.done.wait (!%p3697_p2), %s3059_s11, 4096  }
 0x5c8   : > { %3961 = vsyncadd (!%p3697_p2), %s3059_s11, 4294963200  ;;  %p22_p4 = scmp.ge.s32.totalorder %s4175_s22, 4   ;;  %s5467_s24 = smov %s3968_s25 }
 0x5c9   : > { %s5468_s25 = smov %s3972_s26  ;;  %s5469_s26 = smov %s4185_s18 }
 0x5ca   : > { %s5470_s27 = smov %s4175_s22  ;;  %24 = sbr.rel (!%p22_p4) target bundleno = 7 (0x7), region = 108 }
 0x5d1   :  { %3064 = vsyncpa [#allocation5], 1 }
 0x5d2   :  { %3066 = vsyncpa [#allocation5 + $0x1], 1 }
 0x5d3   :  { %3067 = vsyncpa [#allocation8], 1 }
 0x5d4   :  { %3068 = vsyncpa [#allocation11], 1 }
 0x5d5   :  { %3069 = vsyncpa [#allocation6], 1 }
 0x5d6   :  { %3071 = vsyncpa [#allocation6 + $0x1], 1 }

</bundles_post_ra>
